<compile_context>
chip_gen: v7x
topology: tpu7x:2x2x1
jax: 0.10.0
libtpu: 0.0.40
codegen_flags: <defaults>
</compile_context>

<pallas_src>
import math

import jax
import jax.numpy as jnp
from jax import lax
from jax.experimental import pallas as pl
from jax.experimental.pallas import tpu as pltpu

# ---------------- problem sizes (small, consistent with the module) ----------
B, N, D = 2, 64, 32          # batch, sequence length, hidden_channels
H = 4                        # num_heads
HD = D // H                  # head dim
MID = 64                     # mid_dim of the channel mixer
EPS = 1e-5
ROWS = B * N                 # tokens flattened across batch


def _layernorm(x, w, b):
    # single-pass statistics: var = E[x^2] - mean^2
    s1 = jnp.sum(x, axis=-1, keepdims=True)
    s2 = jnp.sum(x * x, axis=-1, keepdims=True)
    mean = s1 * (1.0 / D)
    var = s2 * (1.0 / D) - mean * mean
    return (x - mean) * lax.rsqrt(var + EPS) * w + b


def _make_kernel(bpb):
    """bpb = batches per grid block; attention is block-diagonal over batches."""

    def kernel(x_ref, vd_ref, wqkv_ref, wo_ref, w12_ref, w3_ref, vw_ref, o_ref):
        x = x_ref[...].astype(jnp.float32)                  # (bpb*N, D)

        vd = vd_ref[...]                                    # (6, D)
        tnw, tnb = vd[0:1, :], vd[1:2, :]
        cnw, cnb = vd[2:3, :], vd[3:4, :]
        bo, b3 = vd[4:5, :], vd[5:6, :]
        vw = vw_ref[...]                                    # (2, 2*MID)
        bqkv = vw[0:1, : 3 * D]                             # (1, 3D)
        b12 = vw[1:2, :]                                    # (1, 2*MID)

        # -------- token mixer: pre-norm MHA (scale pre-folded into Wq/bq) -----
        xn = _layernorm(x, tnw, tnb)
        qkv = jnp.dot(xn, wqkv_ref[...],
                      preferred_element_type=jnp.float32) + bqkv   # (rows, 3D)

        bo_full = jnp.broadcast_to(bo, (N, D)).astype(jnp.float32)  # hoisted
        attn_blocks = []
        for b in range(bpb):                                # static unroll
            rs = slice(b * N, (b + 1) * N)
            acc = bo_full
            for h in range(H):                              # static unroll
                q0 = h * HD
                qh = qkv[rs, q0:q0 + HD]
                kh = qkv[rs, D + q0:D + q0 + HD]
                vh = qkv[rs, 2 * D + q0:2 * D + q0 + HD]
                # contract last dims of both operands (no explicit transpose)
                s = lax.dot_general(qh, kh, (((1,), (1,)), ((), ())),
                                    preferred_element_type=jnp.float32)  # (N, N)
                s = s - jnp.max(s, axis=-1, keepdims=True)
                p = jnp.exp(s)
                p = p * pl.reciprocal(jnp.sum(p, axis=-1, keepdims=True),
                                      approx=True)
                pv = jnp.dot(p, vh, preferred_element_type=jnp.float32)  # (N, HD)
                # fold output projection per head -> no lane-axis head concat
                acc = acc + jnp.dot(pv, wo_ref[q0:q0 + HD, :],
                                    preferred_element_type=jnp.float32)
            attn_blocks.append(acc)
        attn = attn_blocks[0] if bpb == 1 else jnp.concatenate(attn_blocks, axis=0)
        x = x + attn

        # -------- channel mixer: pre-norm GLU (W1|W2 fused, 128-lane result) --
        xn2 = _layernorm(x, cnw, cnb)
        ug = jnp.dot(xn2, w12_ref[...],
                     preferred_element_type=jnp.float32) + b12      # (rows, 2*MID)
        u = ug[:, :MID]
        g = ug[:, MID:]
        hidden = (u * jax.nn.sigmoid(u)) * g                        # silu(u) * g
        x = x + jnp.dot(hidden, w3_ref[...],
                        preferred_element_type=jnp.float32) + b3

        o_ref[...] = x.astype(o_ref.dtype)

    return kernel


def _grid_size():
    """1 grid step (batch collapsed) on single-TC chips; B steps on v7x (2 TCs)."""
    try:
        kind = jax.devices()[0].device_kind.lower()
    except Exception:
        kind = ""
    if "v7" in kind or "7x" in kind:
        return B
    return 1


def _full_spec(shape):
    nd = len(shape)
    return pl.BlockSpec(shape, lambda i, _nd=nd: (0,) * _nd)


def transformer_layer(x, params):
    """x: (B, N, D) float32. params: tuple of unfused weights. Returns (B, N, D)."""
    (tnw, tnb, wq, bq, wk, bk, wv, bv, wo, bo,
     cnw, cnb, w1, b1, w2, b2, w3, b3) = params

    # ---- wrapper-side fusion / packing (pure layout, no extra kernel work) ---
    scale = 1.0 / math.sqrt(HD)
    wqkv = jnp.concatenate([wq * scale, wk, wv], axis=1)         # (D, 3D)
    bqkv = jnp.concatenate([bq * scale, bk, bv], axis=1)         # (1, 3D)
    w12 = jnp.concatenate([w1, w2], axis=1)                      # (D, 2*MID)=(32,128)
    b12 = jnp.concatenate([b1, b2], axis=1)                      # (1, 128)
    vecs_d = jnp.concatenate([tnw, tnb, cnw, cnb, bo, b3], axis=0)   # (6, D)
    bqkv_pad = jnp.pad(bqkv, ((0, 0), (0, 2 * MID - 3 * D)))     # (1, 128)
    vecs_w = jnp.concatenate([bqkv_pad, b12], axis=0)            # (2, 128)

    G = _grid_size()
    RPB = ROWS // G          # rows per grid block
    BPB = B // G             # batches per grid block

    kernel = _make_kernel(BPB)

    in_specs = [
        pl.BlockSpec((RPB, D), lambda i: (i, 0)),
        _full_spec(vecs_d.shape),
        _full_spec(wqkv.shape),
        _full_spec(wo.shape),
        _full_spec(w12.shape),
        _full_spec(w3.shape),
        _full_spec(vecs_w.shape),
    ]

    out = pl.pallas_call(
        kernel,
        out_shape=jax.ShapeDtypeStruct((ROWS, D), x.dtype),
        grid_spec=pltpu.PrefetchScalarGridSpec(
            num_scalar_prefetch=0,
            grid=(G,),
            in_specs=in_specs,
            out_specs=pl.BlockSpec((RPB, D), lambda i: (i, 0)),
        ),
        compiler_params=pltpu.CompilerParams(
            dimension_semantics=("parallel",)),
    )(x.reshape(ROWS, D), vecs_d, wqkv, wo, w12, w3, vecs_w)

    return out.reshape(B, N, D)


# ----------------------- pure-JAX reference (for checking) -------------------
def reference(x, params):
    (tnw, tnb, wq, bq, wk, bk, wv, bv, wo, bo,
     cnw, cnb, w1, b1, w2, b2, w3, b3) = params

    def ln(v, w, b):
        mu = jnp.mean(v, axis=-1, keepdims=True)
        var = jnp.mean((v - mu) ** 2, axis=-1, keepdims=True)
        return (v - mu) * jax.lax.rsqrt(var + EPS) * w[0] + b[0]

    xn = ln(x, tnw, tnb)
    q = xn @ wq + bq[0]
    k = xn @ wk + bk[0]
    v = xn @ wv + bv[0]
    q = q.reshape(B, N, H, HD).transpose(0, 2, 1, 3)
    k = k.reshape(B, N, H, HD).transpose(0, 2, 1, 3)
    v = v.reshape(B, N, H, HD).transpose(0, 2, 1, 3)
    s = jnp.einsum("bhnd,bhmd->bhnm", q, k) / (HD ** 0.5)
    p = jax.nn.softmax(s, axis=-1)
    attn = jnp.einsum("bhnm,bhmd->bhnd", p, v).transpose(0, 2, 1, 3).reshape(B, N, D)
    x = x + attn @ wo + bo[0]

    xn2 = ln(x, cnw, cnb)
    u = xn2 @ w1 + b1[0]
    g = xn2 @ w2 + b2[0]
    x = x + (jax.nn.silu(u) * g) @ w3 + b3[0]
    return x


def make_params(key):
    ks = jax.random.split(key, 10)
    std = 0.02
    p = (
        jnp.ones((1, D), jnp.float32),                                 # token_norm gamma
        jnp.zeros((1, D), jnp.float32),                                # token_norm beta
        std * jax.random.normal(ks[0], (D, D), jnp.float32),           # Wq
        std * jax.random.normal(ks[1], (1, D), jnp.float32),           # bq
        std * jax.random.normal(ks[2], (D, D), jnp.float32),           # Wk
        jnp.zeros((1, D), jnp.float32),                                # bk
        std * jax.random.normal(ks[3], (D, D), jnp.float32),           # Wv
        jnp.zeros((1, D), jnp.float32),                                # bv
        std * jax.random.normal(ks[4], (D, D), jnp.float32),           # Wo
        jnp.zeros((1, D), jnp.float32),                                # bo
        jnp.ones((1, D), jnp.float32),                                 # channel_norm gamma
        jnp.zeros((1, D), jnp.float32),                                # channel_norm beta
        std * jax.random.normal(ks[5], (D, MID), jnp.float32),         # W1 (up)
        std * jax.random.normal(ks[6], (1, MID), jnp.float32),         # b1
        std * jax.random.normal(ks[7], (D, MID), jnp.float32),         # W2 (gate)
        jnp.zeros((1, MID), jnp.float32),                              # b2
        std * jax.random.normal(ks[8], (MID, D), jnp.float32),         # W3 (down)
        jnp.zeros((1, D), jnp.float32),                                # b3
    )
    return p


if __name__ == "__main__":
    key = jax.random.PRNGKey(0)
    kx, kp = jax.random.split(key)
    x = jax.random.normal(kx, (B, N, D), jnp.float32)
    params = make_params(kp)

    out = transformer_layer(x, params)
    out = jax.block_until_ready(out)

    ref = reference(x, params)
    assert out.shape == (B, N, D)
    err = float(jnp.max(jnp.abs(out - ref)))
    # tolerance slightly loosened vs f64-exact: approx EUP reciprocal in the
    # softmax and the single-pass LayerNorm variance differ at ~1e-4 level.
    assert err < 1e-3, err

    print("KERNEL_OK")
</pallas_src>

<mosaic_0001>
module attributes {stable_mosaic.version = 11 : i64} {
  func.func @kernel(%arg0: i32, %arg1: memref<128x32xf32, #tpu.memory_space<vmem>>, %arg2: memref<6x32xf32, #tpu.memory_space<vmem>>, %arg3: memref<32x96xf32, #tpu.memory_space<vmem>>, %arg4: memref<32x32xf32, #tpu.memory_space<vmem>>, %arg5: memref<32x128xf32, #tpu.memory_space<vmem>>, %arg6: memref<64x32xf32, #tpu.memory_space<vmem>>, %arg7: memref<2x128xf32, #tpu.memory_space<vmem>>, %arg8: memref<128x32xf32, #tpu.memory_space<vmem>>) attributes {dimension_semantics = [#tpu.dimension_semantics<parallel>], iteration_bounds = array<i64: 1>, scalar_prefetch = 0 : i64, scratch_operands = 0 : i64, tpu.core_type = #tpu.core_type<tc>, window_params = [{transform_indices = @transform_0, window_bounds = array<i64: 128, 32>}, {pipeline_mode = #tpu.pipeline_mode<synchronous>, transform_indices = @transform_1, window_bounds = array<i64: 6, 32>}, {pipeline_mode = #tpu.pipeline_mode<synchronous>, transform_indices = @transform_2, window_bounds = array<i64: 32, 96>}, {pipeline_mode = #tpu.pipeline_mode<synchronous>, transform_indices = @transform_3, window_bounds = array<i64: 32, 32>}, {pipeline_mode = #tpu.pipeline_mode<synchronous>, transform_indices = @transform_4, window_bounds = array<i64: 32, 128>}, {pipeline_mode = #tpu.pipeline_mode<synchronous>, transform_indices = @transform_5, window_bounds = array<i64: 64, 32>}, {pipeline_mode = #tpu.pipeline_mode<synchronous>, transform_indices = @transform_6, window_bounds = array<i64: 2, 128>}, {transform_indices = @transform_7, window_bounds = array<i64: 128, 32>}]} {
    %c0 = arith.constant 0 : index
    %c0_0 = arith.constant 0 : index
    %0 = vector.load %arg1[%c0, %c0_0] : memref<128x32xf32, #tpu.memory_space<vmem>>, vector<128x32xf32>
    %c0_1 = arith.constant 0 : index
    %c0_2 = arith.constant 0 : index
    %1 = vector.load %arg2[%c0_1, %c0_2] : memref<6x32xf32, #tpu.memory_space<vmem>>, vector<6x32xf32>
    %2 = vector.extract_strided_slice %1 {offsets = [0, 0], sizes = [1, 32], strides = [1, 1]} : vector<6x32xf32> to vector<1x32xf32>
    %3 = vector.extract_strided_slice %1 {offsets = [1, 0], sizes = [1, 32], strides = [1, 1]} : vector<6x32xf32> to vector<1x32xf32>
    %4 = vector.extract_strided_slice %1 {offsets = [2, 0], sizes = [1, 32], strides = [1, 1]} : vector<6x32xf32> to vector<1x32xf32>
    %5 = vector.extract_strided_slice %1 {offsets = [3, 0], sizes = [1, 32], strides = [1, 1]} : vector<6x32xf32> to vector<1x32xf32>
    %6 = vector.extract_strided_slice %1 {offsets = [4, 0], sizes = [1, 32], strides = [1, 1]} : vector<6x32xf32> to vector<1x32xf32>
    %7 = vector.extract_strided_slice %1 {offsets = [5, 0], sizes = [1, 32], strides = [1, 1]} : vector<6x32xf32> to vector<1x32xf32>
    %c0_3 = arith.constant 0 : index
    %c0_4 = arith.constant 0 : index
    %8 = vector.load %arg7[%c0_3, %c0_4] : memref<2x128xf32, #tpu.memory_space<vmem>>, vector<2x128xf32>
    %9 = vector.extract_strided_slice %8 {offsets = [0, 0], sizes = [1, 96], strides = [1, 1]} : vector<2x128xf32> to vector<1x96xf32>
    %10 = vector.extract_strided_slice %8 {offsets = [1, 0], sizes = [1, 128], strides = [1, 1]} : vector<2x128xf32> to vector<1x128xf32>
    %cst = arith.constant dense<0.000000e+00> : vector<128xf32>
    %11 = vector.multi_reduction <add>, %0, %cst [1] : vector<128x32xf32> to vector<128xf32>
    %12 = vector.shape_cast %11 : vector<128xf32> to vector<128x1xf32>
    %13 = arith.mulf %0, %0 : vector<128x32xf32>
    %cst_5 = arith.constant dense<0.000000e+00> : vector<128xf32>
    %14 = vector.multi_reduction <add>, %13, %cst_5 [1] : vector<128x32xf32> to vector<128xf32>
    %15 = vector.shape_cast %14 : vector<128xf32> to vector<128x1xf32>
    %cst_6 = arith.constant 3.125000e-02 : f32
    %16 = vector.broadcast %cst_6 : f32 to vector<128x1xf32>
    %17 = arith.mulf %12, %16 : vector<128x1xf32>
    %cst_7 = arith.constant 3.125000e-02 : f32
    %18 = vector.broadcast %cst_7 : f32 to vector<128x1xf32>
    %19 = arith.mulf %15, %18 : vector<128x1xf32>
    %20 = arith.mulf %17, %17 : vector<128x1xf32>
    %21 = arith.subf %19, %20 : vector<128x1xf32>
    %22 = vector.broadcast %17 : vector<128x1xf32> to vector<128x32xf32>
    %23 = arith.subf %0, %22 : vector<128x32xf32>
    %cst_8 = arith.constant 9.99999974E-6 : f32
    %24 = vector.broadcast %cst_8 : f32 to vector<128x1xf32>
    %25 = arith.addf %21, %24 : vector<128x1xf32>
    %26 = math.rsqrt %25 : vector<128x1xf32>
    %27 = vector.broadcast %26 : vector<128x1xf32> to vector<128x32xf32>
    %28 = arith.mulf %23, %27 : vector<128x32xf32>
    %29 = vector.broadcast %2 : vector<1x32xf32> to vector<128x32xf32>
    %30 = arith.mulf %28, %29 : vector<128x32xf32>
    %31 = vector.broadcast %3 : vector<1x32xf32> to vector<128x32xf32>
    %32 = arith.addf %30, %31 : vector<128x32xf32>
    %c0_9 = arith.constant 0 : index
    %c0_10 = arith.constant 0 : index
    %33 = vector.load %arg3[%c0_9, %c0_10] : memref<32x96xf32, #tpu.memory_space<vmem>>, vector<32x96xf32>
    %cst_11 = arith.constant dense<0.000000e+00> : vector<128x96xf32>
    %34 = tpu.matmul %32, %33, %cst_11 {dimension_numbers = #tpu.dot_dimension_numbers<[1], [0], [0], [1], [0, 0, 1, 1], [], []>} : vector<128x32xf32>, vector<32x96xf32>, vector<128x96xf32> -> vector<128x96xf32>
    %35 = vector.broadcast %9 : vector<1x96xf32> to vector<128x96xf32>
    %36 = arith.addf %34, %35 : vector<128x96xf32>
    %37 = vector.shape_cast %6 : vector<1x32xf32> to vector<1x32xf32>
    %38 = vector.broadcast %37 : vector<1x32xf32> to vector<64x32xf32>
    %39 = vector.extract_strided_slice %36 {offsets = [0, 0], sizes = [64, 8], strides = [1, 1]} : vector<128x96xf32> to vector<64x8xf32>
    %40 = vector.extract_strided_slice %36 {offsets = [0, 32], sizes = [64, 8], strides = [1, 1]} : vector<128x96xf32> to vector<64x8xf32>
    %41 = vector.extract_strided_slice %36 {offsets = [0, 64], sizes = [64, 8], strides = [1, 1]} : vector<128x96xf32> to vector<64x8xf32>
    %cst_12 = arith.constant dense<0.000000e+00> : vector<64x64xf32>
    %42 = tpu.matmul %39, %40, %cst_12 {dimension_numbers = #tpu.dot_dimension_numbers<[1], [1], [0], [0], [0, 0, 1, 0], [], []>} : vector<64x8xf32>, vector<64x8xf32>, vector<64x64xf32> -> vector<64x64xf32>
    %cst_13 = arith.constant dense<0xFF800000> : vector<64xf32>
    %43 = vector.multi_reduction <maximumf>, %42, %cst_13 [1] : vector<64x64xf32> to vector<64xf32>
    %44 = vector.shape_cast %43 : vector<64xf32> to vector<64x1xf32>
    %45 = vector.broadcast %44 : vector<64x1xf32> to vector<64x64xf32>
    %46 = arith.subf %42, %45 : vector<64x64xf32>
    %47 = math.exp %46 : vector<64x64xf32>
    %cst_14 = arith.constant dense<0.000000e+00> : vector<64xf32>
    %48 = vector.multi_reduction <add>, %47, %cst_14 [1] : vector<64x64xf32> to vector<64xf32>
    %49 = vector.shape_cast %48 : vector<64xf32> to vector<64x1xf32>
    %50 = tpu.reciprocal %49 {approx = true} : vector<64x1xf32> -> vector<64x1xf32>
    %51 = vector.broadcast %50 : vector<64x1xf32> to vector<64x64xf32>
    %52 = arith.mulf %47, %51 : vector<64x64xf32>
    %cst_15 = arith.constant dense<0.000000e+00> : vector<64x8xf32>
    %53 = tpu.matmul %52, %41, %cst_15 {dimension_numbers = #tpu.dot_dimension_numbers<[1], [0], [0], [1], [0, 0, 1, 1], [], []>} : vector<64x64xf32>, vector<64x8xf32>, vector<64x8xf32> -> vector<64x8xf32>
    %c0_16 = arith.constant 0 : index
    %c0_17 = arith.constant 0 : index
    %54 = vector.load %arg4[%c0_16, %c0_17] : memref<32x32xf32, #tpu.memory_space<vmem>>, vector<8x32xf32>
    %cst_18 = arith.constant dense<0.000000e+00> : vector<64x32xf32>
    %55 = tpu.matmul %53, %54, %cst_18 {dimension_numbers = #tpu.dot_dimension_numbers<[1], [0], [0], [1], [0, 0, 1, 1], [], []>} : vector<64x8xf32>, vector<8x32xf32>, vector<64x32xf32> -> vector<64x32xf32>
    %56 = arith.addf %38, %55 : vector<64x32xf32>
    %57 = vector.extract_strided_slice %36 {offsets = [0, 8], sizes = [64, 8], strides = [1, 1]} : vector<128x96xf32> to vector<64x8xf32>
    %58 = vector.extract_strided_slice %36 {offsets = [0, 40], sizes = [64, 8], strides = [1, 1]} : vector<128x96xf32> to vector<64x8xf32>
    %59 = vector.extract_strided_slice %36 {offsets = [0, 72], sizes = [64, 8], strides = [1, 1]} : vector<128x96xf32> to vector<64x8xf32>
    %cst_19 = arith.constant dense<0.000000e+00> : vector<64x64xf32>
    %60 = tpu.matmul %57, %58, %cst_19 {dimension_numbers = #tpu.dot_dimension_numbers<[1], [1], [0], [0], [0, 0, 1, 0], [], []>} : vector<64x8xf32>, vector<64x8xf32>, vector<64x64xf32> -> vector<64x64xf32>
    %cst_20 = arith.constant dense<0xFF800000> : vector<64xf32>
    %61 = vector.multi_reduction <maximumf>, %60, %cst_20 [1] : vector<64x64xf32> to vector<64xf32>
    %62 = vector.shape_cast %61 : vector<64xf32> to vector<64x1xf32>
    %63 = vector.broadcast %62 : vector<64x1xf32> to vector<64x64xf32>
    %64 = arith.subf %60, %63 : vector<64x64xf32>
    %65 = math.exp %64 : vector<64x64xf32>
    %cst_21 = arith.constant dense<0.000000e+00> : vector<64xf32>
    %66 = vector.multi_reduction <add>, %65, %cst_21 [1] : vector<64x64xf32> to vector<64xf32>
    %67 = vector.shape_cast %66 : vector<64xf32> to vector<64x1xf32>
    %68 = tpu.reciprocal %67 {approx = true} : vector<64x1xf32> -> vector<64x1xf32>
    %69 = vector.broadcast %68 : vector<64x1xf32> to vector<64x64xf32>
    %70 = arith.mulf %65, %69 : vector<64x64xf32>
    %cst_22 = arith.constant dense<0.000000e+00> : vector<64x8xf32>
    %71 = tpu.matmul %70, %59, %cst_22 {dimension_numbers = #tpu.dot_dimension_numbers<[1], [0], [0], [1], [0, 0, 1, 1], [], []>} : vector<64x64xf32>, vector<64x8xf32>, vector<64x8xf32> -> vector<64x8xf32>
    %c8 = arith.constant 8 : index
    %c0_23 = arith.constant 0 : index
    %72 = vector.load %arg4[%c8, %c0_23] : memref<32x32xf32, #tpu.memory_space<vmem>>, vector<8x32xf32>
    %cst_24 = arith.constant dense<0.000000e+00> : vector<64x32xf32>
    %73 = tpu.matmul %71, %72, %cst_24 {dimension_numbers = #tpu.dot_dimension_numbers<[1], [0], [0], [1], [0, 0, 1, 1], [], []>} : vector<64x8xf32>, vector<8x32xf32>, vector<64x32xf32> -> vector<64x32xf32>
    %74 = arith.addf %56, %73 : vector<64x32xf32>
    %75 = vector.extract_strided_slice %36 {offsets = [0, 16], sizes = [64, 8], strides = [1, 1]} : vector<128x96xf32> to vector<64x8xf32>
    %76 = vector.extract_strided_slice %36 {offsets = [0, 48], sizes = [64, 8], strides = [1, 1]} : vector<128x96xf32> to vector<64x8xf32>
    %77 = vector.extract_strided_slice %36 {offsets = [0, 80], sizes = [64, 8], strides = [1, 1]} : vector<128x96xf32> to vector<64x8xf32>
    %cst_25 = arith.constant dense<0.000000e+00> : vector<64x64xf32>
    %78 = tpu.matmul %75, %76, %cst_25 {dimension_numbers = #tpu.dot_dimension_numbers<[1], [1], [0], [0], [0, 0, 1, 0], [], []>} : vector<64x8xf32>, vector<64x8xf32>, vector<64x64xf32> -> vector<64x64xf32>
    %cst_26 = arith.constant dense<0xFF800000> : vector<64xf32>
    %79 = vector.multi_reduction <maximumf>, %78, %cst_26 [1] : vector<64x64xf32> to vector<64xf32>
    %80 = vector.shape_cast %79 : vector<64xf32> to vector<64x1xf32>
    %81 = vector.broadcast %80 : vector<64x1xf32> to vector<64x64xf32>
    %82 = arith.subf %78, %81 : vector<64x64xf32>
    %83 = math.exp %82 : vector<64x64xf32>
    %cst_27 = arith.constant dense<0.000000e+00> : vector<64xf32>
    %84 = vector.multi_reduction <add>, %83, %cst_27 [1] : vector<64x64xf32> to vector<64xf32>
    %85 = vector.shape_cast %84 : vector<64xf32> to vector<64x1xf32>
    %86 = tpu.reciprocal %85 {approx = true} : vector<64x1xf32> -> vector<64x1xf32>
    %87 = vector.broadcast %86 : vector<64x1xf32> to vector<64x64xf32>
    %88 = arith.mulf %83, %87 : vector<64x64xf32>
    %cst_28 = arith.constant dense<0.000000e+00> : vector<64x8xf32>
    %89 = tpu.matmul %88, %77, %cst_28 {dimension_numbers = #tpu.dot_dimension_numbers<[1], [0], [0], [1], [0, 0, 1, 1], [], []>} : vector<64x64xf32>, vector<64x8xf32>, vector<64x8xf32> -> vector<64x8xf32>
    %c16 = arith.constant 16 : index
    %c0_29 = arith.constant 0 : index
    %90 = vector.load %arg4[%c16, %c0_29] : memref<32x32xf32, #tpu.memory_space<vmem>>, vector<8x32xf32>
    %cst_30 = arith.constant dense<0.000000e+00> : vector<64x32xf32>
    %91 = tpu.matmul %89, %90, %cst_30 {dimension_numbers = #tpu.dot_dimension_numbers<[1], [0], [0], [1], [0, 0, 1, 1], [], []>} : vector<64x8xf32>, vector<8x32xf32>, vector<64x32xf32> -> vector<64x32xf32>
    %92 = arith.addf %74, %91 : vector<64x32xf32>
    %93 = vector.extract_strided_slice %36 {offsets = [0, 24], sizes = [64, 8], strides = [1, 1]} : vector<128x96xf32> to vector<64x8xf32>
    %94 = vector.extract_strided_slice %36 {offsets = [0, 56], sizes = [64, 8], strides = [1, 1]} : vector<128x96xf32> to vector<64x8xf32>
    %95 = vector.extract_strided_slice %36 {offsets = [0, 88], sizes = [64, 8], strides = [1, 1]} : vector<128x96xf32> to vector<64x8xf32>
    %cst_31 = arith.constant dense<0.000000e+00> : vector<64x64xf32>
    %96 = tpu.matmul %93, %94, %cst_31 {dimension_numbers = #tpu.dot_dimension_numbers<[1], [1], [0], [0], [0, 0, 1, 0], [], []>} : vector<64x8xf32>, vector<64x8xf32>, vector<64x64xf32> -> vector<64x64xf32>
    %cst_32 = arith.constant dense<0xFF800000> : vector<64xf32>
    %97 = vector.multi_reduction <maximumf>, %96, %cst_32 [1] : vector<64x64xf32> to vector<64xf32>
    %98 = vector.shape_cast %97 : vector<64xf32> to vector<64x1xf32>
    %99 = vector.broadcast %98 : vector<64x1xf32> to vector<64x64xf32>
    %100 = arith.subf %96, %99 : vector<64x64xf32>
    %101 = math.exp %100 : vector<64x64xf32>
    %cst_33 = arith.constant dense<0.000000e+00> : vector<64xf32>
    %102 = vector.multi_reduction <add>, %101, %cst_33 [1] : vector<64x64xf32> to vector<64xf32>
    %103 = vector.shape_cast %102 : vector<64xf32> to vector<64x1xf32>
    %104 = tpu.reciprocal %103 {approx = true} : vector<64x1xf32> -> vector<64x1xf32>
    %105 = vector.broadcast %104 : vector<64x1xf32> to vector<64x64xf32>
    %106 = arith.mulf %101, %105 : vector<64x64xf32>
    %cst_34 = arith.constant dense<0.000000e+00> : vector<64x8xf32>
    %107 = tpu.matmul %106, %95, %cst_34 {dimension_numbers = #tpu.dot_dimension_numbers<[1], [0], [0], [1], [0, 0, 1, 1], [], []>} : vector<64x64xf32>, vector<64x8xf32>, vector<64x8xf32> -> vector<64x8xf32>
    %c24 = arith.constant 24 : index
    %c0_35 = arith.constant 0 : index
    %108 = vector.load %arg4[%c24, %c0_35] : memref<32x32xf32, #tpu.memory_space<vmem>>, vector<8x32xf32>
    %cst_36 = arith.constant dense<0.000000e+00> : vector<64x32xf32>
    %109 = tpu.matmul %107, %108, %cst_36 {dimension_numbers = #tpu.dot_dimension_numbers<[1], [0], [0], [1], [0, 0, 1, 1], [], []>} : vector<64x8xf32>, vector<8x32xf32>, vector<64x32xf32> -> vector<64x32xf32>
    %110 = arith.addf %92, %109 : vector<64x32xf32>
    %111 = vector.extract_strided_slice %36 {offsets = [64, 0], sizes = [64, 8], strides = [1, 1]} : vector<128x96xf32> to vector<64x8xf32>
    %112 = vector.extract_strided_slice %36 {offsets = [64, 32], sizes = [64, 8], strides = [1, 1]} : vector<128x96xf32> to vector<64x8xf32>
    %113 = vector.extract_strided_slice %36 {offsets = [64, 64], sizes = [64, 8], strides = [1, 1]} : vector<128x96xf32> to vector<64x8xf32>
    %cst_37 = arith.constant dense<0.000000e+00> : vector<64x64xf32>
    %114 = tpu.matmul %111, %112, %cst_37 {dimension_numbers = #tpu.dot_dimension_numbers<[1], [1], [0], [0], [0, 0, 1, 0], [], []>} : vector<64x8xf32>, vector<64x8xf32>, vector<64x64xf32> -> vector<64x64xf32>
    %cst_38 = arith.constant dense<0xFF800000> : vector<64xf32>
    %115 = vector.multi_reduction <maximumf>, %114, %cst_38 [1] : vector<64x64xf32> to vector<64xf32>
    %116 = vector.shape_cast %115 : vector<64xf32> to vector<64x1xf32>
    %117 = vector.broadcast %116 : vector<64x1xf32> to vector<64x64xf32>
    %118 = arith.subf %114, %117 : vector<64x64xf32>
    %119 = math.exp %118 : vector<64x64xf32>
    %cst_39 = arith.constant dense<0.000000e+00> : vector<64xf32>
    %120 = vector.multi_reduction <add>, %119, %cst_39 [1] : vector<64x64xf32> to vector<64xf32>
    %121 = vector.shape_cast %120 : vector<64xf32> to vector<64x1xf32>
    %122 = tpu.reciprocal %121 {approx = true} : vector<64x1xf32> -> vector<64x1xf32>
    %123 = vector.broadcast %122 : vector<64x1xf32> to vector<64x64xf32>
    %124 = arith.mulf %119, %123 : vector<64x64xf32>
    %cst_40 = arith.constant dense<0.000000e+00> : vector<64x8xf32>
    %125 = tpu.matmul %124, %113, %cst_40 {dimension_numbers = #tpu.dot_dimension_numbers<[1], [0], [0], [1], [0, 0, 1, 1], [], []>} : vector<64x64xf32>, vector<64x8xf32>, vector<64x8xf32> -> vector<64x8xf32>
    %c0_41 = arith.constant 0 : index
    %c0_42 = arith.constant 0 : index
    %126 = vector.load %arg4[%c0_41, %c0_42] : memref<32x32xf32, #tpu.memory_space<vmem>>, vector<8x32xf32>
    %cst_43 = arith.constant dense<0.000000e+00> : vector<64x32xf32>
    %127 = tpu.matmul %125, %126, %cst_43 {dimension_numbers = #tpu.dot_dimension_numbers<[1], [0], [0], [1], [0, 0, 1, 1], [], []>} : vector<64x8xf32>, vector<8x32xf32>, vector<64x32xf32> -> vector<64x32xf32>
    %128 = arith.addf %38, %127 : vector<64x32xf32>
    %129 = vector.extract_strided_slice %36 {offsets = [64, 8], sizes = [64, 8], strides = [1, 1]} : vector<128x96xf32> to vector<64x8xf32>
    %130 = vector.extract_strided_slice %36 {offsets = [64, 40], sizes = [64, 8], strides = [1, 1]} : vector<128x96xf32> to vector<64x8xf32>
    %131 = vector.extract_strided_slice %36 {offsets = [64, 72], sizes = [64, 8], strides = [1, 1]} : vector<128x96xf32> to vector<64x8xf32>
    %cst_44 = arith.constant dense<0.000000e+00> : vector<64x64xf32>
    %132 = tpu.matmul %129, %130, %cst_44 {dimension_numbers = #tpu.dot_dimension_numbers<[1], [1], [0], [0], [0, 0, 1, 0], [], []>} : vector<64x8xf32>, vector<64x8xf32>, vector<64x64xf32> -> vector<64x64xf32>
    %cst_45 = arith.constant dense<0xFF800000> : vector<64xf32>
    %133 = vector.multi_reduction <maximumf>, %132, %cst_45 [1] : vector<64x64xf32> to vector<64xf32>
    %134 = vector.shape_cast %133 : vector<64xf32> to vector<64x1xf32>
    %135 = vector.broadcast %134 : vector<64x1xf32> to vector<64x64xf32>
    %136 = arith.subf %132, %135 : vector<64x64xf32>
    %137 = math.exp %136 : vector<64x64xf32>
    %cst_46 = arith.constant dense<0.000000e+00> : vector<64xf32>
    %138 = vector.multi_reduction <add>, %137, %cst_46 [1] : vector<64x64xf32> to vector<64xf32>
    %139 = vector.shape_cast %138 : vector<64xf32> to vector<64x1xf32>
    %140 = tpu.reciprocal %139 {approx = true} : vector<64x1xf32> -> vector<64x1xf32>
    %141 = vector.broadcast %140 : vector<64x1xf32> to vector<64x64xf32>
    %142 = arith.mulf %137, %141 : vector<64x64xf32>
    %cst_47 = arith.constant dense<0.000000e+00> : vector<64x8xf32>
    %143 = tpu.matmul %142, %131, %cst_47 {dimension_numbers = #tpu.dot_dimension_numbers<[1], [0], [0], [1], [0, 0, 1, 1], [], []>} : vector<64x64xf32>, vector<64x8xf32>, vector<64x8xf32> -> vector<64x8xf32>
    %c8_48 = arith.constant 8 : index
    %c0_49 = arith.constant 0 : index
    %144 = vector.load %arg4[%c8_48, %c0_49] : memref<32x32xf32, #tpu.memory_space<vmem>>, vector<8x32xf32>
    %cst_50 = arith.constant dense<0.000000e+00> : vector<64x32xf32>
    %145 = tpu.matmul %143, %144, %cst_50 {dimension_numbers = #tpu.dot_dimension_numbers<[1], [0], [0], [1], [0, 0, 1, 1], [], []>} : vector<64x8xf32>, vector<8x32xf32>, vector<64x32xf32> -> vector<64x32xf32>
    %146 = arith.addf %128, %145 : vector<64x32xf32>
    %147 = vector.extract_strided_slice %36 {offsets = [64, 16], sizes = [64, 8], strides = [1, 1]} : vector<128x96xf32> to vector<64x8xf32>
    %148 = vector.extract_strided_slice %36 {offsets = [64, 48], sizes = [64, 8], strides = [1, 1]} : vector<128x96xf32> to vector<64x8xf32>
    %149 = vector.extract_strided_slice %36 {offsets = [64, 80], sizes = [64, 8], strides = [1, 1]} : vector<128x96xf32> to vector<64x8xf32>
    %cst_51 = arith.constant dense<0.000000e+00> : vector<64x64xf32>
    %150 = tpu.matmul %147, %148, %cst_51 {dimension_numbers = #tpu.dot_dimension_numbers<[1], [1], [0], [0], [0, 0, 1, 0], [], []>} : vector<64x8xf32>, vector<64x8xf32>, vector<64x64xf32> -> vector<64x64xf32>
    %cst_52 = arith.constant dense<0xFF800000> : vector<64xf32>
    %151 = vector.multi_reduction <maximumf>, %150, %cst_52 [1] : vector<64x64xf32> to vector<64xf32>
    %152 = vector.shape_cast %151 : vector<64xf32> to vector<64x1xf32>
    %153 = vector.broadcast %152 : vector<64x1xf32> to vector<64x64xf32>
    %154 = arith.subf %150, %153 : vector<64x64xf32>
    %155 = math.exp %154 : vector<64x64xf32>
    %cst_53 = arith.constant dense<0.000000e+00> : vector<64xf32>
    %156 = vector.multi_reduction <add>, %155, %cst_53 [1] : vector<64x64xf32> to vector<64xf32>
    %157 = vector.shape_cast %156 : vector<64xf32> to vector<64x1xf32>
    %158 = tpu.reciprocal %157 {approx = true} : vector<64x1xf32> -> vector<64x1xf32>
    %159 = vector.broadcast %158 : vector<64x1xf32> to vector<64x64xf32>
    %160 = arith.mulf %155, %159 : vector<64x64xf32>
    %cst_54 = arith.constant dense<0.000000e+00> : vector<64x8xf32>
    %161 = tpu.matmul %160, %149, %cst_54 {dimension_numbers = #tpu.dot_dimension_numbers<[1], [0], [0], [1], [0, 0, 1, 1], [], []>} : vector<64x64xf32>, vector<64x8xf32>, vector<64x8xf32> -> vector<64x8xf32>
    %c16_55 = arith.constant 16 : index
    %c0_56 = arith.constant 0 : index
    %162 = vector.load %arg4[%c16_55, %c0_56] : memref<32x32xf32, #tpu.memory_space<vmem>>, vector<8x32xf32>
    %cst_57 = arith.constant dense<0.000000e+00> : vector<64x32xf32>
    %163 = tpu.matmul %161, %162, %cst_57 {dimension_numbers = #tpu.dot_dimension_numbers<[1], [0], [0], [1], [0, 0, 1, 1], [], []>} : vector<64x8xf32>, vector<8x32xf32>, vector<64x32xf32> -> vector<64x32xf32>
    %164 = arith.addf %146, %163 : vector<64x32xf32>
    %165 = vector.extract_strided_slice %36 {offsets = [64, 24], sizes = [64, 8], strides = [1, 1]} : vector<128x96xf32> to vector<64x8xf32>
    %166 = vector.extract_strided_slice %36 {offsets = [64, 56], sizes = [64, 8], strides = [1, 1]} : vector<128x96xf32> to vector<64x8xf32>
    %167 = vector.extract_strided_slice %36 {offsets = [64, 88], sizes = [64, 8], strides = [1, 1]} : vector<128x96xf32> to vector<64x8xf32>
    %cst_58 = arith.constant dense<0.000000e+00> : vector<64x64xf32>
    %168 = tpu.matmul %165, %166, %cst_58 {dimension_numbers = #tpu.dot_dimension_numbers<[1], [1], [0], [0], [0, 0, 1, 0], [], []>} : vector<64x8xf32>, vector<64x8xf32>, vector<64x64xf32> -> vector<64x64xf32>
    %cst_59 = arith.constant dense<0xFF800000> : vector<64xf32>
    %169 = vector.multi_reduction <maximumf>, %168, %cst_59 [1] : vector<64x64xf32> to vector<64xf32>
    %170 = vector.shape_cast %169 : vector<64xf32> to vector<64x1xf32>
    %171 = vector.broadcast %170 : vector<64x1xf32> to vector<64x64xf32>
    %172 = arith.subf %168, %171 : vector<64x64xf32>
    %173 = math.exp %172 : vector<64x64xf32>
    %cst_60 = arith.constant dense<0.000000e+00> : vector<64xf32>
    %174 = vector.multi_reduction <add>, %173, %cst_60 [1] : vector<64x64xf32> to vector<64xf32>
    %175 = vector.shape_cast %174 : vector<64xf32> to vector<64x1xf32>
    %176 = tpu.reciprocal %175 {approx = true} : vector<64x1xf32> -> vector<64x1xf32>
    %177 = vector.broadcast %176 : vector<64x1xf32> to vector<64x64xf32>
    %178 = arith.mulf %173, %177 : vector<64x64xf32>
    %cst_61 = arith.constant dense<0.000000e+00> : vector<64x8xf32>
    %179 = tpu.matmul %178, %167, %cst_61 {dimension_numbers = #tpu.dot_dimension_numbers<[1], [0], [0], [1], [0, 0, 1, 1], [], []>} : vector<64x64xf32>, vector<64x8xf32>, vector<64x8xf32> -> vector<64x8xf32>
    %c24_62 = arith.constant 24 : index
    %c0_63 = arith.constant 0 : index
    %180 = vector.load %arg4[%c24_62, %c0_63] : memref<32x32xf32, #tpu.memory_space<vmem>>, vector<8x32xf32>
    %cst_64 = arith.constant dense<0.000000e+00> : vector<64x32xf32>
    %181 = tpu.matmul %179, %180, %cst_64 {dimension_numbers = #tpu.dot_dimension_numbers<[1], [0], [0], [1], [0, 0, 1, 1], [], []>} : vector<64x8xf32>, vector<8x32xf32>, vector<64x32xf32> -> vector<64x32xf32>
    %182 = arith.addf %164, %181 : vector<64x32xf32>
    %183 = tpu.concatenate %110, %182 in 0 : vector<64x32xf32>, vector<64x32xf32> -> vector<128x32xf32>
    %184 = arith.addf %0, %183 : vector<128x32xf32>
    %cst_65 = arith.constant dense<0.000000e+00> : vector<128xf32>
    %185 = vector.multi_reduction <add>, %184, %cst_65 [1] : vector<128x32xf32> to vector<128xf32>
    %186 = vector.shape_cast %185 : vector<128xf32> to vector<128x1xf32>
    %187 = arith.mulf %184, %184 : vector<128x32xf32>
    %cst_66 = arith.constant dense<0.000000e+00> : vector<128xf32>
    %188 = vector.multi_reduction <add>, %187, %cst_66 [1] : vector<128x32xf32> to vector<128xf32>
    %189 = vector.shape_cast %188 : vector<128xf32> to vector<128x1xf32>
    %cst_67 = arith.constant 3.125000e-02 : f32
    %190 = vector.broadcast %cst_67 : f32 to vector<128x1xf32>
    %191 = arith.mulf %186, %190 : vector<128x1xf32>
    %cst_68 = arith.constant 3.125000e-02 : f32
    %192 = vector.broadcast %cst_68 : f32 to vector<128x1xf32>
    %193 = arith.mulf %189, %192 : vector<128x1xf32>
    %194 = arith.mulf %191, %191 : vector<128x1xf32>
    %195 = arith.subf %193, %194 : vector<128x1xf32>
    %196 = vector.broadcast %191 : vector<128x1xf32> to vector<128x32xf32>
    %197 = arith.subf %184, %196 : vector<128x32xf32>
    %cst_69 = arith.constant 9.99999974E-6 : f32
    %198 = vector.broadcast %cst_69 : f32 to vector<128x1xf32>
    %199 = arith.addf %195, %198 : vector<128x1xf32>
    %200 = math.rsqrt %199 : vector<128x1xf32>
    %201 = vector.broadcast %200 : vector<128x1xf32> to vector<128x32xf32>
    %202 = arith.mulf %197, %201 : vector<128x32xf32>
    %203 = vector.broadcast %4 : vector<1x32xf32> to vector<128x32xf32>
    %204 = arith.mulf %202, %203 : vector<128x32xf32>
    %205 = vector.broadcast %5 : vector<1x32xf32> to vector<128x32xf32>
    %206 = arith.addf %204, %205 : vector<128x32xf32>
    %c0_70 = arith.constant 0 : index
    %c0_71 = arith.constant 0 : index
    %207 = vector.load %arg5[%c0_70, %c0_71] : memref<32x128xf32, #tpu.memory_space<vmem>>, vector<32x128xf32>
    %cst_72 = arith.constant dense<0.000000e+00> : vector<128x128xf32>
    %208 = tpu.matmul %206, %207, %cst_72 {dimension_numbers = #tpu.dot_dimension_numbers<[1], [0], [0], [1], [0, 0, 1, 1], [], []>} : vector<128x32xf32>, vector<32x128xf32>, vector<128x128xf32> -> vector<128x128xf32>
    %209 = vector.broadcast %10 : vector<1x128xf32> to vector<128x128xf32>
    %210 = arith.addf %208, %209 : vector<128x128xf32>
    %211 = vector.extract_strided_slice %210 {offsets = [0, 0], sizes = [128, 64], strides = [1, 1]} : vector<128x128xf32> to vector<128x64xf32>
    %212 = vector.extract_strided_slice %210 {offsets = [0, 64], sizes = [128, 64], strides = [1, 1]} : vector<128x128xf32> to vector<128x64xf32>
    %213 = arith.negf %211 : vector<128x64xf32>
    %214 = math.exp %213 : vector<128x64xf32>
    %cst_73 = arith.constant 1.000000e+00 : f32
    %215 = vector.broadcast %cst_73 : f32 to vector<128x64xf32>
    %216 = arith.addf %215, %214 : vector<128x64xf32>
    %217 = arith.divf %215, %216 : vector<128x64xf32>
    %218 = arith.mulf %211, %217 : vector<128x64xf32>
    %219 = arith.mulf %218, %212 : vector<128x64xf32>
    %c0_74 = arith.constant 0 : index
    %c0_75 = arith.constant 0 : index
    %220 = vector.load %arg6[%c0_74, %c0_75] : memref<64x32xf32, #tpu.memory_space<vmem>>, vector<64x32xf32>
    %cst_76 = arith.constant dense<0.000000e+00> : vector<128x32xf32>
    %221 = tpu.matmul %219, %220, %cst_76 {dimension_numbers = #tpu.dot_dimension_numbers<[1], [0], [0], [1], [0, 0, 1, 1], [], []>} : vector<128x64xf32>, vector<64x32xf32>, vector<128x32xf32> -> vector<128x32xf32>
    %222 = arith.addf %184, %221 : vector<128x32xf32>
    %223 = vector.broadcast %7 : vector<1x32xf32> to vector<128x32xf32>
    %224 = arith.addf %222, %223 : vector<128x32xf32>
    %c0_77 = arith.constant 0 : index
    %c0_78 = arith.constant 0 : index
    %225 = vector.load %arg8[%c0_77, %c0_78] : memref<128x32xf32, #tpu.memory_space<vmem>>, vector<128x32xf32>
    tpu.vector_store %arg8[%c0_77, %c0_78], %224 {strides = array<i32>} : memref<128x32xf32, #tpu.memory_space<vmem>>, vector<128x32xf32>,
    return
  }
  func.func @transform_0(%arg0: i32) -> (i32, i32) {
    %c0_i32 = arith.constant 0 : i32
    %c0_i32_0 = arith.constant 0 : i32
    return %arg0, %c0_i32 : i32, i32
  }
  func.func @transform_1(%arg0: i32) -> (i32, i32) {
    %c0_i32 = arith.constant 0 : i32
    %c0_i32_0 = arith.constant 0 : i32
    %c0_i32_1 = arith.constant 0 : i32
    return %c0_i32, %c0_i32_0 : i32, i32
  }
  func.func @transform_2(%arg0: i32) -> (i32, i32) {
    %c0_i32 = arith.constant 0 : i32
    %c0_i32_0 = arith.constant 0 : i32
    %c0_i32_1 = arith.constant 0 : i32
    return %c0_i32, %c0_i32_0 : i32, i32
  }
  func.func @transform_3(%arg0: i32) -> (i32, i32) {
    %c0_i32 = arith.constant 0 : i32
    %c0_i32_0 = arith.constant 0 : i32
    %c0_i32_1 = arith.constant 0 : i32
    return %c0_i32, %c0_i32_0 : i32, i32
  }
  func.func @transform_4(%arg0: i32) -> (i32, i32) {
    %c0_i32 = arith.constant 0 : i32
    %c0_i32_0 = arith.constant 0 : i32
    %c0_i32_1 = arith.constant 0 : i32
    return %c0_i32, %c0_i32_0 : i32, i32
  }
  func.func @transform_5(%arg0: i32) -> (i32, i32) {
    %c0_i32 = arith.constant 0 : i32
    %c0_i32_0 = arith.constant 0 : i32
    %c0_i32_1 = arith.constant 0 : i32
    return %c0_i32, %c0_i32_0 : i32, i32
  }
  func.func @transform_6(%arg0: i32) -> (i32, i32) {
    %c0_i32 = arith.constant 0 : i32
    %c0_i32_0 = arith.constant 0 : i32
    %c0_i32_1 = arith.constant 0 : i32
    return %c0_i32, %c0_i32_0 : i32, i32
  }
  func.func @transform_7(%arg0: i32) -> (i32, i32) {
    %c0_i32 = arith.constant 0 : i32
    %c0_i32_0 = arith.constant 0 : i32
    return %arg0, %c0_i32 : i32, i32
  }
}

</mosaic_0001>

<bundles_post_ra>
// kernel: tpu_custom_call.1
= control target key start
LH: loop header
LB: loop body
LE: loop exit
PB: predicated region body
PF: predicated region fallthrough
CT: control target
= control target key end

     0   :  { %vm44_vm0 = vcmask 261120   ;;  %v285_v47 = vlaneseq  ;;  %vm554_vm1 = vcmask 64512   ;;  %s8380_s28 = smov 96   ;;  %vm692_vm3 = vcmask 523264   ;;  %s8381_s22 = smov 64   ;;  %s10656_s0 = inlined_call_operand.vmem [shape: f32[128,32], index: 0, kind: input, shape index: {}]   ;;  %s10657_s2 = inlined_call_operand.vmem [shape: f32[32,96], index: 2, kind: input, shape index: {}]   ;;  %s10658_s1 = inlined_call_operand.vmem [shape: f32[6,32], index: 1, kind: input, shape index: {}]   ;;  %s10659_s6 = inlined_call_operand.vmem [shape: f32[2,128], index: 6, kind: input, shape index: {}]   ;;  %s10660_s3 = inlined_call_operand.vmem [shape: f32[32,32], index: 3, kind: input, shape index: {}]   ;;  %s10661_s4 = inlined_call_operand.vmem [shape: f32[32,128], index: 4, kind: input, shape index: {}]   ;;  %s10662_s5 = inlined_call_operand.vmem [shape: f32[64,32], index: 5, kind: input, shape index: {}]   ;;  %s10663_s7 = inlined_call_operand.vmem [shape: f32[128,32], index: 7, kind: output, shape index: {}]  }
   0x1   :  { %v8434_v0 = vld [vmem:[%s10656_s0] sm:$0xff]  ;;  %v8439_v1 = vld [vmem:[%s10656_s0 + $0x8] sm:$0xff]  ;;  %v8453_v7 = vld [vmem:[%s10656_s0 + $0x10] sm:$0xff]  ;;  %s8382_s23 = smov 88   ;;  %s8383_s24 = smov 120  }
   0x2   :  { %v45_v2 = vsel %vm44_vm0, %v8434_v0, 0.0  ;;  %v93_v3 = vmul.f32 %v8434_v0, %v8434_v0  ;;  %v94_v4 = vmul.f32 %v8439_v1, %v8439_v1  ;;  %v48_v6 = vsel %vm44_vm0, %v8439_v1, 0.0  ;;  %v8459_v9 = vld [vmem:[%s10656_s0 + $0x18] sm:$0xff]  ;;  %v8473_v15 = vld [vmem:[%s10656_s0 + $0x20] sm:$0xff]  ;;  %v8479_v17 = vld [vmem:[%s10656_s0 + $0x28] sm:$0xff]  ;;  %s8385_s25 = smov 112  }
   0x3   :  { %46 = vadd.xlane.f32.xlu0 %v45_v2  ;;  %v51_v10 = vsel %vm44_vm0, %v8453_v7, 0.0  ;;  %v95_v11 = vmul.f32 %v8453_v7, %v8453_v7  ;;  %v54_v12 = vsel %vm44_vm0, %v8459_v9, 0.0  ;;  %v96_v13 = vmul.f32 %v8459_v9, %v8459_v9  ;;  %v8493_v23 = vld [vmem:[%s10656_s0 + $0x30] sm:$0xff]  ;;  %v8499_v25 = vld [vmem:[%s10656_s0 + $0x38] sm:$0xff]  ;;  %v325_v32 = vld [vmem:[%s10657_s2] sm:$0xff]  ;;  %s8386_s29 = smov 56  }
   0x4   :  { %v109_v5 = vsel %vm44_vm0, %v93_v3, 0.0  ;;  %v112_v8 = vsel %vm44_vm0, %v94_v4, 0.0  ;;  %v57_v18 = vsel %vm44_vm0, %v8473_v15, 0.0  ;;  %v97_v19 = vmul.f32 %v8473_v15, %v8473_v15  ;;  %v326_v33 = vld [vmem:[%s10657_s2 + $0x8] sm:$0xff]  ;;  %v327_v35 = vld [vmem:[%s10657_s2 + $0x10] sm:$0xff]  ;;  %v328_v36 = vld [vmem:[%s10657_s2 + $0x18] sm:$0xff] }
   0x5   :  { %110 = vadd.xlane.f32.xlu1 %v109_v5  ;;  %v115_v14 = vsel %vm44_vm0, %v95_v11, 0.0  ;;  %v118_v16 = vsel %vm44_vm0, %v96_v13, 0.0  ;;  %v60_v20 = vsel %vm44_vm0, %v8479_v17, 0.0  ;;  %v98_v21 = vmul.f32 %v8479_v17, %v8479_v17  ;;  %v42_v4 = vld [vmem:[%s10658_s1] sm:$0x3f]  ;;  %vm8684_vm2 = vmpackc.low %vm554_vm1, %vm554_vm1  ;;  %s8384_s2 = smov 80  }
   0x6   :  { %v121_v22 = vsel %vm44_vm0, %v97_v19, 0.0  ;;  %v63_v26 = vsel %vm44_vm0, %v8493_v23, 0.0  ;;  %v99_v27 = vmul.f32 %v8493_v23, %v8493_v23  ;;  %v66_v28 = vsel %vm44_vm0, %v8499_v25, 0.0  ;;  %s8387_s30 = smov 72   ;;  %s8388_s8 = smov 104  }
   0x7   :  { %49 = vadd.xlane.f32.xlu0 %v48_v6  ;;  %v124_v24 = vsel %vm44_vm0, %v98_v21, 0.0  ;;  %v100_v29 = vmul.f32 %v8499_v25, %v8499_v25  ;;  %v7218_v34 = vpack.c.bf16 %v326_v33, %v325_v32  ;;  %v7222_v37 = vpack.c.bf16 %v328_v36, %v327_v35  ;;  %s8389_s9 = smov 48  }
   0x8   :  { %v127_v30 = vsel %vm44_vm0, %v99_v27, 0.0  ;;  %v8525_v55 = vshrl.u32 %v285_v47, 7 }
   0x9   :  { %113 = vadd.xlane.f32.xlu1 %v112_v8  ;;  %v130_v31 = vsel %vm44_vm0, %v100_v29, 0.0  ;;  %7219 = vmatprep.subr.bf16.mxu0 %v7218_v34 }
   0xa   :  { %7221 = vmatpush3.bf16.msra.mxu0 %v7218_v34  ;;  %v287_v62 = vsub.s32 0, %v8525_v55  ;;  %v307_v6 = vsub.s32 1, %v8525_v55 }
   0xb   :  { %52 = vadd.xlane.f32.xlu0 %v51_v10  ;;  %7223 = vmatprep.subr.bf16.mxu0 %v7222_v37 }
   0xd   :  { %55 = vadd.xlane.f32.xlu1 %v54_v12 }
   0xe   :  { %7225 = vmatpush3.bf16.msra.mxu0 %v7222_v37 }
   0xf   :  { %116 = vadd.xlane.f32.xlu0 %v115_v14  ;;  %v8543_v14 = vrot.slane %v42_v4, %v287_v62 }
  0x11   :  { %119 = vadd.xlane.f32.xlu1 %v118_v16 }
  0x13   :  { %58 = vadd.xlane.f32.xlu0 %v57_v18 }
  0x15   :  { %61 = vadd.xlane.f32.xlu1 %v60_v20 }
  0x17   :  { %122 = vadd.xlane.f32.xlu0 %v121_v22 }
  0x19   :  { %125 = vadd.xlane.f32.xlu1 %v124_v24  ;;  %v8549_v24 = vrot.slane %v42_v4, %v307_v6 }
  0x1b   :  { %64 = vadd.xlane.f32.xlu0 %v63_v26 }
  0x1d   :  { %67 = vadd.xlane.f32.xlu1 %v66_v28 }
  0x1f   :  { %128 = vadd.xlane.f32.xlu0 %v127_v30 }
  0x21   :  { %131 = vadd.xlane.f32.xlu1 %v130_v31 }
  0x90   :  { %v47_v38 = vpop.xlane.xlu0 %46 }
  0x91   :  { %v157_v39 = vmul.f32 0.03125, %v47_v38 }
  0x92   :  { %v111_v40 = vpop.xlane.xlu1 %110 }
  0x93   :  { %v189_v41 = vmul.f32 %v157_v39, %v157_v39  ;;  %v173_v42 = vmul.f32 0.03125, %v111_v40  ;;  %v221_v12 = vsub.f32 %v8434_v0, %v157_v39 }
  0x94   :  { %v50_v43 = vpop.xlane.xlu0 %49 }
  0x95   :  { %v205_v44 = vsub.f32 %v173_v42, %v189_v41  ;;  %v158_v45 = vmul.f32 0.03125, %v50_v43 }
  0x96   :  { %v114_v46 = vpop.xlane.xlu1 %113 }
  0x97   :  { %v237_v48 = vadd.f32 1e-05, %v205_v44  ;;  %v190_v49 = vmul.f32 %v158_v45, %v158_v45  ;;  %v174_v50 = vmul.f32 0.03125, %v114_v46  ;;  %v222_v26 = vsub.f32 %v8439_v1, %v158_v45 }
  0x98   :  { %v53_v51 = vpop.xlane.xlu0 %52 }
  0x99   :  { %7973 = vrsqrt.f32 %v237_v48  ;;  %v206_v52 = vsub.f32 %v174_v50, %v190_v49  ;;  %v8523_v53 = vmul.f32 0.03125, %v53_v51 }
  0x9a   :  { %v56_v54 = vpop.xlane.xlu1 %55 }
  0x9b   :  { %v238_v56 = vadd.f32 1e-05, %v206_v52  ;;  %v191_v57 = vmul.f32 %v8523_v53, %v8523_v53  ;;  %v8529_v58 = vmul.f32 0.03125, %v56_v54  ;;  %v223_v42 = vsub.f32 %v8453_v7, %v8523_v53 }
  0x9c   :  { %v117_v59 = vpop.xlane.xlu0 %116 }
  0x9d   :  { %7975 = vrsqrt.f32 %v238_v56  ;;  %v175_v60 = vmul.f32 0.03125, %v117_v59  ;;  %v192_v63 = vmul.f32 %v8529_v58, %v8529_v58  ;;  %v224_v48 = vsub.f32 %v8459_v9, %v8529_v58 }
  0x9e   :  { %v120_v61 = vpop.xlane.xlu1 %119 }
  0x9f   :  { %v207_v2 = vsub.f32 %v175_v60, %v191_v57  ;;  %v176_v3 = vmul.f32 0.03125, %v120_v61 }
  0xa0   :  { %v59_v5 = vpop.xlane.xlu0 %58 }
  0xa1   :  { %v239_v8 = vadd.f32 1e-05, %v207_v2  ;;  %v208_v10 = vsub.f32 %v176_v3, %v192_v63  ;;  %v8538_v11 = vmul.f32 0.03125, %v59_v5 }
  0xa2   :  { %v62_v13 = vpop.xlane.xlu1 %61 }
  0xa3   :  { %v7974_v16 = vpop.eup %7973  ;;  %7977 = vrsqrt.f32 %v239_v8  ;;  %v240_v18 = vadd.f32 1e-05, %v208_v10  ;;  %v193_v19 = vmul.f32 %v8538_v11, %v8538_v11  ;;  %v162_v20 = vmul.f32 0.03125, %v62_v13 }
  0xa4   :  { %v123_v21 = vpop.xlane.xlu0 %122  ;;  %v269_v22 = vmul.f32 %v7974_v16, %v221_v12  ;;  %v225_v9 = vsub.f32 %v8473_v15, %v8538_v11 }
  0xa5   :  { %7979 = vrsqrt.f32 %v240_v18  ;;  %v177_v0 = vmul.f32 0.03125, %v123_v21  ;;  %v194_v30 = vmul.f32 %v162_v20, %v162_v20  ;;  %v226_v3 = vsub.f32 %v8479_v17, %v162_v20 }
  0xa6   :  { %v126_v27 = vpop.xlane.xlu1 %125  ;;  %v289_v28 = vmul.f32 %v8543_v14, %v269_v22 }
  0xa7   :  { %v7976_v29 = vpop.eup %7975  ;;  %v209_v31 = vsub.f32 %v177_v0, %v193_v19  ;;  %v178_v32 = vmul.f32 0.03125, %v126_v27 }
  0xa8   :  { %v65_v33 = vpop.xlane.xlu0 %64  ;;  %v309_v34 = vadd.f32 %v8549_v24, %v289_v28  ;;  %v270_v35 = vmul.f32 %v7976_v29, %v222_v26 }
  0xa9   :  { %v241_v36 = vadd.f32 1e-05, %v209_v31  ;;  %v210_v37 = vsub.f32 %v178_v32, %v194_v30  ;;  %v163_v38 = vmul.f32 0.03125, %v65_v33 }
  0xaa   :  { %v68_v39 = vpop.xlane.xlu1 %67  ;;  %6562 = vmatprep.mubr.msk.f32.mxu0 %vm44_vm0, %v309_v34  ;;  %v290_v40 = vmul.f32 %v8543_v14, %v270_v35 }
  0xab   :  { %7981 = vrsqrt.f32 %v241_v36  ;;  %v242_v1 = vadd.f32 1e-05, %v210_v37  ;;  %v195_v41 = vmul.f32 %v163_v38, %v163_v38  ;;  %v164_v43 = vmul.f32 0.03125, %v68_v39 }
  0xac   :  { %v129_v44 = vpop.xlane.xlu0 %128  ;;  %v310_v45 = vadd.f32 %v8549_v24, %v290_v40  ;;  %v227_v15 = vsub.f32 %v8493_v23, %v163_v38 }
  0xad   :  { %v7978_v46 = vpop.eup %7977  ;;  %7983 = vrsqrt.f32 %v242_v1  ;;  %v179_v47 = vmul.f32 0.03125, %v129_v44  ;;  %v196_v52 = vmul.f32 %v164_v43, %v164_v43  ;;  %v228_v17 = vsub.f32 %v8499_v25, %v164_v43  ;;  %v43_v25 = vld [vmem:[%s10659_s6] sm:$0x3] }
  0xae   :  { %v132_v49 = vpop.xlane.xlu1 %131  ;;  %6563 = vmatmul.mubr.msk.f32.vlgmr.msra.gmra.mrb[0].mxu0 %vm44_vm0, %v310_v45  ;;  %v271_v50 = vmul.f32 %v7978_v46, %v223_v42  ;;  %v8590_v26 = vrot.slane %v43_v25, %v287_v62  ;;  %v8645_v45 = vld [vmem:[%s10656_s0 + $0x40] sm:$0xff] }
  0xaf   :  { %v7980_v51 = vpop.eup %7979  ;;  %v211_v54 = vsub.f32 %v179_v47, %v195_v41  ;;  %v180_v56 = vmul.f32 0.03125, %v132_v49  ;;  %v69_v46 = vsel %vm44_vm0, %v8645_v45, 0.0  ;;  %v101_v47 = vmul.f32 %v8645_v45, %v8645_v45  ;;  %v8655_v49 = vld [vmem:[%s10656_s0 + $0x50] sm:$0xff] }
  0xb0   :  { %v291_v7 = vmul.f32 %v8543_v14, %v271_v50  ;;  %v272_v53 = vmul.f32 %v7980_v51, %v224_v48  ;;  %v75_v50 = vsel %vm44_vm0, %v8655_v49, 0.0  ;;  %v103_v51 = vmul.f32 %v8655_v49, %v8655_v49 }
  0xb1   :  { %v243_v57 = vadd.f32 1e-05, %v211_v54  ;;  %v212_v59 = vsub.f32 %v180_v56, %v196_v52  ;;  %v133_v48 = vsel %vm44_vm0, %v101_v47, 0.0  ;;  %v8665_v54 = vld [vmem:[%s10656_s0 + $0x48] sm:$0xff] }
  0xb2   :  { %v311_v60 = vadd.f32 %v8549_v24, %v291_v7  ;;  %v292_v61 = vmul.f32 %v8543_v14, %v272_v53  ;;  %v139_v52 = vsel %vm44_vm0, %v103_v51, 0.0  ;;  %v72_v56 = vsel %vm44_vm0, %v8665_v54, 0.0 }
  0xb3   :  { %7985 = vrsqrt.f32 %v243_v57  ;;  %v244_v63 = vadd.f32 1e-05, %v212_v59  ;;  %v102_v7 = vmul.f32 %v8665_v54, %v8665_v54  ;;  %v8675_v57 = vld [vmem:[%s10656_s0 + $0x58] sm:$0xff] }
  0xb4   :  { %6565 = vmatprep.mubr.msk.f32.mxu0 %vm44_vm0, %v311_v60  ;;  %v312_v58 = vadd.f32 %v8549_v24, %v292_v61  ;;  %v78_v59 = vsel %vm44_vm0, %v8675_v57, 0.0  ;;  %v104_v60 = vmul.f32 %v8675_v57, %v8675_v57 }
  0xb5   :  { %v7982_v2 = vpop.eup %7981  ;;  %7987 = vrsqrt.f32 %v244_v63  ;;  %v136_v53 = vsel %vm44_vm0, %v102_v7, 0.0 }
  0xb6   :  { %6566 = vmatmul.mubr.msk.f32.gmra.mrb[2].mxu0 %vm44_vm0, %v312_v58  ;;  %v273_v4 = vmul.f32 %v7982_v2, %v225_v9  ;;  %v142_v61 = vsel %vm44_vm0, %v104_v60, 0.0 }
  0xb7   :  { %v7984_v5 = vpop.eup %7983 }
  0xb8   :  { %v293_v8 = vmul.f32 %v8543_v14, %v273_v4  ;;  %v274_v10 = vmul.f32 %v7984_v5, %v226_v3 }
  0xba   :  { %v313_v12 = vadd.f32 %v8549_v24, %v293_v8  ;;  %v294_v13 = vmul.f32 %v8543_v14, %v274_v10 }
  0xbc   :  { %6568 = vmatprep.mubr.msk.f32.mxu0 %vm44_vm0, %v313_v12  ;;  %v314_v11 = vadd.f32 %v8549_v24, %v294_v13 }
  0xbd   :  { %v7986_v16 = vpop.eup %7985 }
  0xbe   :  { %6569 = vmatmul.mubr.msk.f32.gmra.mrb[4].mxu0 %vm44_vm0, %v314_v11  ;;  %v275_v18 = vmul.f32 %v7986_v16, %v227_v15 }
  0xbf   :  { %v7988_v19 = vpop.eup %7987 }
  0xc0   :  { %v295_v20 = vmul.f32 %v8543_v14, %v275_v18  ;;  %v276_v21 = vmul.f32 %v7988_v19, %v228_v17 }
  0xc2   :  { %v315_v22 = vadd.f32 %v8549_v24, %v295_v20  ;;  %v296_v0 = vmul.f32 %v8543_v14, %v276_v21 }
  0xc4   :  { %6571 = vmatprep.mubr.msk.f32.mxu0 %vm44_vm0, %v315_v22  ;;  %v316_v23 = vadd.f32 %v8549_v24, %v296_v0 }
  0xc6   :  { %6572 = vmatmul.mubr.msk.f32.gmra.mrb[6].mxu0 %vm44_vm0, %v316_v23 }
 0x181   :  { %v6564_v27 = vpop.f32.mrb[0].mxu0 }
 0x182   :  { %v8593_v28 = vadd.f32 %v6564_v27, %v8590_v26  ;;  %v447_v29 = vpop.f32.mrb[1].mxu0 }
 0x183   :  { %v8596_v30 = vadd.f32 %v447_v29, %v8590_v26 }
 0x185   :  { %6602 = vmatprep.mubr.msk.f32.mxu1 %vm554_vm1, %v8596_v30  ;;  %v8602_v31 = vpack.i.bf16 %v8593_v28, %v8596_v30 }
 0x187   :  { %7654 = vrot.lane.b32.xlu0 %v8602_v31, %s8380_s28 }
 0x189   :  { %v6567_v62 = vpop.f32.mrb[2].mxu0 }
 0x18a   :  { %v8607_v32 = vadd.f32 %v6567_v62, %v8590_v26  ;;  %v457_v33 = vpop.f32.mrb[3].mxu0 }
 0x18b   :  { %v8610_v34 = vadd.f32 %v457_v33, %v8590_v26 }
 0x18d   :  { %v8614_v35 = vpack.i.bf16 %v8607_v32, %v8610_v34 }
 0x18f   :  { %7659 = vrot.lane.b32.xlu1 %v8614_v35, %s8380_s28 }
 0x191   :  { %v6570_v36 = vpop.f32.mrb[4].mxu0 }
 0x192   :  { %v8619_v37 = vadd.f32 %v6570_v36, %v8590_v26  ;;  %v467_v38 = vpop.f32.mrb[5].mxu0 }
 0x193   :  { %v8622_v39 = vadd.f32 %v467_v38, %v8590_v26 }
 0x195   :  { %v8626_v40 = vpack.i.bf16 %v8619_v37, %v8622_v39 }
 0x197   :  { %7664 = vrot.lane.b32.xlu1 %v8626_v40, %s8380_s28 }
 0x199   :  { %v6573_v1 = vpop.f32.mrb[6].mxu0 }
 0x19a   :  { %v8631_v41 = vadd.f32 %v6573_v1, %v8590_v26  ;;  %v477_v42 = vpop.f32.mrb[7].mxu0 }
 0x19b   :  { %v8634_v43 = vadd.f32 %v477_v42, %v8590_v26 }
 0x19d   :  { %v8638_v44 = vpack.i.bf16 %v8631_v41, %v8634_v43 }
 0x19f   :  { %7669 = vrot.lane.b32.xlu1 %v8638_v44, %s8380_s28 }
 0x1a6   :  { %70 = vadd.xlane.f32.xlu0 %v69_v46 }
 0x1aa   :  { %134 = vadd.xlane.f32.xlu0 %v133_v48 }
 0x1ae   :  { %76 = vadd.xlane.f32.xlu0 %v75_v50 }
 0x1b2   :  { %140 = vadd.xlane.f32.xlu0 %v139_v52 }
 0x1c3   :  { %73 = vadd.xlane.f32.xlu1 %v72_v56 }
 0x1c7   :  { %137 = vadd.xlane.f32.xlu1 %v136_v53 }
 0x1cb   :  { %79 = vadd.xlane.f32.xlu1 %v78_v59 }
 0x1cf   :  { %143 = vadd.xlane.f32.xlu1 %v142_v61 }
 0x1f9   :  { %v7655_v63 = vpop.permute.xlu0 %7654 }
 0x1fa   :  { %v7657_v9 = vunpack.i.h.bf16 %v7655_v63  ;;  %v7656_v58 = vunpack.i.l.bf16 %v7655_v63 }
 0x1fc   :  { %v7226_v3 = vpack.c.bf16 %v7657_v9, %v7656_v58 }
 0x1fe   :  { %7228 = vmatprep.subr.msk.bf16.mxu1 %vm8684_vm2, %v7226_v3 }
 0x1ff   :  { %7231 = vmatpush3.bf16.xpose.msk.msra.mxu1 %vm8684_vm2, %v7226_v3  ;;  %v8729_v3 = vld [vmem:[%s10656_s0 + $0x68] sm:$0xff] }
 0x201   :  { %v7660_v4 = vpop.permute.xlu1 %7659 }
 0x202   :  { %v7662_v5 = vunpack.i.h.bf16 %v7660_v4  ;;  %v7661_v8 = vunpack.i.l.bf16 %v7660_v4 }
 0x204   :  { %v7232_v10 = vpack.c.bf16 %v7662_v5, %v7661_v8 }
 0x206   :  { %7234 = vmatprep.subr.msk.bf16.mxu1 %vm8684_vm2, %v7232_v10 }
 0x207   :  { %7237 = vmatpush3.bf16.xpose.msk.msra.mxu1 %vm8684_vm2, %v7232_v10 }
 0x209   :  { %v7665_v12 = vpop.permute.xlu1 %7664 }
 0x20a   :  { %v7667_v13 = vunpack.i.h.bf16 %v7665_v12  ;;  %v7666_v15 = vunpack.i.l.bf16 %v7665_v12  ;;  %v8740_v12 = vld [vmem:[%s10656_s0 + $0x60] sm:$0xff] }
 0x20c   :  { %v7238_v11 = vpack.c.bf16 %v7667_v13, %v7666_v15  ;;  %v84_v15 = vsel %vm44_vm0, %v8729_v3, 0.0 }
 0x20e   :  { %7240 = vmatprep.subr.msk.bf16.mxu1 %vm8684_vm2, %v7238_v11 }
 0x20f   :  { %7243 = vmatpush3.bf16.xpose.msk.msra.mxu1 %vm8684_vm2, %v7238_v11  ;;  %v106_v11 = vmul.f32 %v8729_v3, %v8729_v3 }
 0x211   :  { %v7670_v16 = vpop.permute.xlu1 %7669 }
 0x212   :  { %v7672_v17 = vunpack.i.h.bf16 %v7670_v16  ;;  %v7671_v18 = vunpack.i.l.bf16 %v7670_v16 }
 0x214   :  { %v7244_v19 = vpack.c.bf16 %v7672_v17, %v7671_v18  ;;  %v81_v17 = vsel %vm44_vm0, %v8740_v12, 0.0  ;;  %v105_v18 = vmul.f32 %v8740_v12, %v8740_v12 }
 0x216   :  { %7246 = vmatprep.subr.msk.bf16.mxu1 %vm8684_vm2, %v7244_v19 }
 0x217   :  { %7249 = vmatpush3.bf16.xpose.msk.msra.mxu1 %vm8684_vm2, %v7244_v19 }
 0x21e   :  { %6603 = vmatmul.mubr.msk.f32.vlgmr.msra.gmra.mrb[0].mxu1 %vm554_vm1, %v8593_v28 }
 0x21f   :  { %6605 = vmatprep.mubr.msk.f32.mxu1 %vm554_vm1, %v8610_v34 }
 0x222   :  { %6606 = vmatmul.mubr.msk.f32.gmra.mrb[2].mxu1 %vm554_vm1, %v8607_v32 }
 0x223   :  { %6608 = vmatprep.mubr.msk.f32.mxu1 %vm554_vm1, %v8622_v39 }
 0x226   :  { %6609 = vmatmul.mubr.msk.f32.gmra.mrb[4].mxu1 %vm554_vm1, %v8619_v37 }
 0x227   :  { %6611 = vmatprep.mubr.msk.f32.mxu1 %vm554_vm1, %v8634_v43 }
 0x22a   :  { %6612 = vmatmul.mubr.msk.f32.gmra.mrb[6].mxu1 %vm554_vm1, %v8631_v41 }
 0x233   :  { %v71_v20 = vpop.xlane.xlu0 %70 }
 0x234   :  { %v165_v21 = vmul.f32 0.03125, %v71_v20 }
 0x236   :  { %v197_v22 = vmul.f32 %v165_v21, %v165_v21  ;;  %v229_v29 = vsub.f32 %v8645_v45, %v165_v21  ;;  %v148_v21 = vsel %vm44_vm0, %v106_v11, 0.0 }
 0x237   :  { %v135_v0 = vpop.xlane.xlu0 %134 }
 0x238   :  { %v181_v23 = vmul.f32 0.03125, %v135_v0  ;;  %v145_v0 = vsel %vm44_vm0, %v105_v18, 0.0 }
 0x23a   :  { %v213_v25 = vsub.f32 %v181_v23, %v197_v22  ;;  %v8763_v23 = vld [vmem:[%s10656_s0 + $0x78] sm:$0xff] }
 0x23b   :  { %v77_v42 = vpop.xlane.xlu0 %76 }
 0x23c   :  { %v245_v27 = vadd.f32 1e-05, %v213_v25  ;;  %v167_v47 = vmul.f32 0.03125, %v77_v42 }
 0x23e   :  { %7989 = vrsqrt.f32 %v245_v27  ;;  %v199_v56 = vmul.f32 %v167_v47, %v167_v47 }
 0x23f   :  { %v141_v50 = vpop.xlane.xlu0 %140 }
 0x240   :  { %v183_v7 = vmul.f32 0.03125, %v141_v50 }
 0x242   :  { %v215_v59 = vsub.f32 %v183_v7, %v199_v56 }
 0x244   :  { %v247_v63 = vadd.f32 1e-05, %v215_v59 }
 0x248   :  { %v7990_v62 = vpop.eup %7989 }
 0x249   :  { %v277_v33 = vmul.f32 %v7990_v62, %v229_v29  ;;  %v8770_v29 = vld [vmem:[%s10656_s0 + $0x70] sm:$0xff] }
 0x24b   :  { %v297_v36 = vmul.f32 %v8543_v14, %v277_v33 }
 0x24d   :  { %v317_v38 = vadd.f32 %v8549_v24, %v297_v36  ;;  %v231_v36 = vsub.f32 %v8655_v49, %v167_v47 }
 0x24f   :  { %6574 = vmatprep.mubr.msk.f32.mxu0 %vm44_vm0, %v317_v38 }
 0x250   :  { %v74_v1 = vpop.xlane.xlu1 %73 }
 0x251   :  { %v166_v46 = vmul.f32 0.03125, %v74_v1  ;;  %v90_v1 = vsel %vm44_vm0, %v8763_v23, 0.0 }
 0x253   :  { %v198_v51 = vmul.f32 %v166_v46, %v166_v46  ;;  %v230_v62 = vsub.f32 %v8665_v54, %v166_v46 }
 0x254   :  { %v138_v48 = vpop.xlane.xlu1 %137 }
 0x255   :  { %v182_v52 = vmul.f32 0.03125, %v138_v48  ;;  %v87_v48 = vsel %vm44_vm0, %v8770_v29, 0.0 }
 0x257   :  { %v214_v45 = vsub.f32 %v182_v52, %v198_v51 }
 0x258   :  { %v80_v53 = vpop.xlane.xlu1 %79 }
 0x259   :  { %v246_v60 = vadd.f32 1e-05, %v214_v45  ;;  %v8722_v61 = vmul.f32 0.03125, %v80_v53  ;;  %v108_v53 = vmul.f32 %v8763_v23, %v8763_v23 }
 0x25b   :  { %7991 = vrsqrt.f32 %v246_v60  ;;  %v200_v4 = vmul.f32 %v8722_v61, %v8722_v61  ;;  %v232_v59 = vsub.f32 %v8675_v57, %v8722_v61 }
 0x25c   :  { %v144_v9 = vpop.xlane.xlu1 %143  ;;  %7993 = vrsqrt.f32 %v247_v63 }
 0x25d   :  { %v184_v5 = vmul.f32 0.03125, %v144_v9  ;;  %v154_v9 = vsel %vm44_vm0, %v108_v53, 0.0 }
 0x25f   :  { %v216_v19 = vsub.f32 %v184_v5, %v200_v4 }
 0x261   :  { %v248_v25 = vadd.f32 1e-05, %v216_v19 }
 0x263   :  { %7995 = vrsqrt.f32 %v248_v25 }
 0x265   :  { %v7992_v33 = vpop.eup %7991 }
 0x266   :  { %v7994_v38 = vpop.eup %7993  ;;  %v278_v51 = vmul.f32 %v7992_v33, %v230_v62 }
 0x267   :  { %v279_v54 = vmul.f32 %v7994_v38, %v231_v36 }
 0x268   :  { %v298_v46 = vmul.f32 %v8543_v14, %v278_v51 }
 0x269   :  { %v299_v49 = vmul.f32 %v8543_v14, %v279_v54 }
 0x26a   :  { %v318_v52 = vadd.f32 %v8549_v24, %v298_v46 }
 0x26b   :  { %v319_v7 = vadd.f32 %v8549_v24, %v299_v49 }
 0x26c   :  { %6575 = vmatmul.mubr.msk.f32.gmra.mrb[8].mxu0 %vm44_vm0, %v318_v52 }
 0x26d   :  { %6577 = vmatprep.mubr.msk.f32.mxu0 %vm44_vm0, %v319_v7  ;;  %v7996_v60 = vpop.eup %7995 }
 0x26e   :  { %v280_v4 = vmul.f32 %v7996_v60, %v232_v59 }
 0x2f1   :  { %v8724_v58 = vpop.f32.mrb[0].mxu1 }
 0x2f2   :  { %v8733_v8 = vpop.f32.mrb[1].mxu1  ;;  %v696_v10 = vsel %vm692_vm3, %v8724_v58, -inf }
 0x2f3   :  { %697 = vmax.xlane.f32.xlu1 %v696_v10  ;;  %v693_v13 = vsel %vm692_vm3, %v8733_v8, -inf  ;;  %v300_v10 = vmul.f32 %v8543_v14, %v280_v4 }
 0x2f4   :  { %694 = vmax.xlane.f32.xlu0 %v693_v13  ;;  %v107_v13 = vmul.f32 %v8770_v29, %v8770_v29 }
 0x2f5   :  { %v8748_v16 = vpop.f32.mrb[2].mxu1  ;;  %v320_v57 = vadd.f32 %v8549_v24, %v300_v10 }
 0x2f6   :  { %v8754_v20 = vpop.f32.mrb[3].mxu1  ;;  %v702_v56 = vsel %vm692_vm3, %v8748_v16, -inf }
 0x2f7   :  { %85 = vadd.xlane.f32.xlu1 %v84_v15  ;;  %v699_v63 = vsel %vm692_vm3, %v8754_v20, -inf  ;;  %6578 = vmatmul.mubr.msk.f32.gmra.mrb[10].mxu0 %vm44_vm0, %v320_v57  ;;  %v151_v15 = vsel %vm44_vm0, %v107_v13, 0.0 }
 0x2f8   :  { %82 = vadd.xlane.f32.xlu0 %v81_v17 }
 0x2f9   :  { %v8757_v22 = vpop.f32.mrb[4].mxu1 }
 0x2fa   :  { %v8765_v27 = vpop.f32.mrb[5].mxu1  ;;  %v708_v47 = vsel %vm692_vm3, %v8757_v22, -inf }
 0x2fb   :  { %149 = vadd.xlane.f32.xlu1 %v148_v21  ;;  %v705_v5 = vsel %vm692_vm3, %v8765_v27, -inf }
 0x2fc   :  { %146 = vadd.xlane.f32.xlu0 %v145_v0 }
 0x2fd   :  { %v8776_v42 = vpop.f32.mrb[6].mxu1 }
 0x2fe   :  { %v8780_v50 = vpop.f32.mrb[7].mxu1  ;;  %v714_v45 = vsel %vm692_vm3, %v8776_v42, -inf }
 0x2ff   :  { %91 = vadd.xlane.f32.xlu1 %v90_v1  ;;  %v711_v61 = vsel %vm692_vm3, %v8780_v50, -inf }
 0x300   :  { %88 = vadd.xlane.f32.xlu0 %v87_v48 }
 0x303   :  { %709 = vmax.xlane.f32.xlu1 %v708_v47 }
 0x304   :  { %703 = vmax.xlane.f32.xlu0 %v702_v56 }
 0x307   :  { %715 = vmax.xlane.f32.xlu1 %v714_v45 }
 0x308   :  { %700 = vmax.xlane.f32.xlu0 %v699_v63 }
 0x30b   :  { %155 = vadd.xlane.f32.xlu1 %v154_v9 }
 0x30c   :  { %706 = vmax.xlane.f32.xlu0 %v705_v5 }
 0x310   :  { %712 = vmax.xlane.f32.xlu0 %v711_v61 }
 0x314   :  { %152 = vadd.xlane.f32.xlu0 %v151_v15 }
 0x31c   :  { %7679 = vrot.lane.b32.xlu1 %v8614_v35, %s8381_s22 }
 0x320   :  { %7684 = vrot.lane.b32.xlu1 %v8626_v40, %s8381_s22 }
 0x324   :  { %7689 = vrot.lane.b32.xlu1 %v8638_v44, %s8381_s22 }
 0x328   :  { %7699 = vrot.lane.b32.xlu1 %v8614_v35, %s8382_s23 }
 0x32a   :  { %7674 = vrot.lane.b32.xlu0 %v8602_v31, %s8381_s22 }
 0x32e   :  { %7694 = vrot.lane.b32.xlu0 %v8602_v31, %s8382_s23 }
 0x380   :  { %v698_v11 = vpop.xlane.xlu1 %697 }
 0x381   :  { %v718_v17 = vsub.f32 %v8724_v58, %v698_v11  ;;  %v695_v18 = vpop.xlane.xlu0 %694 }
 0x382   :  { %v717_v19 = vsub.f32 %v8733_v8, %v695_v18 }
 0x383   :  { %v727_v21 = vmul.f32 1.442695, %v718_v17 }
 0x384   :  { %v725_v0 = vmul.f32 1.442695, %v717_v19  ;;  %v86_v25 = vpop.xlane.xlu1 %85 }
 0x385   :  { %7997 = vpow2.f32 %v727_v21  ;;  %v170_v62 = vmul.f32 0.03125, %v86_v25  ;;  %v83_v33 = vpop.xlane.xlu0 %82 }
 0x386   :  { %7999 = vpow2.f32 %v725_v0  ;;  %v169_v36 = vmul.f32 0.03125, %v83_v33 }
 0x387   :  { %v202_v38 = vmul.f32 %v170_v62, %v170_v62  ;;  %v234_v61 = vsub.f32 %v8729_v3, %v170_v62 }
 0x388   :  { %v150_v1 = vpop.xlane.xlu1 %149  ;;  %v201_v54 = vmul.f32 %v169_v36, %v169_v36  ;;  %v233_v21 = vsub.f32 %v8740_v12, %v169_v36 }
 0x389   :  { %v186_v48 = vmul.f32 0.03125, %v150_v1  ;;  %v147_v51 = vpop.xlane.xlu0 %146 }
 0x38a   :  { %v185_v46 = vmul.f32 0.03125, %v147_v51 }
 0x38b   :  { %v218_v49 = vsub.f32 %v186_v48, %v202_v38 }
 0x38c   :  { %v217_v47 = vsub.f32 %v185_v46, %v201_v54  ;;  %v92_v58 = vpop.xlane.xlu1 %91 }
 0x38d   :  { %v250_v52 = vadd.f32 1e-05, %v218_v49  ;;  %v89_v56 = vpop.xlane.xlu0 %88  ;;  %v8834_v4 = vmul.f32 0.03125, %v92_v58 }
 0x38e   :  { %v249_v8 = vadd.f32 1e-05, %v217_v47  ;;  %v171_v46 = vmul.f32 0.03125, %v89_v56 }
 0x38f   :  { %v8825_v7 = vpop.eup %7997  ;;  %8001 = vrsqrt.f32 %v250_v52  ;;  %v204_v11 = vmul.f32 %v8834_v4, %v8834_v4 }
 0x390   :  { %v8827_v53 = vpop.eup %7999  ;;  %8003 = vrsqrt.f32 %v249_v8  ;;  %v710_v45 = vpop.xlane.xlu1 %709  ;;  %v744_v59 = vsel %vm692_vm3, %v8825_v7, 0.0  ;;  %v203_v52 = vmul.f32 %v171_v46, %v171_v46 }
 0x391   :  { %v704_v60 = vpop.xlane.xlu0 %703  ;;  %745 = vadd.xlane.f32.xlu1 %v744_v59  ;;  %v741_v63 = vsel %vm692_vm3, %v8827_v53, 0.0  ;;  %v722_v5 = vsub.f32 %v8757_v22, %v710_v45 }
 0x392   :  { %v720_v9 = vsub.f32 %v8748_v16, %v704_v60  ;;  %742 = vadd.xlane.f32.xlu0 %v741_v63 }
 0x393   :  { %v735_v17 = vmul.f32 1.442695, %v722_v5 }
 0x394   :  { %v731_v10 = vmul.f32 1.442695, %v720_v9  ;;  %v8837_v13 = vpop.xlane.xlu1 %715 }
 0x395   :  { %v701_v57 = vpop.xlane.xlu0 %700 }
 0x396   :  { %8005 = vpow2.f32 %v731_v10  ;;  %v719_v15 = vsub.f32 %v8754_v20, %v701_v57 }
 0x398   :  { %v729_v18 = vmul.f32 1.442695, %v719_v15  ;;  %v156_v16 = vpop.xlane.xlu1 %155 }
 0x399   :  { %v8002_v19 = vpop.eup %8001  ;;  %v188_v0 = vmul.f32 0.03125, %v156_v16  ;;  %v707_v22 = vpop.xlane.xlu0 %706  ;;  %v236_v16 = vsub.f32 %v8763_v23, %v8834_v4  ;;  %v235_v23 = vsub.f32 %v8770_v29, %v171_v46 }
 0x39a   :  { %v8004_v25 = vpop.eup %8003  ;;  %8007 = vpow2.f32 %v729_v18  ;;  %v721_v33 = vsub.f32 %v8765_v27, %v707_v22  ;;  %v282_v38 = vmul.f32 %v8002_v19, %v234_v61 }
 0x39b   :  { %v220_v3 = vsub.f32 %v188_v0, %v204_v11  ;;  %v281_v62 = vmul.f32 %v8004_v25, %v233_v21  ;;  %8009 = vpow2.f32 %v735_v17 }
 0x39c   :  { %v733_v20 = vmul.f32 1.442695, %v721_v33  ;;  %v302_v1 = vmul.f32 %v8543_v14, %v282_v38  ;;  %v7680_v36 = vpop.permute.xlu1 %7679 }
 0x39d   :  { %v252_v48 = vadd.f32 1e-05, %v220_v3  ;;  %v8846_v51 = vpop.xlane.xlu0 %712  ;;  %v301_v54 = vmul.f32 %v8543_v14, %v281_v62  ;;  %v7682_v59 = vunpack.i.h.bf16 %v7680_v36  ;;  %v7681_v10 = vunpack.i.l.bf16 %v7680_v36 }
 0x39e   :  { %v322_v12 = vadd.f32 %v8549_v24, %v302_v1  ;;  %8011 = vpow2.f32 %v733_v20 }
 0x39f   :  { %v321_v49 = vadd.f32 %v8549_v24, %v301_v54  ;;  %8013 = vrsqrt.f32 %v252_v48  ;;  %v7254_v0 = vpack.c.bf16 %v7682_v59, %v7681_v10 }
 0x3a0   :  { %v8851_v47 = vpop.eup %8005  ;;  %v7685_v60 = vpop.permute.xlu1 %7684 }
 0x3a1   :  { %6580 = vmatprep.mubr.msk.f32.mxu0 %vm44_vm0, %v321_v49  ;;  %v153_v27 = vpop.xlane.xlu0 %152  ;;  %v750_v58 = vsel %vm692_vm3, %v8851_v47, 0.0  ;;  %v7687_v19 = vunpack.i.h.bf16 %v7685_v60  ;;  %v7686_v21 = vunpack.i.l.bf16 %v7685_v60 }
 0x3a2   :  { %v187_v8 = vmul.f32 0.03125, %v153_v27  ;;  %751 = vadd.xlane.f32.xlu1 %v750_v58  ;;  %6581 = vmatmul.mubr.msk.f32.gmra.mrb[12].mxu0 %vm44_vm0, %v322_v12 }
 0x3a3   :  { %v7258_v62 = vpack.c.bf16 %v7687_v19, %v7686_v21 }
 0x3a4   :  { %v8857_v56 = vpop.eup %8007  ;;  %v219_v45 = vsub.f32 %v187_v8, %v203_v52  ;;  %v7690_v25 = vpop.permute.xlu1 %7689 }
 0x3a5   :  { %v7675_v63 = vpop.permute.xlu0 %7674  ;;  %v747_v9 = vsel %vm692_vm3, %v8857_v56, 0.0  ;;  %v8861_v5 = vpop.eup %8009  ;;  %v7692_v38 = vunpack.i.h.bf16 %v7690_v25  ;;  %v7691_v3 = vunpack.i.l.bf16 %v7690_v25 }
 0x3a6   :  { %v251_v57 = vadd.f32 1e-05, %v219_v45  ;;  %v7677_v61 = vunpack.i.h.bf16 %v7675_v63  ;;  %v7676_v15 = vunpack.i.l.bf16 %v7675_v63  ;;  %748 = vadd.xlane.f32.xlu0 %v747_v9  ;;  %v756_v17 = vsel %vm692_vm3, %v8861_v5, 0.0 }
 0x3a7   :  { %v7262_v12 = vpack.c.bf16 %v7692_v38, %v7691_v3 }
 0x3a8   :  { %8015 = vrsqrt.f32 %v251_v57  ;;  %v7250_v11 = vpack.c.bf16 %v7677_v61, %v7676_v15  ;;  %v8865_v18 = vpop.eup %8011  ;;  %v7700_v9 = vpop.permute.xlu1 %7699 }
 0x3a9   :  { %v8014_v22 = vpop.eup %8013  ;;  %v753_v33 = vsel %vm692_vm3, %v8865_v18, 0.0  ;;  %v7695_v1 = vpop.permute.xlu0 %7694 }
 0x3aa   :  { %757 = vadd.xlane.f32.xlu0 %v756_v17  ;;  %7251 = vmatprep.subr.bf16.mxu0 %v7250_v11  ;;  %v284_v20 = vmul.f32 %v8014_v22, %v236_v16  ;;  %v7697_v48 = vunpack.i.h.bf16 %v7695_v1  ;;  %v7696_v54 = vunpack.i.l.bf16 %v7695_v1  ;;  %v7701_v17 = vunpack.i.l.bf16 %v7700_v9 }
 0x3ab   :  { %7253 = vmatpush3.bf16.msra.mxu0 %v7250_v11  ;;  %v7702_v11 = vunpack.i.h.bf16 %v7700_v9 }
 0x3ac   :  { %7255 = vmatprep.subr.bf16.mxu0 %v7254_v0  ;;  %v304_v36 = vmul.f32 %v8543_v14, %v284_v20  ;;  %v7266_v58 = vpack.c.bf16 %v7697_v48, %v7696_v54 }
 0x3ad   :  { %v7272_v21 = vpack.c.bf16 %v7702_v11, %v7701_v17 }
 0x3ae   :  { %754 = vadd.xlane.f32.xlu0 %v753_v33  ;;  %v324_v52 = vadd.f32 %v8549_v24, %v304_v36 }
 0x3af   :  { %7257 = vmatpush3.bf16.msra.mxu0 %v7254_v0 }
 0x3b0   :  { %7259 = vmatprep.subr.bf16.mxu0 %v7258_v62 }
 0x3b2   :  { %v8016_v4 = vpop.eup %8015 }
 0x3b3   :  { %7709 = vrot.lane.b32.xlu1 %v8638_v44, %s8382_s23  ;;  %7261 = vmatpush3.bf16.msra.mxu0 %v7258_v62  ;;  %v283_v49 = vmul.f32 %v8016_v4, %v235_v23 }
 0x3b4   :  { %7263 = vmatprep.subr.bf16.mxu0 %v7262_v12 }
 0x3b5   :  { %v303_v27 = vmul.f32 %v8543_v14, %v283_v49  ;;  %v724_v14 = vsub.f32 %v8776_v42, %v8837_v13  ;;  %v8904_v13 = vpop.f32.mrb[8].mxu0 }
 0x3b6   :  { %v8908_v45 = vpop.f32.mrb[9].mxu0 }
 0x3b7   :  { %1074 = vrot.lane.b32.xlu1 %v8593_v28, %s8383_s24  ;;  %7265 = vmatpush3.bf16.msra.mxu0 %v7262_v12  ;;  %v323_v29 = vadd.f32 %v8549_v24, %v303_v27  ;;  %v739_v46 = vmul.f32 1.442695, %v724_v14  ;;  %v723_v24 = vsub.f32 %v8780_v50, %v8846_v51 }
 0x3b8   :  { %7268 = vmatprep.subr.msk.bf16.mxu0 %vm8684_vm2, %v7266_v58 }
 0x3b9   :  { %6583 = vmatprep.mubr.msk.f32.mxu0 %vm44_vm0, %v323_v29  ;;  %8017 = vpow2.f32 %v739_v46  ;;  %v737_v8 = vmul.f32 1.442695, %v723_v24 }
 0x3ba   :  { %6584 = vmatmul.mubr.msk.f32.gmra.mrb[14].mxu0 %vm44_vm0, %v324_v52 }
 0x3bb   :  { %8019 = vpow2.f32 %v737_v8 }
 0x3c3   :  { %v8898_v42 = vpop.eup %8017 }
 0x3c4   :  { %7704 = vrot.lane.b32.xlu0 %v8626_v40, %s8382_s23  ;;  %v762_v50 = vsel %vm692_vm3, %v8898_v42, 0.0 }
 0x3c5   :  { %v8906_v51 = vpop.eup %8019 }
 0x3c6   :  { %v759_v59 = vsel %vm692_vm3, %v8906_v51, 0.0 }
 0x3c8   :  { %1072 = vrot.lane.b32.xlu0 %v8596_v30, %s8383_s24 }
 0x3ca   :  { %v8916_v60 = vpop.f32.mrb[10].mxu0 }
 0x3cb   :  { %v8920_v63 = vpop.f32.mrb[11].mxu0 }
 0x3cc   :  { %1076 = vrot.lane.b32.xlu0 %v8610_v34, %s8383_s24 }
 0x3d0   :  { %1080 = vrot.lane.b32.xlu0 %v8622_v39, %s8383_s24 }
 0x3d4   :  { %1084 = vrot.lane.b32.xlu0 %v8634_v43, %s8383_s24 }
 0x3d8   :  { %7714 = vrot.lane.b32.xlu0 %v8602_v31, %s8384_s2 }
 0x3db   :  { %763 = vadd.xlane.f32.xlu1 %v762_v50 }
 0x3dc   :  { %7724 = vrot.lane.b32.xlu0 %v8626_v40, %s8384_s2 }
 0x3df   :  { %760 = vadd.xlane.f32.xlu1 %v759_v59 }
 0x3e0   :  { %1620 = vrot.lane.b32.xlu0 %v8596_v30, %s8385_s25 }
 0x3e4   :  { %1624 = vrot.lane.b32.xlu0 %v8610_v34, %s8385_s25 }
 0x3e8   :  { %1628 = vrot.lane.b32.xlu0 %v8622_v39, %s8385_s25 }
 0x3ec   :  { %1632 = vrot.lane.b32.xlu0 %v8634_v43, %s8385_s25 }
 0x3f0   :  { %1078 = vrot.lane.b32.xlu1 %v8607_v32, %s8383_s24 }
 0x3f4   :  { %1082 = vrot.lane.b32.xlu1 %v8619_v37, %s8383_s24 }
 0x3f8   :  { %1086 = vrot.lane.b32.xlu1 %v8631_v41, %s8383_s24 }
 0x3fc   :  { %7719 = vrot.lane.b32.xlu1 %v8614_v35, %s8384_s2 }
 0x400   :  { %7729 = vrot.lane.b32.xlu1 %v8638_v44, %s8384_s2 }
 0x404   :  { %1622 = vrot.lane.b32.xlu1 %v8593_v28, %s8385_s25 }
 0x408   :  { %1626 = vrot.lane.b32.xlu1 %v8607_v32, %s8385_s25 }
 0x40c   :  { %1630 = vrot.lane.b32.xlu1 %v8619_v37, %s8385_s25 }
 0x410   :  { %1634 = vrot.lane.b32.xlu1 %v8631_v41, %s8385_s25 }
 0x41e   :  { %v746_v10 = vpop.xlane.xlu1 %745 }
 0x41f   :  { %8021 = vrcp.f32 %v746_v10  ;;  %v743_v57 = vpop.xlane.xlu0 %742 }
 0x420   :  { %8023 = vrcp.f32 %v743_v57 }
 0x429   :  { %v8022_v61 = vpop.eup %8021 }
 0x42a   :  { %v8024_v15 = vpop.eup %8023  ;;  %v774_v19 = vmul.f32 %v8022_v61, %v8825_v7 }
 0x42b   :  { %v773_v16 = vmul.f32 %v8024_v15, %v8827_v53 }
 0x42d   :  { %6630 = vmatprep.mubr.msk.f32.mxu0 %vm692_vm3, %v773_v16 }
 0x42e   :  { %6631 = vmatmul.mubr.msk.f32.vlgmr.msra.gmra.mrb[16].mxu0 %vm692_vm3, %v774_v19 }
 0x42f   :  { %7271 = vmatpush3.bf16.xpose.msk.msra.mxu0 %vm8684_vm2, %v7266_v58  ;;  %v752_v0 = vpop.xlane.xlu1 %751 }
 0x430   :  { %7274 = vmatprep.subr.msk.bf16.mxu0 %vm8684_vm2, %v7272_v21  ;;  %8025 = vrcp.f32 %v752_v0 }
 0x433   :  { %v749_v22 = vpop.xlane.xlu0 %748  ;;  %v7710_v25 = vpop.permute.xlu1 %7709 }
 0x434   :  { %8027 = vrcp.f32 %v749_v22  ;;  %v7712_v3 = vunpack.i.h.bf16 %v7710_v25  ;;  %v7711_v1 = vunpack.i.l.bf16 %v7710_v25 }
 0x436   :  { %v7284_v36 = vpack.c.bf16 %v7712_v3, %v7711_v1 }
 0x437   :  { %7277 = vmatpush3.bf16.xpose.msk.msra.mxu0 %vm8684_vm2, %v7272_v21  ;;  %v758_v53 = vpop.xlane.xlu0 %757  ;;  %v1075_v50 = vpop.permute.xlu1 %1074 }
 0x438   :  { %8029 = vrcp.f32 %v758_v53 }
 0x43a   :  { %v8026_v33 = vpop.eup %8025 }
 0x43b   :  { %v755_v7 = vpop.xlane.xlu0 %754  ;;  %v776_v48 = vmul.f32 %v8026_v33, %v8851_v47 }
 0x43c   :  { %8031 = vrcp.f32 %v755_v7 }
 0x43e   :  { %v8028_v38 = vpop.eup %8027 }
 0x43f   :  { %v7705_v62 = vpop.permute.xlu0 %7704  ;;  %v775_v20 = vmul.f32 %v8028_v38, %v8857_v56 }
 0x440   :  { %v7707_v23 = vunpack.i.h.bf16 %v7705_v62  ;;  %v7706_v4 = vunpack.i.l.bf16 %v7705_v62 }
 0x441   :  { %6633 = vmatprep.mubr.msk.f32.mxu0 %vm692_vm3, %v775_v20 }
 0x442   :  { %v7278_v54 = vpack.c.bf16 %v7707_v23, %v7706_v4  ;;  %6634 = vmatmul.mubr.msk.f32.gmra.mrb[18].mxu0 %vm692_vm3, %v776_v48  ;;  %v8030_v49 = vpop.eup %8029 }
 0x443   :  { %v1073_v12 = vpop.permute.xlu0 %1072  ;;  %v778_v58 = vmul.f32 %v8030_v49, %v8861_v5 }
 0x444   :  { %7280 = vmatprep.subr.msk.bf16.mxu0 %vm8684_vm2, %v7278_v54 }
 0x445   :  { %7283 = vmatpush3.bf16.xpose.msk.msra.mxu0 %vm8684_vm2, %v7278_v54 }
 0x446   :  { %v8032_v56 = vpop.eup %8031  ;;  %7286 = vmatprep.subr.msk.bf16.mxu0 %vm8684_vm2, %v7284_v36 }
 0x447   :  { %v1077_v27 = vpop.permute.xlu0 %1076  ;;  %v777_v47 = vmul.f32 %v8032_v56, %v8865_v18 }
 0x449   :  { %6636 = vmatprep.mubr.msk.f32.mxu0 %vm692_vm3, %v777_v47 }
 0x44a   :  { %6637 = vmatmul.mubr.msk.f32.gmra.mrb[20].mxu0 %vm692_vm3, %v778_v58 }
 0x44b   :  { %v1081_v52 = vpop.permute.xlu0 %1080 }
 0x44d   :  { %7289 = vmatpush3.bf16.xpose.msk.msra.mxu0 %vm8684_vm2, %v7284_v36 }
 0x44f   :  { %v1085_v29 = vpop.permute.xlu0 %1084 }
 0x453   :  { %v7715_v14 = vpop.permute.xlu0 %7714 }
 0x454   :  { %v7717_v46 = vunpack.i.h.bf16 %v7715_v14  ;;  %v7716_v24 = vunpack.i.l.bf16 %v7715_v14 }
 0x456   :  { %v7306_v8 = vpack.c.bf16 %v7717_v46, %v7716_v24 }
 0x457   :  { %v7725_v53 = vpop.permute.xlu0 %7724 }
 0x458   :  { %7308 = vmatprep.subr.msk.bf16.mxu0 %vm8684_vm2, %v7306_v8  ;;  %v7726_v7 = vunpack.i.l.bf16 %v7725_v53 }
 0x45b   :  { %v1621_v38 = vpop.permute.xlu0 %1620 }
 0x45f   :  { %v1625_v48 = vpop.permute.xlu0 %1624 }
 0x468   :  { %v764_v18 = vpop.xlane.xlu1 %763 }
 0x469   :  { %8033 = vrcp.f32 %v764_v18 }
 0x46c   :  { %v761_v5 = vpop.xlane.xlu1 %760 }
 0x46d   :  { %8035 = vrcp.f32 %v761_v5 }
 0x470   :  { %v1079_v59 = vpop.permute.xlu1 %1078 }
 0x473   :  { %v8034_v57 = vpop.eup %8033 }
 0x474   :  { %v1083_v9 = vpop.permute.xlu1 %1082  ;;  %v780_v16 = vmul.f32 %v8034_v57, %v8898_v42  ;;  %v934_v42 = vld [vmem:[%s10660_s3] sm:$0xff] }
 0x475   :  { %v8972_v10 = vpop.f32.mrb[12].mxu0  ;;  %6642 = vmatprep.subr.mxu1 %v934_v42 }
 0x476   :  { %v8974_v61 = vpop.f32.mrb[13].mxu0  ;;  %6643 = vmatpush3.msra.mxu1 %v934_v42 }
 0x477   :  { %v8036_v15 = vpop.eup %8035 }
 0x478   :  { %v1087_v11 = vpop.permute.xlu1 %1086  ;;  %v779_v17 = vmul.f32 %v8036_v15, %v8906_v51  ;;  %v7727_v51 = vunpack.i.h.bf16 %v7725_v53 }
 0x47a   :  { %6639 = vmatprep.mubr.msk.f32.mxu0 %vm692_vm3, %v779_v17  ;;  %v7318_v25 = vpack.c.bf16 %v7727_v51, %v7726_v7 }
 0x47b   :  { %6640 = vmatmul.mubr.msk.f32.gmra.mrb[22].mxu0 %vm692_vm3, %v780_v16 }
 0x47c   :  { %v7720_v19 = vpop.permute.xlu1 %7719  ;;  %6672 = vmatprep.mubr.msk.f32.mxu0 %vm554_vm1, %v1073_v12  ;;  %v1629_v12 = vpop.permute.xlu0 %1628 }
 0x47d   :  { %v7722_v21 = vunpack.i.h.bf16 %v7720_v19  ;;  %v7721_v0 = vunpack.i.l.bf16 %v7720_v19 }
 0x47f   :  { %v7312_v22 = vpack.c.bf16 %v7722_v21, %v7721_v0  ;;  %6673 = vmatmul.mubr.msk.f32.vlgmr.msra.gmra.mrb[24].mxu0 %vm554_vm1, %v1075_v50 }
 0x480   :  { %7311 = vmatpush3.bf16.xpose.msk.msra.mxu0 %vm8684_vm2, %v7306_v8  ;;  %6675 = vmatprep.mubr.msk.f32.mxu0 %vm554_vm1, %v1077_v27  ;;  %v7730_v33 = vpop.permute.xlu1 %7729  ;;  %v1633_v49 = vpop.permute.xlu0 %1632 }
 0x481   :  { %7314 = vmatprep.subr.msk.bf16.mxu0 %vm8684_vm2, %v7312_v22  ;;  %v7732_v3 = vunpack.i.h.bf16 %v7730_v33  ;;  %v7731_v62 = vunpack.i.l.bf16 %v7730_v33 }
 0x483   :  { %6676 = vmatmul.mubr.msk.f32.gmra.mrb[26].mxu0 %vm554_vm1, %v1079_v59  ;;  %v7324_v23 = vpack.c.bf16 %v7732_v3, %v7731_v62 }
 0x484   :  { %6678 = vmatprep.mubr.msk.f32.mxu0 %vm554_vm1, %v1081_v52  ;;  %v1623_v4 = vpop.permute.xlu1 %1622 }
 0x487   :  { %6679 = vmatmul.mubr.msk.f32.gmra.mrb[28].mxu0 %vm554_vm1, %v1083_v9 }
 0x488   :  { %7317 = vmatpush3.bf16.xpose.msk.msra.mxu0 %vm8684_vm2, %v7312_v22  ;;  %6681 = vmatprep.mubr.msk.f32.mxu0 %vm554_vm1, %v1085_v29  ;;  %v1627_v54 = vpop.permute.xlu1 %1626 }
 0x489   :  { %7320 = vmatprep.subr.msk.bf16.mxu0 %vm8684_vm2, %v7318_v25 }
 0x48b   :  { %6682 = vmatmul.mubr.msk.f32.gmra.mrb[30].mxu0 %vm554_vm1, %v1087_v11 }
 0x48c   :  { %6742 = vmatprep.mubr.msk.f32.mxu0 %vm554_vm1, %v1621_v38  ;;  %v1631_v36 = vpop.permute.xlu1 %1630 }
 0x48d   :  { %v9000_v20 = vpop.f32.mrb[14].mxu0 }
 0x48e   :  { %v9002_v1 = vpop.f32.mrb[15].mxu0 }
 0x490   :  { %7323 = vmatpush3.bf16.xpose.msk.msra.mxu0 %vm8684_vm2, %v7318_v25  ;;  %v1635_v56 = vpop.permute.xlu1 %1634 }
 0x491   :  { %7326 = vmatprep.subr.msk.bf16.mxu0 %vm8684_vm2, %v7324_v23 }
 0x498   :  { %7329 = vmatpush3.bf16.xpose.msk.msra.mxu0 %vm8684_vm2, %v7324_v23 }
 0x49f   :  { %6743 = vmatmul.mubr.msk.f32.vlgmr.msra.gmra.mrb[32].mxu0 %vm554_vm1, %v1623_v4 }
 0x4a0   :  { %6745 = vmatprep.mubr.msk.f32.mxu0 %vm554_vm1, %v1625_v48 }
 0x4a3   :  { %6746 = vmatmul.mubr.msk.f32.gmra.mrb[34].mxu0 %vm554_vm1, %v1627_v54 }
 0x4a4   :  { %6748 = vmatprep.mubr.msk.f32.mxu0 %vm554_vm1, %v1629_v12 }
 0x4a7   :  { %6749 = vmatmul.mubr.msk.f32.gmra.mrb[36].mxu0 %vm554_vm1, %v1631_v36 }
 0x4a8   :  { %6751 = vmatprep.mubr.msk.f32.mxu0 %vm554_vm1, %v1633_v49 }
 0x4ab   :  { %6752 = vmatmul.mubr.msk.f32.gmra.mrb[38].mxu0 %vm554_vm1, %v1635_v56 }
 0x501   :  { %v6632_v27 = vpop.f32.mrb[16].mxu0 }
 0x502   :  { %v895_v47 = vpop.f32.mrb[17].mxu0 }
 0x503   :  { %6644 = vmatprep.mubr.msk.f32.mxu1 %vm554_vm1, %v895_v47 }
 0x504   :  { %6645 = vmatmul.mubr.msk.f32.vlgmr.msra.gmra.mrb[8].mxu1 %vm554_vm1, %v6632_v27 }
 0x515   :  { %v6635_v58 = vpop.f32.mrb[18].mxu0 }
 0x516   :  { %v905_v52 = vpop.f32.mrb[19].mxu0 }
 0x517   :  { %6647 = vmatprep.mubr.msk.f32.mxu1 %vm554_vm1, %v905_v52 }
 0x518   :  { %6648 = vmatmul.mubr.msk.f32.gmra.mrb[10].mxu1 %vm554_vm1, %v6635_v58 }
 0x51d   :  { %v6638_v29 = vpop.f32.mrb[20].mxu0 }
 0x51e   :  { %v915_v14 = vpop.f32.mrb[21].mxu0 }
 0x51f   :  { %6650 = vmatprep.mubr.msk.f32.mxu1 %vm554_vm1, %v915_v14 }
 0x520   :  { %6651 = vmatmul.mubr.msk.f32.gmra.mrb[12].mxu1 %vm554_vm1, %v6638_v29 }
 0x54e   :  { %v6641_v46 = vpop.f32.mrb[22].mxu0 }
 0x54f   :  { %v925_v24 = vpop.f32.mrb[23].mxu0 }
 0x550   :  { %6653 = vmatprep.mubr.msk.f32.mxu1 %vm554_vm1, %v925_v24 }
 0x551   :  { %6654 = vmatmul.mubr.msk.f32.gmra.mrb[14].mxu1 %vm554_vm1, %v6641_v46 }
 0x552   :  { %v6674_v8 = vpop.f32.mrb[24].mxu0 }
 0x553   :  { %v1202_v50 = vpop.f32.mrb[25].mxu0  ;;  %v1244_v18 = vsel %vm692_vm3, %v6674_v8, -inf }
 0x554   :  { %1245 = vmax.xlane.f32.xlu1 %v1244_v18  ;;  %v1241_v5 = vsel %vm692_vm3, %v1202_v50, -inf }
 0x555   :  { %1242 = vmax.xlane.f32.xlu0 %v1241_v5 }
 0x556   :  { %v6677_v59 = vpop.f32.mrb[26].mxu0 }
 0x557   :  { %v1212_v9 = vpop.f32.mrb[27].mxu0  ;;  %v1250_v57 = vsel %vm692_vm3, %v6677_v59, -inf }
 0x558   :  { %v1247_v16 = vsel %vm692_vm3, %v1212_v9, -inf }
 0x559   :  { %1251 = vmax.xlane.f32.xlu0 %v1250_v57 }
 0x55a   :  { %v6680_v15 = vpop.f32.mrb[28].mxu0 }
 0x55b   :  { %v1222_v11 = vpop.f32.mrb[29].mxu0  ;;  %v1256_v17 = vsel %vm692_vm3, %v6680_v15, -inf }
 0x55c   :  { %1257 = vmax.xlane.f32.xlu1 %v1256_v17  ;;  %v1253_v22 = vsel %vm692_vm3, %v1222_v11, -inf }
 0x55d   :  { %1248 = vmax.xlane.f32.xlu0 %v1247_v16 }
 0x55e   :  { %v6683_v19 = vpop.f32.mrb[30].mxu0 }
 0x55f   :  { %v1232_v21 = vpop.f32.mrb[31].mxu0  ;;  %v1262_v0 = vsel %vm692_vm3, %v6683_v19, -inf }
 0x560   :  { %1263 = vmax.xlane.f32.xlu1 %v1262_v0  ;;  %v1259_v53 = vsel %vm692_vm3, %v1232_v21, -inf }
 0x561   :  { %1254 = vmax.xlane.f32.xlu0 %v1253_v22 }
 0x565   :  { %1260 = vmax.xlane.f32.xlu0 %v1259_v53 }
 0x571   :  { %7739 = vrot.lane.b32.xlu1 %v8614_v35, %s8386_s29 }
 0x572   :  { %v9035_v42 = vpop.f32.mrb[32].mxu0 }
 0x573   :  { %v9037_v51 = vpop.f32.mrb[33].mxu0 }
 0x576   :  { %v9039_v7 = vpop.f32.mrb[34].mxu0 }
 0x577   :  { %v9041_v25 = vpop.f32.mrb[35].mxu0 }
 0x57a   :  { %v9043_v33 = vpop.f32.mrb[36].mxu0 }
 0x57b   :  { %v9045_v38 = vpop.f32.mrb[37].mxu0  ;;  %7734 = vrot.lane.b32.xlu0 %v8602_v31, %s8386_s29 }
 0x57e   :  { %v9049_v3 = vpop.f32.mrb[38].mxu0 }
 0x57f   :  { %v9051_v62 = vpop.f32.mrb[39].mxu0 }
 0x5e1   :  { %v1246_v23 = vpop.xlane.xlu1 %1245 }
 0x5e2   :  { %v1266_v4 = vsub.f32 %v6674_v8, %v1246_v23  ;;  %v1243_v48 = vpop.xlane.xlu0 %1242 }
 0x5e3   :  { %v1265_v54 = vsub.f32 %v1202_v50, %v1243_v48 }
 0x5e4   :  { %v1275_v12 = vmul.f32 1.442695, %v1266_v4 }
 0x5e5   :  { %v1273_v36 = vmul.f32 1.442695, %v1265_v54 }
 0x5e6   :  { %8037 = vpow2.f32 %v1275_v12  ;;  %v1252_v49 = vpop.xlane.xlu0 %1251 }
 0x5e7   :  { %8039 = vpow2.f32 %v1273_v36  ;;  %v1268_v56 = vsub.f32 %v6677_v59, %v1252_v49 }
 0x5e9   :  { %v1279_v27 = vmul.f32 1.442695, %v1268_v56  ;;  %v1258_v47 = vpop.xlane.xlu1 %1257 }
 0x5ea   :  { %v1270_v58 = vsub.f32 %v6680_v15, %v1258_v47  ;;  %v1249_v52 = vpop.xlane.xlu0 %1248 }
 0x5eb   :  { %8041 = vpow2.f32 %v1279_v27  ;;  %v1267_v29 = vsub.f32 %v1212_v9, %v1249_v52 }
 0x5ec   :  { %v1283_v14 = vmul.f32 1.442695, %v1270_v58 }
 0x5ed   :  { %v1277_v46 = vmul.f32 1.442695, %v1267_v29  ;;  %v1264_v24 = vpop.xlane.xlu1 %1263 }
 0x5ee   :  { %8043 = vpow2.f32 %v1283_v14  ;;  %v1272_v18 = vsub.f32 %v6683_v19, %v1264_v24  ;;  %v1255_v8 = vpop.xlane.xlu0 %1254 }
 0x5ef   :  { %8045 = vpow2.f32 %v1277_v46  ;;  %v1269_v50 = vsub.f32 %v1222_v11, %v1255_v8 }
 0x5f0   :  { %v9053_v5 = vpop.eup %8037  ;;  %v1287_v57 = vmul.f32 1.442695, %v1272_v18 }
 0x5f1   :  { %v9055_v17 = vpop.eup %8039  ;;  %v1281_v59 = vmul.f32 1.442695, %v1269_v50  ;;  %v1292_v15 = vsel %vm692_vm3, %v9053_v5, 0.0  ;;  %v7740_v11 = vpop.permute.xlu1 %7739 }
 0x5f2   :  { %8047 = vpow2.f32 %v1287_v57  ;;  %1293 = vadd.xlane.f32.xlu1 %v1292_v15  ;;  %v1261_v9 = vpop.xlane.xlu0 %1260  ;;  %v1289_v16 = vsel %vm692_vm3, %v9055_v17, 0.0  ;;  %v7742_v12 = vunpack.i.h.bf16 %v7740_v11  ;;  %v7741_v36 = vunpack.i.l.bf16 %v7740_v11 }
 0x5f3   :  { %8049 = vpow2.f32 %v1281_v59  ;;  %v1271_v19 = vsub.f32 %v1232_v21, %v1261_v9  ;;  %1290 = vadd.xlane.f32.xlu0 %v1289_v16 }
 0x5f4   :  { %v7294_v58 = vpack.c.bf16 %v7742_v12, %v7741_v36 }
 0x5f5   :  { %v9061_v0 = vpop.eup %8041  ;;  %v1285_v22 = vmul.f32 1.442695, %v1271_v19 }
 0x5f6   :  { %v7735_v53 = vpop.permute.xlu0 %7734  ;;  %v1298_v23 = vsel %vm692_vm3, %v9061_v0, 0.0 }
 0x5f7   :  { %8051 = vpow2.f32 %v1285_v22  ;;  %v7737_v4 = vunpack.i.h.bf16 %v7735_v53  ;;  %v7736_v48 = vunpack.i.l.bf16 %v7735_v53  ;;  %1299 = vadd.xlane.f32.xlu1 %v1298_v23 }
 0x5f8   :  { %v9065_v54 = vpop.eup %8043 }
 0x5f9   :  { %v9067_v49 = vpop.eup %8045  ;;  %v1304_v21 = vsel %vm692_vm3, %v9065_v54, 0.0  ;;  %v7290_v56 = vpack.c.bf16 %v7737_v4, %v7736_v48 }
 0x5fa   :  { %v1295_v27 = vsel %vm692_vm3, %v9067_v49, 0.0 }
 0x5fb   :  { %1305 = vadd.xlane.f32.xlu1 %v1304_v21  ;;  %1296 = vadd.xlane.f32.xlu0 %v1295_v27 }
 0x5fc   :  { %v9073_v47 = vpop.eup %8047  ;;  %7291 = vmatprep.subr.bf16.mxu1 %v7290_v56 }
 0x5fd   :  { %v9075_v52 = vpop.eup %8049  ;;  %7293 = vmatpush3.bf16.msra.mxu1 %v7290_v56  ;;  %v1310_v29 = vsel %vm692_vm3, %v9073_v47, 0.0 }
 0x5fe   :  { %7295 = vmatprep.subr.bf16.mxu1 %v7294_v58  ;;  %v1301_v14 = vsel %vm692_vm3, %v9075_v52, 0.0 }
 0x5ff   :  { %1311 = vadd.xlane.f32.xlu1 %v1310_v29  ;;  %1302 = vadd.xlane.f32.xlu0 %v1301_v14 }
 0x601   :  { %v9081_v46 = vpop.eup %8051  ;;  %7297 = vmatpush3.bf16.msra.mxu1 %v7294_v58 }
 0x602   :  { %v1307_v24 = vsel %vm692_vm3, %v9081_v46, 0.0 }
 0x603   :  { %1308 = vadd.xlane.f32.xlu1 %v1307_v24 }
 0x614   :  { %7749 = vrot.lane.b32.xlu1 %v8638_v44, %s8386_s29 }
 0x615   :  { %7744 = vrot.lane.b32.xlu0 %v8626_v40, %s8386_s29 }
 0x618   :  { %7759 = vrot.lane.b32.xlu1 %v8614_v35, %s8387_s30 }
 0x619   :  { %7754 = vrot.lane.b32.xlu0 %v8602_v31, %s8387_s30 }
 0x61c   :  { %7769 = vrot.lane.b32.xlu1 %v8638_v44, %s8387_s30 }
 0x61d   :  { %7764 = vrot.lane.b32.xlu0 %v8626_v40, %s8387_s30 }
 0x620   :  { %2170 = vrot.lane.b32.xlu1 %v8593_v28, %s8388_s8  ;;  %v1789_v28 = vsel %vm692_vm3, %v9037_v51, -inf }
 0x621   :  { %2168 = vrot.lane.b32.xlu0 %v8596_v30, %s8388_s8  ;;  %v1795_v30 = vsel %vm692_vm3, %v9041_v25, -inf }
 0x624   :  { %2174 = vrot.lane.b32.xlu1 %v8607_v32, %s8388_s8  ;;  %v1792_v32 = vsel %vm692_vm3, %v9035_v42, -inf }
 0x625   :  { %2172 = vrot.lane.b32.xlu0 %v8610_v34, %s8388_s8  ;;  %v1798_v34 = vsel %vm692_vm3, %v9039_v7, -inf }
 0x628   :  { %2178 = vrot.lane.b32.xlu1 %v8619_v37, %s8388_s8  ;;  %v1804_v37 = vsel %vm692_vm3, %v9043_v33, -inf }
 0x629   :  { %2176 = vrot.lane.b32.xlu0 %v8622_v39, %s8388_s8  ;;  %v1801_v39 = vsel %vm692_vm3, %v9045_v38, -inf }
 0x62c   :  { %2182 = vrot.lane.b32.xlu1 %v8631_v41, %s8388_s8  ;;  %v1810_v41 = vsel %vm692_vm3, %v9049_v3, -inf }
 0x62d   :  { %2180 = vrot.lane.b32.xlu0 %v8634_v43, %s8388_s8  ;;  %v1807_v43 = vsel %vm692_vm3, %v9051_v62, -inf }
 0x64c   :  { %1790 = vmax.xlane.f32.xlu0 %v1789_v28  ;;  %v1482_v28 = vld [vmem:[%s10660_s3 + $0x8] sm:$0xff] }
 0x650   :  { %1796 = vmax.xlane.f32.xlu0 %v1795_v30  ;;  %1793 = vmax.xlane.f32.xlu1 %v1792_v32 }
 0x654   :  { %1799 = vmax.xlane.f32.xlu0 %v1798_v34  ;;  %1805 = vmax.xlane.f32.xlu1 %v1804_v37 }
 0x658   :  { %1802 = vmax.xlane.f32.xlu0 %v1801_v39  ;;  %1811 = vmax.xlane.f32.xlu1 %v1810_v41 }
 0x65c   :  { %1808 = vmax.xlane.f32.xlu0 %v1807_v43 }
 0x669   :  { %7779 = vrot.lane.b32.xlu1 %v8614_v35, %s8389_s9 }
 0x672   :  { %7774 = vrot.lane.b32.xlu0 %v8602_v31, %s8389_s9 }
 0x67f   :  { %v1294_v18 = vpop.xlane.xlu1 %1293 }
 0x680   :  { %v1291_v8 = vpop.xlane.xlu0 %1290 }
 0x681   :  { %8053 = vrcp.f32 %v1291_v8 }
 0x682   :  { %8055 = vrcp.f32 %v1294_v18 }
 0x684   :  { %v1300_v50 = vpop.xlane.xlu1 %1299 }
 0x688   :  { %v1306_v57 = vpop.xlane.xlu1 %1305  ;;  %v1297_v59 = vpop.xlane.xlu0 %1296 }
 0x689   :  { %8057 = vrcp.f32 %v1297_v59 }
 0x68a   :  { %8059 = vrcp.f32 %v1300_v50 }
 0x68b   :  { %v8054_v15 = vpop.eup %8053 }
 0x68c   :  { %v1312_v9 = vpop.xlane.xlu1 %1311  ;;  %v1303_v16 = vpop.xlane.xlu0 %1302  ;;  %v1321_v19 = vmul.f32 %v8054_v15, %v9055_v17 }
 0x68d   :  { %8061 = vrcp.f32 %v1303_v16  ;;  %v8056_v29 = vpop.eup %8055 }
 0x68e   :  { %6700 = vmatprep.mubr.msk.f32.mxu1 %vm692_vm3, %v1321_v19  ;;  %8063 = vrcp.f32 %v1306_v57  ;;  %v1322_v37 = vmul.f32 %v8056_v29, %v9053_v5 }
 0x690   :  { %v1309_v11 = vpop.xlane.xlu1 %1308  ;;  %v7745_v22 = vpop.permute.xlu0 %7744 }
 0x691   :  { %v7747_v53 = vunpack.i.h.bf16 %v7745_v22  ;;  %v7746_v23 = vunpack.i.l.bf16 %v7745_v22  ;;  %8065 = vrcp.f32 %v1309_v11 }
 0x692   :  { %8067 = vrcp.f32 %v1312_v9 }
 0x693   :  { %v7298_v4 = vpack.c.bf16 %v7747_v53, %v7746_v23  ;;  %v8058_v30 = vpop.eup %8057 }
 0x694   :  { %v7750_v48 = vpop.permute.xlu1 %7749  ;;  %v7755_v12 = vpop.permute.xlu0 %7754  ;;  %v1323_v18 = vmul.f32 %v8058_v30, %v9067_v49 }
 0x695   :  { %v7752_v36 = vunpack.i.h.bf16 %v7750_v48  ;;  %v7751_v21 = vunpack.i.l.bf16 %v7750_v48  ;;  %v7757_v56 = vunpack.i.h.bf16 %v7755_v12  ;;  %v7756_v27 = vunpack.i.l.bf16 %v7755_v12  ;;  %7299 = vmatprep.subr.bf16.mxu1 %v7298_v4  ;;  %v8060_v41 = vpop.eup %8059 }
 0x696   :  { %7301 = vmatpush3.bf16.msra.mxu1 %v7298_v4  ;;  %v1324_v5 = vmul.f32 %v8060_v41, %v9061_v0 }
 0x697   :  { %v7346_v17 = vpack.c.bf16 %v7757_v56, %v7756_v27  ;;  %v7302_v58 = vpack.c.bf16 %v7752_v36, %v7751_v21  ;;  %v8062_v8 = vpop.eup %8061  ;;  %v9177_v36 = vadd.f32 %v8908_v45, %v8590_v26 }
 0x698   :  { %v7760_v14 = vpop.permute.xlu1 %7759  ;;  %v7765_v24 = vpop.permute.xlu0 %7764  ;;  %v1325_v15 = vmul.f32 %v8062_v8, %v9075_v52 }
 0x699   :  { %v7762_v32 = vunpack.i.h.bf16 %v7760_v14  ;;  %v7761_v34 = vunpack.i.l.bf16 %v7760_v14  ;;  %7303 = vmatprep.subr.bf16.mxu1 %v7302_v58  ;;  %7348 = vmatprep.subr.msk.bf16.mxu0 %vm8684_vm2, %v7346_v17  ;;  %v7767_v50 = vunpack.i.h.bf16 %v7765_v24  ;;  %v7766_v57 = vunpack.i.l.bf16 %v7765_v24  ;;  %v8064_v59 = vpop.eup %8063 }
 0x69a   :  { %7305 = vmatpush3.bf16.msra.mxu1 %v7302_v58  ;;  %7351 = vmatpush3.bf16.xpose.msk.msra.mxu0 %vm8684_vm2, %v7346_v17  ;;  %v1326_v19 = vmul.f32 %v8064_v59, %v9065_v54 }
 0x69b   :  { %v7352_v39 = vpack.c.bf16 %v7762_v32, %v7761_v34  ;;  %6712 = vmatprep.subr.mxu1 %v1482_v28  ;;  %v8066_v9 = vpop.eup %8065  ;;  %v7358_v49 = vpack.c.bf16 %v7767_v50, %v7766_v57 }
 0x69c   :  { %v2169_v43 = vpop.permute.xlu0 %2168  ;;  %v7770_v16 = vpop.permute.xlu1 %7769  ;;  %v1327_v11 = vmul.f32 %v8066_v9, %v9081_v46 }
 0x69d   :  { %6701 = vmatmul.mubr.msk.f32.vlgmr.msra.gmra.mrb[16].mxu1 %vm692_vm3, %v1322_v37  ;;  %7354 = vmatprep.subr.msk.bf16.mxu0 %vm8684_vm2, %v7352_v39  ;;  %v8068_v0 = vpop.eup %8067  ;;  %v7772_v22 = vunpack.i.h.bf16 %v7770_v16  ;;  %v7771_v52 = vunpack.i.l.bf16 %v7770_v16 }
 0x69e   :  { %6812 = vmatprep.mubr.msk.f32.mxu0 %vm554_vm1, %v2169_v43  ;;  %6703 = vmatprep.mubr.msk.f32.mxu1 %vm692_vm3, %v1323_v18  ;;  %v1328_v53 = vmul.f32 %v8068_v0, %v9073_v47 }
 0x69f   :  { %6713 = vmatpush3.msra.mxu1 %v1482_v28  ;;  %v7364_v23 = vpack.c.bf16 %v7772_v22, %v7771_v52 }
 0x6a0   :  { %v2171_v54 = vpop.permute.xlu1 %2170  ;;  %v2173_v46 = vpop.permute.xlu0 %2172 }
 0x6a1   :  { %6704 = vmatmul.mubr.msk.f32.gmra.mrb[18].mxu1 %vm692_vm3, %v1324_v5 }
 0x6a2   :  { %6706 = vmatprep.mubr.msk.f32.mxu1 %vm692_vm3, %v1325_v15  ;;  %7357 = vmatpush3.bf16.xpose.msk.msra.mxu0 %vm8684_vm2, %v7352_v39 }
 0x6a3   :  { %7360 = vmatprep.subr.msk.bf16.mxu0 %vm8684_vm2, %v7358_v49 }
 0x6a4   :  { %v2175_v4 = vpop.permute.xlu1 %2174  ;;  %v2177_v47 = vpop.permute.xlu0 %2176 }
 0x6a5   :  { %6707 = vmatmul.mubr.msk.f32.gmra.mrb[20].mxu1 %vm692_vm3, %v1326_v19 }
 0x6a6   :  { %6709 = vmatprep.mubr.msk.f32.mxu1 %vm692_vm3, %v1327_v11 }
 0x6a8   :  { %v2179_v48 = vpop.permute.xlu1 %2178  ;;  %v2181_v12 = vpop.permute.xlu0 %2180 }
 0x6a9   :  { %6710 = vmatmul.mubr.msk.f32.gmra.mrb[22].mxu1 %vm692_vm3, %v1328_v53 }
 0x6aa   :  { %7363 = vmatpush3.bf16.xpose.msk.msra.mxu0 %vm8684_vm2, %v7358_v49 }
 0x6ab   :  { %7366 = vmatprep.subr.msk.bf16.mxu0 %vm8684_vm2, %v7364_v23 }
 0x6ac   :  { %v2183_v21 = vpop.permute.xlu1 %2182 }
 0x6b2   :  { %7369 = vmatpush3.bf16.xpose.msk.msra.mxu0 %vm8684_vm2, %v7364_v23 }
 0x6b9   :  { %6813 = vmatmul.mubr.msk.f32.vlgmr.msra.gmra.mrb[40].mxu0 %vm554_vm1, %v2171_v54 }
 0x6ba   :  { %6815 = vmatprep.mubr.msk.f32.mxu0 %vm554_vm1, %v2173_v46 }
 0x6bd   :  { %6816 = vmatmul.mubr.msk.f32.gmra.mrb[42].mxu0 %vm554_vm1, %v2175_v4 }
 0x6be   :  { %6818 = vmatprep.mubr.msk.f32.mxu0 %vm554_vm1, %v2177_v47  ;;  %v9224_v47 = vadd.f32 %v8904_v13, %v8590_v26 }
 0x6c0   :  { %v9246_v13 = vpack.i.bf16 %v9224_v47, %v9177_v36 }
 0x6c1   :  { %6819 = vmatmul.mubr.msk.f32.gmra.mrb[44].mxu0 %vm554_vm1, %v2179_v48  ;;  %v9230_v48 = vadd.f32 %v8916_v60, %v8590_v26  ;;  %v9254_v60 = vadd.f32 %v9000_v20, %v8590_v26 }
 0x6c2   :  { %6821 = vmatprep.mubr.msk.f32.mxu0 %vm554_vm1, %v2181_v12  ;;  %v9234_v12 = vadd.f32 %v8920_v63, %v8590_v26  ;;  %v9258_v63 = vadd.f32 %v9002_v1, %v8590_v26 }
 0x6c4   :  { %v9274_v20 = vpack.i.bf16 %v9254_v60, %v9258_v63 }
 0x6c5   :  { %6822 = vmatmul.mubr.msk.f32.gmra.mrb[46].mxu0 %vm554_vm1, %v2183_v21  ;;  %v9238_v21 = vadd.f32 %v8972_v10, %v8590_v26  ;;  %v9262_v10 = vpack.i.bf16 %v9230_v48, %v9234_v12 }
 0x6c6   :  { %6882 = vmatprep.mubr.msk.f32.mxu0 %vm554_vm1, %v9177_v36 }
 0x6d9   :  { %v1791_v56 = vpop.xlane.xlu0 %1790 }
 0x6da   :  { %v1813_v27 = vsub.f32 %v9037_v51, %v1791_v56  ;;  %v9242_v56 = vadd.f32 %v8974_v61, %v8590_v26 }
 0x6dc   :  { %v1821_v17 = vmul.f32 1.442695, %v1813_v27  ;;  %v9266_v61 = vpack.i.bf16 %v9238_v21, %v9242_v56 }
 0x6dd   :  { %v1794_v58 = vpop.xlane.xlu1 %1793  ;;  %v1797_v29 = vpop.xlane.xlu0 %1796 }
 0x6de   :  { %8069 = vpow2.f32 %v1821_v17  ;;  %v1814_v14 = vsub.f32 %v9035_v42, %v1794_v58  ;;  %v1815_v24 = vsub.f32 %v9041_v25, %v1797_v29 }
 0x6e0   :  { %v1823_v28 = vmul.f32 1.442695, %v1814_v14  ;;  %v1825_v45 = vmul.f32 1.442695, %v1815_v24 }
 0x6e1   :  { %v1806_v30 = vpop.xlane.xlu1 %1805  ;;  %v1800_v32 = vpop.xlane.xlu0 %1799 }
 0x6e2   :  { %8071 = vpow2.f32 %v1823_v28  ;;  %v1818_v34 = vsub.f32 %v9043_v33, %v1806_v30  ;;  %v1816_v37 = vsub.f32 %v9039_v7, %v1800_v32 }
 0x6e3   :  { %8073 = vpow2.f32 %v1825_v45 }
 0x6e4   :  { %v1827_v39 = vmul.f32 1.442695, %v1816_v37  ;;  %v1831_v51 = vmul.f32 1.442695, %v1818_v34 }
 0x6e5   :  { %v1812_v41 = vpop.xlane.xlu1 %1811  ;;  %v1803_v43 = vpop.xlane.xlu0 %1802 }
 0x6e6   :  { %v1820_v18 = vsub.f32 %v9049_v3, %v1812_v41  ;;  %v1817_v42 = vsub.f32 %v9045_v38, %v1803_v43  ;;  %8075 = vpow2.f32 %v1827_v39 }
 0x6e7   :  { %8077 = vpow2.f32 %v1831_v51 }
 0x6e8   :  { %v9189_v25 = vpop.eup %8069  ;;  %v1829_v8 = vmul.f32 1.442695, %v1817_v42  ;;  %v1835_v50 = vmul.f32 1.442695, %v1820_v18 }
 0x6e9   :  { %v1809_v57 = vpop.xlane.xlu0 %1808  ;;  %v1837_v33 = vsel %vm692_vm3, %v9189_v25, 0.0  ;;  %v7780_v26 = vpop.permute.xlu1 %7779 }
 0x6ea   :  { %v1819_v7 = vsub.f32 %v9051_v62, %v1809_v57  ;;  %1838 = vadd.xlane.f32.xlu0 %v1837_v33  ;;  %8079 = vpow2.f32 %v1829_v8  ;;  %v7782_v1 = vunpack.i.h.bf16 %v7780_v26  ;;  %v7781_v27 = vunpack.i.l.bf16 %v7780_v26 }
 0x6eb   :  { %8081 = vpow2.f32 %v1835_v50 }
 0x6ec   :  { %v9194_v5 = vpop.eup %8071  ;;  %v1833_v38 = vmul.f32 1.442695, %v1819_v7  ;;  %v7334_v29 = vpack.c.bf16 %v7782_v1, %v7781_v27 }
 0x6ed   :  { %v9196_v59 = vpop.eup %8073  ;;  %v7775_v3 = vpop.permute.xlu0 %7774  ;;  %v1840_v15 = vsel %vm692_vm3, %v9194_v5, 0.0 }
 0x6ee   :  { %v7777_v9 = vunpack.i.h.bf16 %v7775_v3  ;;  %v7776_v49 = vunpack.i.l.bf16 %v7775_v3  ;;  %1841 = vadd.xlane.f32.xlu1 %v1840_v15  ;;  %v1843_v16 = vsel %vm692_vm3, %v9196_v59, 0.0  ;;  %8083 = vpow2.f32 %v1833_v38 }
 0x6ef   :  { %1844 = vadd.xlane.f32.xlu0 %v1843_v16 }
 0x6f0   :  { %v7330_v62 = vpack.c.bf16 %v7777_v9, %v7776_v49  ;;  %v9202_v19 = vpop.eup %8075 }
 0x6f1   :  { %v1846_v0 = vsel %vm692_vm3, %v9202_v19, 0.0  ;;  %v9206_v11 = vpop.eup %8077 }
 0x6f2   :  { %7331 = vmatprep.subr.bf16.mxu1 %v7330_v62  ;;  %1847 = vadd.xlane.f32.xlu1 %v1846_v0  ;;  %v1852_v52 = vsel %vm692_vm3, %v9206_v11, 0.0 }
 0x6f4   :  { %v9208_v22 = vpop.eup %8079 }
 0x6f5   :  { %v1849_v53 = vsel %vm692_vm3, %v9208_v22, 0.0  ;;  %v9214_v23 = vpop.eup %8081 }
 0x6f6   :  { %1853 = vadd.xlane.f32.xlu1 %v1852_v52  ;;  %1850 = vadd.xlane.f32.xlu0 %v1849_v53  ;;  %v1858_v54 = vsel %vm692_vm3, %v9214_v23, 0.0 }
 0x6f8   :  { %v9218_v46 = vpop.eup %8083 }
 0x6f9   :  { %v1855_v4 = vsel %vm692_vm3, %v9218_v46, 0.0 }
 0x6fa   :  { %1859 = vadd.xlane.f32.xlu1 %v1858_v54 }
 0x6fe   :  { %1856 = vadd.xlane.f32.xlu1 %v1855_v4 }
 0x70c   :  { %7784 = vrot.lane.b32.xlu0 %v8626_v40, %s8389_s9 }
 0x70f   :  { %7789 = vrot.lane.b32.xlu1 %v8638_v44, %s8389_s9 }
 0x710   :  { %7794 = vrot.lane.b32.xlu0 %v9246_v13, %s8380_s28 }
 0x713   :  { %7799 = vrot.lane.b32.xlu1 %v9262_v10, %s8380_s28 }
 0x714   :  { %7804 = vrot.lane.b32.xlu0 %v9266_v61, %s8380_s28 }
 0x717   :  { %7809 = vrot.lane.b32.xlu1 %v9274_v20, %s8380_s28  ;;  %s8390_s28 = smov 40  }
 0x770   :  { %v6702_v17 = vpop.f32.mrb[16].mxu1 }
 0x771   :  { %v1443_v58 = vpop.f32.mrb[17].mxu1 }
 0x772   :  { %6714 = vmatprep.mubr.msk.f32.mxu1 %vm554_vm1, %v1443_v58 }
 0x773   :  { %6715 = vmatmul.mubr.msk.f32.vlgmr.msra.gmra.mrb[8].mxu1 %vm554_vm1, %v6702_v17 }
 0x774   :  { %7333 = vmatpush3.bf16.msra.mxu1 %v7330_v62  ;;  %v6705_v14 = vpop.f32.mrb[18].mxu1 }
 0x775   :  { %7335 = vmatprep.subr.bf16.mxu1 %v7334_v29  ;;  %v1453_v24 = vpop.f32.mrb[19].mxu1 }
 0x776   :  { %6717 = vmatprep.mubr.msk.f32.mxu1 %vm554_vm1, %v1453_v24 }
 0x777   :  { %v1839_v28 = vpop.xlane.xlu0 %1838  ;;  %6718 = vmatmul.mubr.msk.f32.gmra.mrb[10].mxu1 %vm554_vm1, %v6705_v14 }
 0x778   :  { %8085 = vrcp.f32 %v1839_v28  ;;  %7337 = vmatpush3.bf16.msra.mxu1 %v7334_v29  ;;  %v6708_v45 = vpop.f32.mrb[20].mxu1 }
 0x779   :  { %v1463_v30 = vpop.f32.mrb[21].mxu1 }
 0x77a   :  { %6720 = vmatprep.mubr.msk.f32.mxu1 %vm554_vm1, %v1463_v30 }
 0x77b   :  { %v1842_v32 = vpop.xlane.xlu1 %1841  ;;  %6721 = vmatmul.mubr.msk.f32.gmra.mrb[12].mxu1 %vm554_vm1, %v6708_v45 }
 0x77c   :  { %v6711_v34 = vpop.f32.mrb[22].mxu1  ;;  %v1845_v39 = vpop.xlane.xlu0 %1844  ;;  %8087 = vrcp.f32 %v1842_v32 }
 0x77d   :  { %v1473_v37 = vpop.f32.mrb[23].mxu1  ;;  %8089 = vrcp.f32 %v1845_v39 }
 0x77e   :  { %6723 = vmatprep.mubr.msk.f32.mxu1 %vm554_vm1, %v1473_v37 }
 0x77f   :  { %6724 = vmatmul.mubr.msk.f32.gmra.mrb[14].mxu1 %vm554_vm1, %v6711_v34  ;;  %v1848_v51 = vpop.xlane.xlu1 %1847 }
 0x780   :  { %8091 = vrcp.f32 %v1848_v51 }
 0x782   :  { %v8086_v41 = vpop.eup %8085 }
 0x783   :  { %v1869_v43 = vmul.f32 %v8086_v41, %v9189_v25  ;;  %v1854_v18 = vpop.xlane.xlu1 %1853  ;;  %v1851_v42 = vpop.xlane.xlu0 %1850 }
 0x784   :  { %8093 = vrcp.f32 %v1851_v42 }
 0x785   :  { %6770 = vmatprep.mubr.msk.f32.mxu1 %vm692_vm3, %v1869_v43  ;;  %8095 = vrcp.f32 %v1854_v18 }
 0x786   :  { %v8088_v58 = vpop.eup %8087 }
 0x787   :  { %v1860_v8 = vpop.xlane.xlu1 %1859  ;;  %v7785_v50 = vpop.permute.xlu0 %7784  ;;  %v1870_v39 = vmul.f32 %v8088_v58, %v9194_v5 }
 0x788   :  { %v7787_v57 = vunpack.i.h.bf16 %v7785_v50  ;;  %v7786_v33 = vunpack.i.l.bf16 %v7785_v50  ;;  %v8090_v28 = vpop.eup %8089 }
 0x789   :  { %v1871_v42 = vmul.f32 %v8090_v28, %v9196_v59 }
 0x78a   :  { %v7338_v7 = vpack.c.bf16 %v7787_v57, %v7786_v33  ;;  %v8092_v43 = vpop.eup %8091 }
 0x78b   :  { %v1857_v38 = vpop.xlane.xlu1 %1856  ;;  %v7795_v3 = vpop.permute.xlu0 %7794 }
 0x78c   :  { %v7797_v15 = vunpack.i.h.bf16 %v7795_v3  ;;  %v7796_v9 = vunpack.i.l.bf16 %v7795_v3  ;;  %7339 = vmatprep.subr.bf16.mxu1 %v7338_v7  ;;  %v9288_v49 = vpop.f32.mrb[40].mxu0  ;;  %8097 = vrcp.f32 %v1857_v38 }
 0x78d   :  { %7341 = vmatpush3.bf16.msra.mxu1 %v7338_v7  ;;  %v9290_v25 = vpop.f32.mrb[41].mxu0  ;;  %v2340_v16 = vsel %vm692_vm3, %v9288_v49, -inf  ;;  %8099 = vrcp.f32 %v1860_v8  ;;  %v1872_v7 = vmul.f32 %v8092_v43, %v9202_v19 }
 0x78e   :  { %v7386_v62 = vpack.c.bf16 %v7797_v15, %v7796_v9  ;;  %2341 = vmax.xlane.f32.xlu1 %v2340_v16  ;;  %v2337_v0 = vsel %vm692_vm3, %v9290_v25, -inf  ;;  %v8094_v50 = vpop.eup %8093 }
 0x78f   :  { %v7790_v52 = vpop.permute.xlu1 %7789  ;;  %2338 = vmax.xlane.f32.xlu0 %v2337_v0  ;;  %v7805_v4 = vpop.permute.xlu0 %7804  ;;  %v1873_v3 = vmul.f32 %v8094_v50, %v9208_v22 }
 0x790   :  { %v7792_v53 = vunpack.i.h.bf16 %v7790_v52  ;;  %v7791_v54 = vunpack.i.l.bf16 %v7790_v52  ;;  %v9296_v26 = vpop.f32.mrb[42].mxu0  ;;  %7388 = vmatprep.subr.msk.bf16.mxu0 %vm8684_vm2, %v7386_v62  ;;  %v7807_v29 = vunpack.i.h.bf16 %v7805_v4  ;;  %v7806_v45 = vunpack.i.l.bf16 %v7805_v4  ;;  %v8096_v38 = vpop.eup %8095 }
 0x791   :  { %v9300_v1 = vpop.f32.mrb[43].mxu0  ;;  %7391 = vmatpush3.bf16.xpose.msk.msra.mxu0 %vm8684_vm2, %v7386_v62  ;;  %v2346_v41 = vsel %vm692_vm3, %v9296_v26, -inf  ;;  %v1874_v0 = vmul.f32 %v8096_v38, %v9206_v11  ;;  %v2030_v11 = vld [vmem:[%s10660_s3 + $0x10] sm:$0xff] }
 0x792   :  { %v2343_v27 = vsel %vm692_vm3, %v9300_v1, -inf  ;;  %v7342_v17 = vpack.c.bf16 %v7792_v53, %v7791_v54  ;;  %v7398_v57 = vpack.c.bf16 %v7807_v29, %v7806_v45 }
 0x793   :  { %v7800_v14 = vpop.permute.xlu1 %7799  ;;  %2344 = vmax.xlane.f32.xlu0 %v2343_v27 }
 0x794   :  { %v9306_v24 = vpop.f32.mrb[44].mxu0  ;;  %v7802_v30 = vunpack.i.h.bf16 %v7800_v14  ;;  %v7801_v32 = vunpack.i.l.bf16 %v7800_v14  ;;  %7343 = vmatprep.subr.bf16.mxu1 %v7342_v17 }
 0x795   :  { %v9308_v34 = vpop.f32.mrb[45].mxu0  ;;  %v2352_v37 = vsel %vm692_vm3, %v9306_v24, -inf  ;;  %7345 = vmatpush3.bf16.msra.mxu1 %v7342_v17 }
 0x796   :  { %2353 = vmax.xlane.f32.xlu1 %v2352_v37  ;;  %v7392_v51 = vpack.c.bf16 %v7802_v30, %v7801_v32  ;;  %v2349_v59 = vsel %vm692_vm3, %v9308_v34, -inf  ;;  %v8098_v15 = vpop.eup %8097  ;;  %6782 = vmatprep.subr.mxu1 %v2030_v11 }
 0x797   :  { %2347 = vmax.xlane.f32.xlu0 %v2346_v41  ;;  %v7810_v33 = vpop.permute.xlu1 %7809  ;;  %v8100_v52 = vpop.eup %8099  ;;  %v1875_v19 = vmul.f32 %v8098_v15, %v9218_v46 }
 0x798   :  { %v9315_v18 = vpop.f32.mrb[46].mxu0  ;;  %6771 = vmatmul.mubr.msk.f32.vlgmr.msra.gmra.mrb[24].mxu1 %vm692_vm3, %v1870_v39  ;;  %7394 = vmatprep.subr.msk.bf16.mxu0 %vm8684_vm2, %v7392_v51  ;;  %v7812_v9 = vunpack.i.h.bf16 %v7810_v33  ;;  %v7811_v16 = vunpack.i.l.bf16 %v7810_v33  ;;  %v1876_v22 = vmul.f32 %v8100_v52, %v9214_v23 }
 0x799   :  { %v9321_v8 = vpop.f32.mrb[47].mxu0  ;;  %v2358_v5 = vsel %vm692_vm3, %v9315_v18, -inf  ;;  %6773 = vmatprep.mubr.msk.f32.mxu1 %vm692_vm3, %v1871_v42  ;;  %7397 = vmatpush3.bf16.xpose.msk.msra.mxu0 %vm8684_vm2, %v7392_v51 }
 0x79a   :  { %7400 = vmatprep.subr.msk.bf16.mxu0 %vm8684_vm2, %v7398_v57  ;;  %2359 = vmax.xlane.f32.xlu1 %v2358_v5  ;;  %v2355_v62 = vsel %vm692_vm3, %v9321_v8, -inf  ;;  %v7404_v53 = vpack.c.bf16 %v7812_v9, %v7811_v16 }
 0x79b   :  { %2350 = vmax.xlane.f32.xlu0 %v2349_v59  ;;  %6783 = vmatpush3.msra.mxu1 %v2030_v11 }
 0x79c   :  { %6774 = vmatmul.mubr.msk.f32.gmra.mrb[26].mxu1 %vm692_vm3, %v1872_v7 }
 0x79d   :  { %6776 = vmatprep.mubr.msk.f32.mxu1 %vm692_vm3, %v1873_v3 }
 0x79f   :  { %2356 = vmax.xlane.f32.xlu0 %v2355_v62 }
 0x7a0   :  { %6777 = vmatmul.mubr.msk.f32.gmra.mrb[28].mxu1 %vm692_vm3, %v1874_v0 }
 0x7a1   :  { %6779 = vmatprep.mubr.msk.f32.mxu1 %vm692_vm3, %v1875_v19  ;;  %7403 = vmatpush3.bf16.xpose.msk.msra.mxu0 %vm8684_vm2, %v7398_v57 }
 0x7a2   :  { %7406 = vmatprep.subr.msk.bf16.mxu0 %vm8684_vm2, %v7404_v53 }
 0x7a4   :  { %6780 = vmatmul.mubr.msk.f32.gmra.mrb[30].mxu1 %vm692_vm3, %v1876_v22 }
 0x7a9   :  { %7409 = vmatpush3.bf16.xpose.msk.msra.mxu0 %vm8684_vm2, %v7404_v53 }
 0x7ab   :  { %7819 = vrot.lane.b32.xlu1 %v8614_v35, %s8390_s28 }
 0x7b0   :  { %6883 = vmatmul.mubr.msk.f32.vlgmr.msra.gmra.mrb[48].mxu0 %vm554_vm1, %v9224_v47 }
 0x7b1   :  { %6885 = vmatprep.mubr.msk.f32.mxu0 %vm554_vm1, %v9234_v12 }
 0x7b4   :  { %6886 = vmatmul.mubr.msk.f32.gmra.mrb[50].mxu0 %vm554_vm1, %v9230_v48 }
 0x7b5   :  { %6888 = vmatprep.mubr.msk.f32.mxu0 %vm554_vm1, %v9242_v56  ;;  %7814 = vrot.lane.b32.xlu0 %v8602_v31, %s8390_s28 }
 0x7b8   :  { %6889 = vmatmul.mubr.msk.f32.gmra.mrb[52].mxu0 %vm554_vm1, %v9238_v21 }
 0x7b9   :  { %6891 = vmatprep.mubr.msk.f32.mxu0 %vm554_vm1, %v9258_v63 }
 0x7bc   :  { %6892 = vmatmul.mubr.msk.f32.gmra.mrb[54].mxu0 %vm554_vm1, %v9254_v60 }
 0x81b   :  { %v2342_v35 = vpop.xlane.xlu1 %2341 }
 0x81c   :  { %v2362_v23 = vsub.f32 %v9288_v49, %v2342_v35  ;;  %v2339_v46 = vpop.xlane.xlu0 %2338 }
 0x81d   :  { %v2361_v54 = vsub.f32 %v9290_v25, %v2339_v46 }
 0x81e   :  { %v2371_v4 = vmul.f32 1.442695, %v2362_v23 }
 0x81f   :  { %v2369_v27 = vmul.f32 1.442695, %v2361_v54 }
 0x820   :  { %8101 = vpow2.f32 %v2371_v4  ;;  %v2345_v17 = vpop.xlane.xlu0 %2344 }
 0x821   :  { %8103 = vpow2.f32 %v2369_v27  ;;  %v2363_v31 = vsub.f32 %v9300_v1, %v2345_v17 }
 0x823   :  { %v2354_v58 = vpop.xlane.xlu1 %2353  ;;  %v2373_v29 = vmul.f32 1.442695, %v2363_v31 }
 0x824   :  { %v2366_v14 = vsub.f32 %v9306_v24, %v2354_v58  ;;  %v2348_v28 = vpop.xlane.xlu0 %2347 }
 0x825   :  { %8105 = vpow2.f32 %v2373_v29  ;;  %v2364_v45 = vsub.f32 %v9296_v26, %v2348_v28 }
 0x826   :  { %v2379_v30 = vmul.f32 1.442695, %v2366_v14 }
 0x827   :  { %v2375_v49 = vmul.f32 1.442695, %v2364_v45  ;;  %v2360_v32 = vpop.xlane.xlu1 %2359 }
 0x828   :  { %v2368_v25 = vsub.f32 %v9315_v18, %v2360_v32  ;;  %v2351_v37 = vpop.xlane.xlu0 %2350 }
 0x829   :  { %8107 = vpow2.f32 %v2375_v49  ;;  %v2365_v39 = vsub.f32 %v9308_v34, %v2351_v37 }
 0x82a   :  { %v9378_v51 = vpop.eup %8101  ;;  %8109 = vpow2.f32 %v2379_v30  ;;  %v2383_v41 = vmul.f32 1.442695, %v2368_v25 }
 0x82b   :  { %v9380_v1 = vpop.eup %8103  ;;  %v2377_v24 = vmul.f32 1.442695, %v2365_v39  ;;  %v2388_v43 = vsel %vm692_vm3, %v9378_v51, 0.0 }
 0x82c   :  { %2389 = vadd.xlane.f32.xlu1 %v2388_v43  ;;  %v2357_v26 = vpop.xlane.xlu0 %2356  ;;  %v2385_v42 = vsel %vm692_vm3, %v9380_v1, 0.0 }
 0x82d   :  { %8111 = vpow2.f32 %v2377_v24  ;;  %v2367_v18 = vsub.f32 %v9321_v8, %v2357_v26  ;;  %2386 = vadd.xlane.f32.xlu0 %v2385_v42 }
 0x82e   :  { %8113 = vpow2.f32 %v2383_v41 }
 0x82f   :  { %v9387_v34 = vpop.eup %8105  ;;  %v2381_v50 = vmul.f32 1.442695, %v2367_v18 }
 0x830   :  { %v7815_v57 = vpop.permute.xlu0 %7814  ;;  %v2391_v5 = vsel %vm692_vm3, %v9387_v34, 0.0 }
 0x831   :  { %v7817_v33 = vunpack.i.h.bf16 %v7815_v57  ;;  %v7816_v59 = vunpack.i.l.bf16 %v7815_v57  ;;  %2392 = vadd.xlane.f32.xlu0 %v2391_v5  ;;  %8115 = vpow2.f32 %v2381_v50 }
 0x833   :  { %v9391_v7 = vpop.eup %8107  ;;  %v7370_v38 = vpack.c.bf16 %v7817_v33, %v7816_v59 }
 0x834   :  { %v2394_v3 = vsel %vm692_vm3, %v9391_v7, 0.0  ;;  %v9395_v8 = vpop.eup %8109 }
 0x835   :  { %2395 = vadd.xlane.f32.xlu1 %v2394_v3  ;;  %7371 = vmatprep.subr.bf16.mxu1 %v7370_v38  ;;  %v2400_v9 = vsel %vm692_vm3, %v9395_v8, 0.0 }
 0x837   :  { %v9397_v15 = vpop.eup %8111 }
 0x838   :  { %v2397_v16 = vsel %vm692_vm3, %v9397_v15, 0.0  ;;  %v9403_v62 = vpop.eup %8113 }
 0x839   :  { %2401 = vadd.xlane.f32.xlu1 %v2400_v9  ;;  %2398 = vadd.xlane.f32.xlu0 %v2397_v16  ;;  %v2406_v0 = vsel %vm692_vm3, %v9403_v62, 0.0 }
 0x83b   :  { %v9407_v52 = vpop.eup %8115 }
 0x83c   :  { %v2403_v19 = vsel %vm692_vm3, %v9407_v52, 0.0 }
 0x83d   :  { %2407 = vadd.xlane.f32.xlu1 %v2406_v0 }
 0x841   :  { %2404 = vadd.xlane.f32.xlu1 %v2403_v19 }
 0x84f   :  { %7824 = vrot.lane.b32.xlu0 %v8626_v40, %s8390_s28  ;;  %v7820_v40 = vpop.permute.xlu1 %7819 }
 0x850   :  { %v7821_v53 = vunpack.i.l.bf16 %v7820_v40 }
 0x852   :  { %7829 = vrot.lane.b32.xlu1 %v8638_v44, %s8390_s28  ;;  %v7822_v44 = vunpack.i.h.bf16 %v7820_v40 }
 0x853   :  { %7834 = vrot.lane.b32.xlu0 %v9246_v13, %s8382_s23 }
 0x854   :  { %v7374_v35 = vpack.c.bf16 %v7822_v44, %v7821_v53 }
 0x856   :  { %7839 = vrot.lane.b32.xlu1 %v9262_v10, %s8382_s23 }
 0x857   :  { %7844 = vrot.lane.b32.xlu0 %v9266_v61, %s8382_s23 }
 0x85a   :  { %7849 = vrot.lane.b32.xlu1 %v9274_v20, %s8382_s23 }
 0x85b   :  { %3255 = vrot.lane.b32.xlu0 %v9177_v36, %s8383_s24 }
 0x85e   :  { %3257 = vrot.lane.b32.xlu1 %v9224_v47, %s8383_s24 }
 0x85f   :  { %3259 = vrot.lane.b32.xlu0 %v9234_v12, %s8383_s24 }
 0x862   :  { %3261 = vrot.lane.b32.xlu1 %v9230_v48, %s8383_s24 }
 0x863   :  { %3263 = vrot.lane.b32.xlu0 %v9242_v56, %s8383_s24 }
 0x866   :  { %3265 = vrot.lane.b32.xlu1 %v9238_v21, %s8383_s24 }
 0x867   :  { %3267 = vrot.lane.b32.xlu0 %v9258_v63, %s8383_s24 }
 0x86a   :  { %3269 = vrot.lane.b32.xlu1 %v9254_v60, %s8383_s24 }
 0x86b   :  { %v6772_v22 = vpop.f32.mrb[24].mxu1 }
 0x86c   :  { %v1991_v11 = vpop.f32.mrb[25].mxu1 }
 0x86d   :  { %6784 = vmatprep.mubr.msk.f32.mxu1 %vm554_vm1, %v1991_v11 }
 0x86e   :  { %6785 = vmatmul.mubr.msk.f32.vlgmr.msra.gmra.mrb[8].mxu1 %vm554_vm1, %v6772_v22 }
 0x86f   :  { %7373 = vmatpush3.bf16.msra.mxu1 %v7370_v38  ;;  %v6775_v23 = vpop.f32.mrb[26].mxu1 }
 0x870   :  { %7375 = vmatprep.subr.bf16.mxu1 %v7374_v35  ;;  %v2001_v46 = vpop.f32.mrb[27].mxu1 }
 0x871   :  { %6787 = vmatprep.mubr.msk.f32.mxu1 %vm554_vm1, %v2001_v46 }
 0x872   :  { %6788 = vmatmul.mubr.msk.f32.gmra.mrb[10].mxu1 %vm554_vm1, %v6775_v23 }
 0x873   :  { %7377 = vmatpush3.bf16.msra.mxu1 %v7374_v35  ;;  %v6778_v54 = vpop.f32.mrb[28].mxu1 }
 0x874   :  { %v2011_v4 = vpop.f32.mrb[29].mxu1 }
 0x875   :  { %6790 = vmatprep.mubr.msk.f32.mxu1 %vm554_vm1, %v2011_v4 }
 0x876   :  { %6791 = vmatmul.mubr.msk.f32.gmra.mrb[12].mxu1 %vm554_vm1, %v6778_v54 }
 0x877   :  { %v6781_v27 = vpop.f32.mrb[30].mxu1 }
 0x878   :  { %v2021_v17 = vpop.f32.mrb[31].mxu1 }
 0x879   :  { %6793 = vmatprep.mubr.msk.f32.mxu1 %vm554_vm1, %v2021_v17 }
 0x87a   :  { %6794 = vmatmul.mubr.msk.f32.gmra.mrb[14].mxu1 %vm554_vm1, %v6781_v27 }
 0x883   :  { %v9447_v31 = vpop.f32.mrb[48].mxu0 }
 0x884   :  { %v9449_v58 = vpop.f32.mrb[49].mxu0  ;;  %v2880_v25 = vsel %vm692_vm3, %v9447_v31, -inf }
 0x885   :  { %v2877_v29 = vsel %vm692_vm3, %v9449_v58, -inf }
 0x886   :  { %2878 = vmax.xlane.f32.xlu0 %v2877_v29  ;;  %v2578_v29 = vld [vmem:[%s10660_s3 + $0x18] sm:$0xff] }
 0x887   :  { %v9453_v14 = vpop.f32.mrb[50].mxu0 }
 0x888   :  { %v9455_v28 = vpop.f32.mrb[51].mxu0  ;;  %v2886_v32 = vsel %vm692_vm3, %v9453_v14, -inf }
 0x889   :  { %v2883_v45 = vsel %vm692_vm3, %v9455_v28, -inf }
 0x88a   :  { %2884 = vmax.xlane.f32.xlu0 %v2883_v45 }
 0x88b   :  { %v9459_v30 = vpop.f32.mrb[52].mxu0 }
 0x88c   :  { %v9461_v49 = vpop.f32.mrb[53].mxu0  ;;  %v2892_v24 = vsel %vm692_vm3, %v9459_v30, -inf }
 0x88d   :  { %v2889_v41 = vsel %vm692_vm3, %v9461_v49, -inf }
 0x88e   :  { %2887 = vmax.xlane.f32.xlu0 %v2886_v32  ;;  %2881 = vmax.xlane.f32.xlu1 %v2880_v25 }
 0x88f   :  { %v9467_v37 = vpop.f32.mrb[54].mxu0 }
 0x890   :  { %v9469_v39 = vpop.f32.mrb[55].mxu0  ;;  %v2898_v26 = vsel %vm692_vm3, %v9467_v37, -inf }
 0x891   :  { %v2895_v43 = vsel %vm692_vm3, %v9469_v39, -inf }
 0x892   :  { %2890 = vmax.xlane.f32.xlu0 %v2889_v41  ;;  %2893 = vmax.xlane.f32.xlu1 %v2892_v24 }
 0x896   :  { %2896 = vmax.xlane.f32.xlu0 %v2895_v43  ;;  %2899 = vmax.xlane.f32.xlu1 %v2898_v26 }
 0x8a7   :  { %7859 = vrot.lane.b32.xlu1 %v9262_v10, %s8381_s22 }
 0x8ac   :  { %7854 = vrot.lane.b32.xlu0 %v9246_v13, %s8381_s22 }
 0x8b9   :  { %v2390_v18 = vpop.xlane.xlu1 %2389 }
 0x8ba   :  { %v2387_v42 = vpop.xlane.xlu0 %2386 }
 0x8bb   :  { %8117 = vrcp.f32 %v2387_v42 }
 0x8bc   :  { %8119 = vrcp.f32 %v2390_v18 }
 0x8be   :  { %v2393_v50 = vpop.xlane.xlu0 %2392 }
 0x8bf   :  { %8121 = vrcp.f32 %v2393_v50 }
 0x8c2   :  { %v2396_v57 = vpop.xlane.xlu1 %2395 }
 0x8c3   :  { %8123 = vrcp.f32 %v2396_v57 }
 0x8c5   :  { %v8118_v5 = vpop.eup %8117 }
 0x8c6   :  { %v2402_v33 = vpop.xlane.xlu1 %2401  ;;  %v2399_v59 = vpop.xlane.xlu0 %2398  ;;  %v2417_v38 = vmul.f32 %v8118_v5, %v9380_v1 }
 0x8c7   :  { %8125 = vrcp.f32 %v2399_v59  ;;  %v8120_v4 = vpop.eup %8119 }
 0x8c8   :  { %6840 = vmatprep.mubr.msk.f32.mxu1 %vm692_vm3, %v2417_v38  ;;  %8127 = vrcp.f32 %v2402_v33  ;;  %v2418_v43 = vmul.f32 %v8120_v4, %v9378_v51 }
 0x8c9   :  { %v8122_v45 = vpop.eup %8121 }
 0x8ca   :  { %v2408_v3 = vpop.xlane.xlu1 %2407  ;;  %v7825_v9 = vpop.permute.xlu0 %7824  ;;  %v2419_v18 = vmul.f32 %v8122_v45, %v9387_v34 }
 0x8cb   :  { %v7827_v16 = vunpack.i.h.bf16 %v7825_v9  ;;  %v7826_v0 = vunpack.i.l.bf16 %v7825_v9 }
 0x8cd   :  { %v7378_v19 = vpack.c.bf16 %v7827_v16, %v7826_v0  ;;  %v8124_v42 = vpop.eup %8123 }
 0x8ce   :  { %v2405_v40 = vpop.xlane.xlu1 %2404  ;;  %v7835_v44 = vpop.permute.xlu0 %7834  ;;  %v2420_v51 = vmul.f32 %v8124_v42, %v9391_v7 }
 0x8cf   :  { %v7837_v53 = vunpack.i.h.bf16 %v7835_v44  ;;  %v7836_v22 = vunpack.i.l.bf16 %v7835_v44  ;;  %7379 = vmatprep.subr.bf16.mxu1 %v7378_v19  ;;  %8129 = vrcp.f32 %v2405_v40 }
 0x8d0   :  { %7381 = vmatpush3.bf16.msra.mxu1 %v7378_v19  ;;  %8131 = vrcp.f32 %v2408_v3 }
 0x8d1   :  { %v7426_v11 = vpack.c.bf16 %v7837_v53, %v7836_v22  ;;  %v8126_v50 = vpop.eup %8125 }
 0x8d2   :  { %v7830_v35 = vpop.permute.xlu1 %7829  ;;  %v7845_v1 = vpop.permute.xlu0 %7844  ;;  %v2421_v33 = vmul.f32 %v8126_v50, %v9397_v15 }
 0x8d3   :  { %v7832_v23 = vunpack.i.h.bf16 %v7830_v35  ;;  %v7831_v46 = vunpack.i.l.bf16 %v7830_v35  ;;  %7428 = vmatprep.subr.msk.bf16.mxu0 %vm8684_vm2, %v7426_v11  ;;  %v7847_v32 = vunpack.i.h.bf16 %v7845_v1  ;;  %v7846_v25 = vunpack.i.l.bf16 %v7845_v1  ;;  %v8128_v34 = vpop.eup %8127 }
 0x8d4   :  { %7431 = vmatpush3.bf16.xpose.msk.msra.mxu0 %vm8684_vm2, %v7426_v11  ;;  %v2422_v9 = vmul.f32 %v8128_v34, %v9395_v8 }
 0x8d5   :  { %v7382_v54 = vpack.c.bf16 %v7832_v23, %v7831_v46  ;;  %v7438_v57 = vpack.c.bf16 %v7847_v32, %v7846_v25 }
 0x8d6   :  { %v7840_v27 = vpop.permute.xlu1 %7839  ;;  %v3256_v17 = vpop.permute.xlu0 %3255 }
 0x8d7   :  { %v7842_v41 = vunpack.i.h.bf16 %v7840_v27  ;;  %v7841_v24 = vunpack.i.l.bf16 %v7840_v27  ;;  %7383 = vmatprep.subr.bf16.mxu1 %v7382_v54  ;;  %6952 = vmatprep.mubr.msk.f32.mxu0 %vm554_vm1, %v3256_v17 }
 0x8d8   :  { %7385 = vmatpush3.bf16.msra.mxu1 %v7382_v54 }
 0x8d9   :  { %v7432_v26 = vpack.c.bf16 %v7842_v41, %v7841_v24  ;;  %6852 = vmatprep.subr.mxu1 %v2578_v29  ;;  %v8130_v59 = vpop.eup %8129 }
 0x8da   :  { %v7850_v5 = vpop.permute.xlu1 %7849  ;;  %v8132_v16 = vpop.eup %8131  ;;  %v2423_v0 = vmul.f32 %v8130_v59, %v9407_v52 }
 0x8db   :  { %6841 = vmatmul.mubr.msk.f32.vlgmr.msra.gmra.mrb[32].mxu1 %vm692_vm3, %v2418_v43  ;;  %7434 = vmatprep.subr.msk.bf16.mxu0 %vm8684_vm2, %v7432_v26  ;;  %v7852_v38 = vunpack.i.h.bf16 %v7850_v5  ;;  %v7851_v3 = vunpack.i.l.bf16 %v7850_v5  ;;  %v2424_v7 = vmul.f32 %v8132_v16, %v9403_v62  ;;  %v3260_v8 = vpop.permute.xlu0 %3259 }
 0x8dc   :  { %6843 = vmatprep.mubr.msk.f32.mxu1 %vm692_vm3, %v2419_v18  ;;  %7437 = vmatpush3.bf16.xpose.msk.msra.mxu0 %vm8684_vm2, %v7432_v26 }
 0x8dd   :  { %7440 = vmatprep.subr.msk.bf16.mxu0 %vm8684_vm2, %v7438_v57  ;;  %6853 = vmatpush3.msra.mxu1 %v2578_v29  ;;  %v7444_v19 = vpack.c.bf16 %v7852_v38, %v7851_v3 }
 0x8de   :  { %v3258_v15 = vpop.permute.xlu1 %3257 }
 0x8df   :  { %6844 = vmatmul.mubr.msk.f32.gmra.mrb[34].mxu1 %vm692_vm3, %v2420_v51  ;;  %v3264_v40 = vpop.permute.xlu0 %3263 }
 0x8e0   :  { %6846 = vmatprep.mubr.msk.f32.mxu1 %vm692_vm3, %v2421_v33 }
 0x8e2   :  { %v3262_v52 = vpop.permute.xlu1 %3261 }
 0x8e3   :  { %6847 = vmatmul.mubr.msk.f32.gmra.mrb[36].mxu1 %vm692_vm3, %v2422_v9  ;;  %v3268_v53 = vpop.permute.xlu0 %3267 }
 0x8e4   :  { %6849 = vmatprep.mubr.msk.f32.mxu1 %vm692_vm3, %v2423_v0  ;;  %7443 = vmatpush3.bf16.xpose.msk.msra.mxu0 %vm8684_vm2, %v7438_v57 }
 0x8e5   :  { %7446 = vmatprep.subr.msk.bf16.mxu0 %vm8684_vm2, %v7444_v19 }
 0x8e6   :  { %v3266_v44 = vpop.permute.xlu1 %3265 }
 0x8e7   :  { %6850 = vmatmul.mubr.msk.f32.gmra.mrb[38].mxu1 %vm692_vm3, %v2424_v7 }
 0x8ea   :  { %v3270_v62 = vpop.permute.xlu1 %3269 }
 0x8ec   :  { %7449 = vmatpush3.bf16.xpose.msk.msra.mxu0 %vm8684_vm2, %v7444_v19 }
 0x8f3   :  { %6953 = vmatmul.mubr.msk.f32.vlgmr.msra.gmra.mrb[56].mxu0 %vm554_vm1, %v3258_v15 }
 0x8f4   :  { %6955 = vmatprep.mubr.msk.f32.mxu0 %vm554_vm1, %v3260_v8 }
 0x8f7   :  { %6956 = vmatmul.mubr.msk.f32.gmra.mrb[58].mxu0 %vm554_vm1, %v3262_v52 }
 0x8f8   :  { %6958 = vmatprep.mubr.msk.f32.mxu0 %vm554_vm1, %v3264_v40 }
 0x8fb   :  { %6959 = vmatmul.mubr.msk.f32.gmra.mrb[60].mxu0 %vm554_vm1, %v3266_v44 }
 0x8fc   :  { %6961 = vmatprep.mubr.msk.f32.mxu0 %vm554_vm1, %v3268_v53 }
 0x8ff   :  { %6962 = vmatmul.mubr.msk.f32.gmra.mrb[62].mxu0 %vm554_vm1, %v3270_v62 }
 0x913   :  { %v2879_v22 = vpop.xlane.xlu0 %2878 }
 0x914   :  { %v2901_v11 = vsub.f32 %v9449_v58, %v2879_v22 }
 0x916   :  { %v2909_v35 = vmul.f32 1.442695, %v2901_v11 }
 0x917   :  { %v2885_v1 = vpop.xlane.xlu0 %2884 }
 0x918   :  { %8133 = vpow2.f32 %v2909_v35  ;;  %v2903_v23 = vsub.f32 %v9455_v28, %v2885_v1 }
 0x91a   :  { %v2913_v46 = vmul.f32 1.442695, %v2903_v23 }
 0x91b   :  { %v2882_v54 = vpop.xlane.xlu1 %2881  ;;  %v2888_v4 = vpop.xlane.xlu0 %2887 }
 0x91c   :  { %8135 = vpow2.f32 %v2913_v46  ;;  %v2902_v27 = vsub.f32 %v9447_v31, %v2882_v54  ;;  %v2904_v17 = vsub.f32 %v9453_v14, %v2888_v4 }
 0x91e   :  { %v2911_v29 = vmul.f32 1.442695, %v2902_v27  ;;  %v2915_v45 = vmul.f32 1.442695, %v2904_v17 }
 0x91f   :  { %v2894_v32 = vpop.xlane.xlu1 %2893  ;;  %v2891_v25 = vpop.xlane.xlu0 %2890 }
 0x920   :  { %8137 = vpow2.f32 %v2911_v29  ;;  %v2906_v58 = vsub.f32 %v9459_v30, %v2894_v32  ;;  %v2905_v41 = vsub.f32 %v9461_v49, %v2891_v25 }
 0x921   :  { %8139 = vpow2.f32 %v2915_v45 }
 0x922   :  { %v9532_v24 = vpop.eup %8133  ;;  %v2919_v28 = vmul.f32 1.442695, %v2906_v58  ;;  %v2917_v43 = vmul.f32 1.442695, %v2905_v41 }
 0x923   :  { %v2900_v26 = vpop.xlane.xlu1 %2899  ;;  %v2897_v42 = vpop.xlane.xlu0 %2896  ;;  %v2925_v31 = vsel %vm692_vm3, %v9532_v24, 0.0 }
 0x924   :  { %v2908_v14 = vsub.f32 %v9467_v37, %v2900_v26  ;;  %2926 = vadd.xlane.f32.xlu0 %v2925_v31  ;;  %8141 = vpow2.f32 %v2917_v43  ;;  %v2907_v49 = vsub.f32 %v9469_v39, %v2897_v42 }
 0x925   :  { %8143 = vpow2.f32 %v2919_v28 }
 0x926   :  { %v9537_v18 = vpop.eup %8135  ;;  %v2923_v30 = vmul.f32 1.442695, %v2908_v14  ;;  %v2921_v33 = vmul.f32 1.442695, %v2907_v49 }
 0x927   :  { %v7855_v50 = vpop.permute.xlu0 %7854  ;;  %v2931_v57 = vsel %vm692_vm3, %v9537_v18, 0.0  ;;  %v7860_v52 = vpop.permute.xlu1 %7859 }
 0x928   :  { %v7857_v5 = vunpack.i.h.bf16 %v7855_v50  ;;  %2932 = vadd.xlane.f32.xlu0 %v2931_v57  ;;  %v7856_v51 = vunpack.i.l.bf16 %v7855_v50  ;;  %8145 = vpow2.f32 %v2923_v30  ;;  %v7862_v40 = vunpack.i.h.bf16 %v7860_v52 }
 0x929   :  { %8147 = vpow2.f32 %v2921_v33  ;;  %v7861_v44 = vunpack.i.l.bf16 %v7860_v52 }
 0x92a   :  { %v9542_v34 = vpop.eup %8137  ;;  %v7410_v59 = vpack.c.bf16 %v7857_v5, %v7856_v51 }
 0x92b   :  { %v2928_v37 = vsel %vm692_vm3, %v9542_v34, 0.0  ;;  %v9546_v38 = vpop.eup %8139  ;;  %v7414_v11 = vpack.c.bf16 %v7862_v40, %v7861_v44 }
 0x92c   :  { %2929 = vadd.xlane.f32.xlu1 %v2928_v37  ;;  %7411 = vmatprep.subr.bf16.mxu1 %v7410_v59  ;;  %v2934_v3 = vsel %vm692_vm3, %v9546_v38, 0.0 }
 0x92e   :  { %v9548_v39 = vpop.eup %8141 }
 0x92f   :  { %v9552_v9 = vpop.eup %8143  ;;  %v2937_v16 = vsel %vm692_vm3, %v9548_v39, 0.0 }
 0x930   :  { %2935 = vadd.xlane.f32.xlu1 %v2934_v3  ;;  %2938 = vadd.xlane.f32.xlu0 %v2937_v16  ;;  %v2940_v0 = vsel %vm692_vm3, %v9552_v9, 0.0 }
 0x932   :  { %v9558_v19 = vpop.eup %8145 }
 0x933   :  { %v2946_v7 = vsel %vm692_vm3, %v9558_v19, 0.0  ;;  %v9562_v15 = vpop.eup %8147 }
 0x934   :  { %2941 = vadd.xlane.f32.xlu1 %v2940_v0  ;;  %v2943_v8 = vsel %vm692_vm3, %v9562_v15, 0.0 }
 0x938   :  { %2947 = vadd.xlane.f32.xlu1 %v2946_v7 }
 0x93c   :  { %2944 = vadd.xlane.f32.xlu1 %v2943_v8 }
 0x946   :  { %7864 = vrot.lane.b32.xlu0 %v9266_v61, %s8381_s22 }
 0x94a   :  { %7874 = vrot.lane.b32.xlu0 %v9246_v13, %s8384_s2 }
 0x94d   :  { %7869 = vrot.lane.b32.xlu1 %v9274_v20, %s8381_s22 }
 0x94e   :  { %7884 = vrot.lane.b32.xlu0 %v9266_v61, %s8384_s2 }
 0x951   :  { %7879 = vrot.lane.b32.xlu1 %v9262_v10, %s8384_s2 }
 0x952   :  { %3802 = vrot.lane.b32.xlu0 %v9177_v36, %s8385_s25 }
 0x955   :  { %7889 = vrot.lane.b32.xlu1 %v9274_v20, %s8384_s2 }
 0x956   :  { %3806 = vrot.lane.b32.xlu0 %v9234_v12, %s8385_s25 }
 0x959   :  { %3804 = vrot.lane.b32.xlu1 %v9224_v47, %s8385_s25 }
 0x95a   :  { %3810 = vrot.lane.b32.xlu0 %v9242_v56, %s8385_s25 }
 0x95d   :  { %3808 = vrot.lane.b32.xlu1 %v9230_v48, %s8385_s25 }
 0x95e   :  { %3814 = vrot.lane.b32.xlu0 %v9258_v63, %s8385_s25 }
 0x961   :  { %3812 = vrot.lane.b32.xlu1 %v9238_v21, %s8385_s25 }
 0x965   :  { %3816 = vrot.lane.b32.xlu1 %v9254_v60, %s8385_s25 }
 0x9ae   :  { %v6842_v53 = vpop.f32.mrb[32].mxu1 }
 0x9af   :  { %v2539_v62 = vpop.f32.mrb[33].mxu1 }
 0x9b0   :  { %6854 = vmatprep.mubr.msk.f32.mxu1 %vm554_vm1, %v2539_v62 }
 0x9b1   :  { %v2927_v22 = vpop.xlane.xlu0 %2926  ;;  %6855 = vmatmul.mubr.msk.f32.vlgmr.msra.gmra.mrb[8].mxu1 %vm554_vm1, %v6842_v53 }
 0x9b2   :  { %8149 = vrcp.f32 %v2927_v22  ;;  %7413 = vmatpush3.bf16.msra.mxu1 %v7410_v59  ;;  %v6845_v35 = vpop.f32.mrb[34].mxu1 }
 0x9b3   :  { %7415 = vmatprep.subr.bf16.mxu1 %v7414_v11  ;;  %v2549_v1 = vpop.f32.mrb[35].mxu1 }
 0x9b4   :  { %6857 = vmatprep.mubr.msk.f32.mxu1 %vm554_vm1, %v2549_v1 }
 0x9b5   :  { %6858 = vmatmul.mubr.msk.f32.gmra.mrb[10].mxu1 %vm554_vm1, %v6845_v35  ;;  %v2933_v4 = vpop.xlane.xlu0 %2932 }
 0x9b6   :  { %7417 = vmatpush3.bf16.msra.mxu1 %v7414_v11  ;;  %v6848_v23 = vpop.f32.mrb[36].mxu1 }
 0x9b7   :  { %v2559_v46 = vpop.f32.mrb[37].mxu1 }
 0x9b8   :  { %6860 = vmatprep.mubr.msk.f32.mxu1 %vm554_vm1, %v2559_v46 }
 0x9b9   :  { %v2930_v54 = vpop.xlane.xlu1 %2929  ;;  %6861 = vmatmul.mubr.msk.f32.gmra.mrb[12].mxu1 %vm554_vm1, %v6848_v23 }
 0x9ba   :  { %v6851_v27 = vpop.f32.mrb[38].mxu1  ;;  %8151 = vrcp.f32 %v2930_v54 }
 0x9bb   :  { %v2569_v17 = vpop.f32.mrb[39].mxu1  ;;  %8153 = vrcp.f32 %v2933_v4 }
 0x9bc   :  { %v8150_v29 = vpop.eup %8149  ;;  %6863 = vmatprep.mubr.msk.f32.mxu1 %vm554_vm1, %v2569_v17 }
 0x9bd   :  { %v2936_v45 = vpop.xlane.xlu1 %2935  ;;  %6864 = vmatmul.mubr.msk.f32.gmra.mrb[14].mxu1 %vm554_vm1, %v6851_v27  ;;  %v2957_v32 = vmul.f32 %v8150_v29, %v9532_v24  ;;  %v2939_v25 = vpop.xlane.xlu0 %2938 }
 0x9be   :  { %8155 = vrcp.f32 %v2936_v45 }
 0x9bf   :  { %6910 = vmatprep.mubr.msk.f32.mxu1 %vm692_vm3, %v2957_v32  ;;  %8157 = vrcp.f32 %v2939_v25  ;;  %v8357_v25 = vld [vmem:[%s10660_s3] sm:$0xff] }
 0x9c1   :  { %v2942_v58 = vpop.xlane.xlu1 %2941  ;;  %v7865_v41 = vpop.permute.xlu0 %7864 }
 0x9c2   :  { %v7867_v28 = vunpack.i.h.bf16 %v7865_v41  ;;  %v7866_v43 = vunpack.i.l.bf16 %v7865_v41  ;;  %8159 = vrcp.f32 %v2942_v58 }
 0x9c4   :  { %v7418_v42 = vpack.c.bf16 %v7867_v28, %v7866_v43  ;;  %v8152_v22 = vpop.eup %8151 }
 0x9c5   :  { %v2948_v26 = vpop.xlane.xlu1 %2947  ;;  %v7875_v31 = vpop.permute.xlu0 %7874  ;;  %v2958_v29 = vmul.f32 %v8152_v22, %v9542_v34 }
 0x9c6   :  { %v9604_v14 = vpop.f32.mrb[56].mxu0  ;;  %v7877_v30 = vunpack.i.h.bf16 %v7875_v31  ;;  %v7876_v49 = vunpack.i.l.bf16 %v7875_v31  ;;  %7419 = vmatprep.subr.bf16.mxu1 %v7418_v42  ;;  %v8154_v35 = vpop.eup %8153 }
 0x9c7   :  { %v9606_v50 = vpop.f32.mrb[57].mxu0  ;;  %v3427_v24 = vsel %vm692_vm3, %v9604_v14, -inf  ;;  %7421 = vmatpush3.bf16.msra.mxu1 %v7418_v42  ;;  %v2959_v41 = vmul.f32 %v8154_v35, %v9537_v18 }
 0x9c8   :  { %3428 = vmax.xlane.f32.xlu1 %v3427_v24  ;;  %v3424_v57 = vsel %vm692_vm3, %v9606_v50, -inf  ;;  %v7466_v5 = vpack.c.bf16 %v7877_v30, %v7876_v49  ;;  %v8156_v58 = vpop.eup %8155 }
 0x9c9   :  { %v2945_v51 = vpop.xlane.xlu1 %2944  ;;  %3425 = vmax.xlane.f32.xlu0 %v3424_v57  ;;  %v7885_v33 = vpop.permute.xlu0 %7884  ;;  %v2960_v18 = vmul.f32 %v8156_v58, %v9546_v38 }
 0x9ca   :  { %v9612_v37 = vpop.f32.mrb[58].mxu0  ;;  %7468 = vmatprep.subr.msk.bf16.mxu0 %vm8684_vm2, %v7466_v5  ;;  %8161 = vrcp.f32 %v2945_v51  ;;  %v7887_v1 = vunpack.i.h.bf16 %v7885_v33  ;;  %v7886_v23 = vunpack.i.l.bf16 %v7885_v33  ;;  %v8158_v28 = vpop.eup %8157 }
 0x9cb   :  { %v9616_v59 = vpop.f32.mrb[59].mxu0  ;;  %7471 = vmatpush3.bf16.xpose.msk.msra.mxu0 %vm8684_vm2, %v7466_v5  ;;  %v3433_v53 = vsel %vm692_vm3, %v9612_v37, -inf  ;;  %8163 = vrcp.f32 %v2948_v26  ;;  %v2961_v31 = vmul.f32 %v8158_v28, %v9548_v39 }
 0x9cc   :  { %v3430_v3 = vsel %vm692_vm3, %v9616_v59, -inf  ;;  %v7478_v43 = vpack.c.bf16 %v7887_v1, %v7886_v23  ;;  %v8160_v42 = vpop.eup %8159 }
 0x9cd   :  { %v7870_v16 = vpop.permute.xlu1 %7869  ;;  %3431 = vmax.xlane.f32.xlu0 %v3430_v3  ;;  %v3803_v8 = vpop.permute.xlu0 %3802  ;;  %v2962_v57 = vmul.f32 %v8160_v42, %v9552_v9 }
 0x9ce   :  { %v7872_v0 = vunpack.i.h.bf16 %v7870_v16  ;;  %v7871_v7 = vunpack.i.l.bf16 %v7870_v16  ;;  %v9622_v52 = vpop.f32.mrb[60].mxu0  ;;  %7022 = vmatprep.mubr.msk.f32.mxu0 %vm554_vm1, %v3803_v8 }
 0x9cf   :  { %v9625_v40 = vpop.f32.mrb[61].mxu0  ;;  %v3439_v44 = vsel %vm692_vm3, %v9622_v52, -inf }
 0x9d0   :  { %3440 = vmax.xlane.f32.xlu1 %v3439_v44  ;;  %v7422_v62 = vpack.c.bf16 %v7872_v0, %v7871_v7  ;;  %v3436_v32 = vsel %vm692_vm3, %v9625_v40, -inf }
 0x9d1   :  { %v7880_v11 = vpop.permute.xlu1 %7879  ;;  %3434 = vmax.xlane.f32.xlu0 %v3433_v53  ;;  %v3807_v9 = vpop.permute.xlu0 %3806 }
 0x9d2   :  { %v7882_v46 = vunpack.i.h.bf16 %v7880_v11  ;;  %v7881_v54 = vunpack.i.l.bf16 %v7880_v11  ;;  %7423 = vmatprep.subr.bf16.mxu1 %v7422_v62  ;;  %v9631_v4 = vpop.f32.mrb[62].mxu0 }
 0x9d3   :  { %7425 = vmatpush3.bf16.msra.mxu1 %v7422_v62  ;;  %v9633_v27 = vpop.f32.mrb[63].mxu0  ;;  %v3445_v17 = vsel %vm692_vm3, %v9631_v4, -inf }
 0x9d4   :  { %v7472_v45 = vpack.c.bf16 %v7882_v46, %v7881_v54  ;;  %3446 = vmax.xlane.f32.xlu1 %v3445_v17  ;;  %6922 = vmatprep.subr.mxu1 %v8357_v25  ;;  %v3442_v26 = vsel %vm692_vm3, %v9633_v27, -inf  ;;  %v8162_v30 = vpop.eup %8161 }
 0x9d5   :  { %3437 = vmax.xlane.f32.xlu0 %v3436_v32  ;;  %v7890_v34 = vpop.permute.xlu1 %7889  ;;  %v8164_v5 = vpop.eup %8163  ;;  %v2963_v51 = vmul.f32 %v8162_v30, %v9562_v15 }
 0x9d6   :  { %6911 = vmatmul.mubr.msk.f32.vlgmr.msra.gmra.mrb[40].mxu1 %vm692_vm3, %v2958_v29  ;;  %7474 = vmatprep.subr.msk.bf16.mxu0 %vm8684_vm2, %v7472_v45  ;;  %v7892_v49 = vunpack.i.h.bf16 %v7890_v34  ;;  %v7891_v24 = vunpack.i.l.bf16 %v7890_v34  ;;  %v2964_v38 = vmul.f32 %v8164_v5, %v9558_v19  ;;  %v3811_v3 = vpop.permute.xlu0 %3810 }
 0x9d7   :  { %6913 = vmatprep.mubr.msk.f32.mxu1 %vm692_vm3, %v2959_v41  ;;  %7477 = vmatpush3.bf16.xpose.msk.msra.mxu0 %vm8684_vm2, %v7472_v45 }
 0x9d8   :  { %7480 = vmatprep.subr.msk.bf16.mxu0 %vm8684_vm2, %v7478_v43  ;;  %6923 = vmatpush3.msra.mxu1 %v8357_v25  ;;  %v7484_v33 = vpack.c.bf16 %v7892_v49, %v7891_v24 }
 0x9d9   :  { %3443 = vmax.xlane.f32.xlu0 %v3442_v26  ;;  %v3805_v39 = vpop.permute.xlu1 %3804 }
 0x9da   :  { %6914 = vmatmul.mubr.msk.f32.gmra.mrb[42].mxu1 %vm692_vm3, %v2960_v18  ;;  %v3815_v16 = vpop.permute.xlu0 %3814 }
 0x9db   :  { %6916 = vmatprep.mubr.msk.f32.mxu1 %vm692_vm3, %v2961_v31 }
 0x9dd   :  { %v3809_v15 = vpop.permute.xlu1 %3808 }
 0x9de   :  { %6917 = vmatmul.mubr.msk.f32.gmra.mrb[44].mxu1 %vm692_vm3, %v2962_v57 }
 0x9df   :  { %6919 = vmatprep.mubr.msk.f32.mxu1 %vm692_vm3, %v2963_v51  ;;  %7483 = vmatpush3.bf16.xpose.msk.msra.mxu0 %vm8684_vm2, %v7478_v43 }
 0x9e0   :  { %7486 = vmatprep.subr.msk.bf16.mxu0 %vm8684_vm2, %v7484_v33 }
 0x9e1   :  { %v3813_v19 = vpop.permute.xlu1 %3812 }
 0x9e2   :  { %6920 = vmatmul.mubr.msk.f32.gmra.mrb[46].mxu1 %vm692_vm3, %v2964_v38 }
 0x9e5   :  { %7899 = vrot.lane.b32.xlu1 %v9262_v10, %s8386_s29  ;;  %v3817_v0 = vpop.permute.xlu1 %3816 }
 0x9e7   :  { %7489 = vmatpush3.bf16.xpose.msk.msra.mxu0 %vm8684_vm2, %v7484_v33 }
 0x9ee   :  { %7023 = vmatmul.mubr.msk.f32.vlgmr.msra.gmra.mrb[64].mxu0 %vm554_vm1, %v3805_v39 }
 0x9ef   :  { %7025 = vmatprep.mubr.msk.f32.mxu0 %vm554_vm1, %v3807_v9  ;;  %7894 = vrot.lane.b32.xlu0 %v9246_v13, %s8386_s29 }
 0x9f2   :  { %7026 = vmatmul.mubr.msk.f32.gmra.mrb[66].mxu0 %vm554_vm1, %v3809_v15 }
 0x9f3   :  { %7028 = vmatprep.mubr.msk.f32.mxu0 %vm554_vm1, %v3811_v3 }
 0x9f6   :  { %7029 = vmatmul.mubr.msk.f32.gmra.mrb[68].mxu0 %vm554_vm1, %v3813_v19 }
 0x9f7   :  { %7031 = vmatprep.mubr.msk.f32.mxu0 %vm554_vm1, %v3815_v16 }
 0x9fa   :  { %7032 = vmatmul.mubr.msk.f32.gmra.mrb[70].mxu0 %vm554_vm1, %v3817_v0 }
 0xa55   :  { %v3429_v7 = vpop.xlane.xlu1 %3428 }
 0xa56   :  { %v3449_v8 = vsub.f32 %v9604_v14, %v3429_v7  ;;  %v3426_v44 = vpop.xlane.xlu0 %3425 }
 0xa57   :  { %v3448_v53 = vsub.f32 %v9606_v50, %v3426_v44 }
 0xa58   :  { %v3458_v62 = vmul.f32 1.442695, %v3449_v8 }
 0xa59   :  { %v3456_v22 = vmul.f32 1.442695, %v3448_v53 }
 0xa5a   :  { %8165 = vpow2.f32 %v3458_v62  ;;  %v3432_v11 = vpop.xlane.xlu0 %3431 }
 0xa5b   :  { %8167 = vpow2.f32 %v3456_v22  ;;  %v3450_v35 = vsub.f32 %v9616_v59, %v3432_v11 }
 0xa5d   :  { %v3460_v1 = vmul.f32 1.442695, %v3450_v35  ;;  %v3441_v23 = vpop.xlane.xlu1 %3440 }
 0xa5e   :  { %v3453_v46 = vsub.f32 %v9622_v52, %v3441_v23  ;;  %v3435_v54 = vpop.xlane.xlu0 %3434 }
 0xa5f   :  { %8169 = vpow2.f32 %v3460_v1  ;;  %v3451_v17 = vsub.f32 %v9612_v37, %v3435_v54 }
 0xa60   :  { %v3466_v29 = vmul.f32 1.442695, %v3453_v46 }
 0xa61   :  { %v3462_v14 = vmul.f32 1.442695, %v3451_v17  ;;  %v3447_v45 = vpop.xlane.xlu1 %3446 }
 0xa62   :  { %v3455_v50 = vsub.f32 %v9631_v4, %v3447_v45  ;;  %v3438_v32 = vpop.xlane.xlu0 %3437 }
 0xa63   :  { %8171 = vpow2.f32 %v3462_v14  ;;  %v3452_v25 = vsub.f32 %v9625_v40, %v3438_v32 }
 0xa64   :  { %v9688_v58 = vpop.eup %8165  ;;  %8173 = vpow2.f32 %v3466_v29  ;;  %v3470_v41 = vmul.f32 1.442695, %v3455_v50 }
 0xa65   :  { %v9690_v59 = vpop.eup %8167  ;;  %v3464_v52 = vmul.f32 1.442695, %v3452_v25  ;;  %v3475_v28 = vsel %vm692_vm3, %v9688_v58, 0.0 }
 0xa66   :  { %3476 = vadd.xlane.f32.xlu1 %v3475_v28  ;;  %v3444_v37 = vpop.xlane.xlu0 %3443  ;;  %v3472_v43 = vsel %vm692_vm3, %v9690_v59, 0.0 }
 0xa67   :  { %8175 = vpow2.f32 %v3464_v52  ;;  %v3454_v4 = vsub.f32 %v9633_v27, %v3444_v37  ;;  %3473 = vadd.xlane.f32.xlu0 %v3472_v43 }
 0xa68   :  { %8177 = vpow2.f32 %v3470_v41 }
 0xa69   :  { %v9697_v40 = vpop.eup %8169  ;;  %v3468_v34 = vmul.f32 1.442695, %v3454_v4 }
 0xa6a   :  { %v7895_v26 = vpop.permute.xlu0 %7894  ;;  %v3478_v18 = vsel %vm692_vm3, %v9697_v40, 0.0 }
 0xa6b   :  { %v7897_v42 = vunpack.i.h.bf16 %v7895_v26  ;;  %v7896_v31 = vunpack.i.l.bf16 %v7895_v26  ;;  %3479 = vadd.xlane.f32.xlu0 %v3478_v18  ;;  %8179 = vpow2.f32 %v3468_v34 }
 0xa6d   :  { %v9701_v30 = vpop.eup %8171  ;;  %v7450_v49 = vpack.c.bf16 %v7897_v42, %v7896_v31 }
 0xa6e   :  { %v3481_v24 = vsel %vm692_vm3, %v9701_v30, 0.0  ;;  %v9705_v27 = vpop.eup %8173 }
 0xa6f   :  { %3482 = vadd.xlane.f32.xlu1 %v3481_v24  ;;  %7451 = vmatprep.subr.bf16.mxu1 %v7450_v49  ;;  %v3487_v5 = vsel %vm692_vm3, %v9705_v27, 0.0 }
 0xa71   :  { %v9707_v57 = vpop.eup %8175 }
 0xa72   :  { %v3484_v51 = vsel %vm692_vm3, %v9707_v57, 0.0  ;;  %v9713_v33 = vpop.eup %8177 }
 0xa73   :  { %3488 = vadd.xlane.f32.xlu1 %v3487_v5  ;;  %3485 = vadd.xlane.f32.xlu0 %v3484_v51  ;;  %v3493_v38 = vsel %vm692_vm3, %v9713_v33, 0.0 }
 0xa75   :  { %v9717_v39 = vpop.eup %8179 }
 0xa76   :  { %v3490_v9 = vsel %vm692_vm3, %v9717_v39, 0.0 }
 0xa77   :  { %3494 = vadd.xlane.f32.xlu1 %v3493_v38 }
 0xa7b   :  { %3491 = vadd.xlane.f32.xlu1 %v3490_v9 }
 0xa84   :  { %v9721_v15 = vpop.f32.mrb[8].mxu1 }
 0xa85   :  { %v9723_v3 = vpop.f32.mrb[9].mxu1 }
 0xa88   :  { %v9725_v19 = vpop.f32.mrb[10].mxu1 }
 0xa89   :  { %7904 = vrot.lane.b32.xlu0 %v9266_v61, %s8386_s29  ;;  %v9729_v16 = vpop.f32.mrb[11].mxu1 }
 0xa8c   :  { %7909 = vrot.lane.b32.xlu1 %v9274_v20, %s8386_s29  ;;  %v9733_v0 = vpop.f32.mrb[12].mxu1 }
 0xa8d   :  { %7914 = vrot.lane.b32.xlu0 %v9246_v13, %s8387_s30  ;;  %v9737_v7 = vpop.f32.mrb[13].mxu1 }
 0xa90   :  { %7919 = vrot.lane.b32.xlu1 %v9262_v10, %s8387_s30  ;;  %v9741_v8 = vpop.f32.mrb[14].mxu1 }
 0xa91   :  { %7924 = vrot.lane.b32.xlu0 %v9266_v61, %s8387_s30  ;;  %v9745_v44 = vpop.f32.mrb[15].mxu1 }
 0xa94   :  { %7929 = vrot.lane.b32.xlu1 %v9274_v20, %s8387_s30 }
 0xa95   :  { %4349 = vrot.lane.b32.xlu0 %v9177_v36, %s8388_s8  ;;  %v7900_v36 = vpop.permute.xlu1 %7899 }
 0xa96   :  { %v7901_v53 = vunpack.i.l.bf16 %v7900_v36 }
 0xa98   :  { %4351 = vrot.lane.b32.xlu1 %v9224_v47, %s8388_s8  ;;  %v7902_v47 = vunpack.i.h.bf16 %v7900_v36 }
 0xa99   :  { %4353 = vrot.lane.b32.xlu0 %v9234_v12, %s8388_s8 }
 0xa9c   :  { %4355 = vrot.lane.b32.xlu1 %v9230_v48, %s8388_s8  ;;  %v7454_v48 = vpack.c.bf16 %v7902_v47, %v7901_v53 }
 0xa9d   :  { %4357 = vrot.lane.b32.xlu0 %v9242_v56, %s8388_s8 }
 0xaa0   :  { %4359 = vrot.lane.b32.xlu1 %v9238_v21, %s8388_s8 }
 0xaa1   :  { %4361 = vrot.lane.b32.xlu0 %v9258_v63, %s8388_s8 }
 0xaa4   :  { %4363 = vrot.lane.b32.xlu1 %v9254_v60, %s8388_s8 }
 0xaa9   :  { %v6912_v62 = vpop.f32.mrb[40].mxu1 }
 0xaaa   :  { %v3079_v12 = vpop.f32.mrb[41].mxu1 }
 0xaab   :  { %6924 = vmatprep.mubr.msk.f32.mxu1 %vm554_vm1, %v3079_v12 }
 0xaac   :  { %6925 = vmatmul.mubr.msk.f32.vlgmr.msra.gmra.mrb[48].mxu1 %vm554_vm1, %v6912_v62 }
 0xaad   :  { %7453 = vmatpush3.bf16.msra.mxu1 %v7450_v49  ;;  %v6915_v56 = vpop.f32.mrb[42].mxu1 }
 0xaae   :  { %7455 = vmatprep.subr.bf16.mxu1 %v7454_v48  ;;  %v3089_v21 = vpop.f32.mrb[43].mxu1 }
 0xaaf   :  { %6927 = vmatprep.mubr.msk.f32.mxu1 %vm554_vm1, %v3089_v21 }
 0xab0   :  { %6928 = vmatmul.mubr.msk.f32.gmra.mrb[50].mxu1 %vm554_vm1, %v6915_v56 }
 0xab1   :  { %7457 = vmatpush3.bf16.msra.mxu1 %v7454_v48  ;;  %v6918_v60 = vpop.f32.mrb[44].mxu1 }
 0xab2   :  { %v3099_v63 = vpop.f32.mrb[45].mxu1 }
 0xab3   :  { %6930 = vmatprep.mubr.msk.f32.mxu1 %vm554_vm1, %v3099_v63 }
 0xab4   :  { %6931 = vmatmul.mubr.msk.f32.gmra.mrb[52].mxu1 %vm554_vm1, %v6918_v60 }
 0xab5   :  { %v6921_v22 = vpop.f32.mrb[46].mxu1 }
 0xab6   :  { %v3109_v11 = vpop.f32.mrb[47].mxu1 }
 0xab7   :  { %6933 = vmatprep.mubr.msk.f32.mxu1 %vm554_vm1, %v3109_v11 }
 0xab8   :  { %6934 = vmatmul.mubr.msk.f32.gmra.mrb[54].mxu1 %vm554_vm1, %v6921_v22 }
 0xac1   :  { %v9773_v35 = vpop.f32.mrb[64].mxu0 }
 0xac2   :  { %v9775_v1 = vpop.f32.mrb[65].mxu0  ;;  %v3974_v29 = vsel %vm692_vm3, %v9773_v35, -inf }
 0xac3   :  { %v3971_v23 = vsel %vm692_vm3, %v9775_v1, -inf }
 0xac4   :  { %3972 = vmax.xlane.f32.xlu0 %v3971_v23 }
 0xac5   :  { %v9779_v46 = vpop.f32.mrb[66].mxu0 }
 0xac6   :  { %v9781_v54 = vpop.f32.mrb[67].mxu0  ;;  %v3980_v32 = vsel %vm692_vm3, %v9779_v46, -inf }
 0xac7   :  { %v3977_v17 = vsel %vm692_vm3, %v9781_v54, -inf }
 0xac8   :  { %3978 = vmax.xlane.f32.xlu0 %v3977_v17  ;;  %3975 = vmax.xlane.f32.xlu1 %v3974_v29 }
 0xac9   :  { %v9787_v14 = vpop.f32.mrb[68].mxu0 }
 0xaca   :  { %v9789_v45 = vpop.f32.mrb[69].mxu0  ;;  %v3986_v50 = vsel %vm692_vm3, %v9787_v14, -inf }
 0xacb   :  { %v3983_v28 = vsel %vm692_vm3, %v9789_v45, -inf }
 0xacc   :  { %3981 = vmax.xlane.f32.xlu0 %v3980_v32  ;;  %3987 = vmax.xlane.f32.xlu1 %v3986_v50 }
 0xacd   :  { %v9795_v25 = vpop.f32.mrb[70].mxu0 }
 0xace   :  { %v9797_v41 = vpop.f32.mrb[71].mxu0  ;;  %v3992_v52 = vsel %vm692_vm3, %v9795_v25, -inf }
 0xacf   :  { %v3989_v37 = vsel %vm692_vm3, %v9797_v41, -inf }
 0xad0   :  { %3984 = vmax.xlane.f32.xlu0 %v3983_v28  ;;  %3993 = vmax.xlane.f32.xlu1 %v3992_v52 }
 0xad4   :  { %3990 = vmax.xlane.f32.xlu0 %v3989_v37  ;;  %v8358_v37 = vld [vmem:[%s10660_s3 + $0x8] sm:$0xff] }
 0xae1   :  { %7939 = vrot.lane.b32.xlu1 %v9262_v10, %s8389_s9 }
 0xaea   :  { %7934 = vrot.lane.b32.xlu0 %v9246_v13, %s8389_s9 }
 0xaf3   :  { %v3477_v4 = vpop.xlane.xlu1 %3476 }
 0xaf4   :  { %v3474_v43 = vpop.xlane.xlu0 %3473 }
 0xaf5   :  { %8181 = vrcp.f32 %v3474_v43 }
 0xaf6   :  { %8183 = vrcp.f32 %v3477_v4 }
 0xaf8   :  { %v3480_v34 = vpop.xlane.xlu0 %3479 }
 0xaf9   :  { %8185 = vrcp.f32 %v3480_v34 }
 0xafc   :  { %v3483_v26 = vpop.xlane.xlu1 %3482 }
 0xafd   :  { %8187 = vrcp.f32 %v3483_v26 }
 0xaff   :  { %v8182_v18 = vpop.eup %8181 }
 0xb00   :  { %v3489_v42 = vpop.xlane.xlu1 %3488  ;;  %v3486_v31 = vpop.xlane.xlu0 %3485  ;;  %v3504_v49 = vmul.f32 %v8182_v18, %v9690_v59 }
 0xb01   :  { %8189 = vrcp.f32 %v3486_v31  ;;  %v8184_v63 = vpop.eup %8183 }
 0xb02   :  { %6980 = vmatprep.mubr.msk.f32.mxu1 %vm692_vm3, %v3504_v49  ;;  %8191 = vrcp.f32 %v3489_v42  ;;  %v3505_v52 = vmul.f32 %v8184_v63, %v9688_v58 }
 0xb03   :  { %v8186_v23 = vpop.eup %8185 }
 0xb04   :  { %v3495_v24 = vpop.xlane.xlu1 %3494  ;;  %v7905_v5 = vpop.permute.xlu0 %7904  ;;  %v3506_v4 = vmul.f32 %v8186_v23, %v9697_v40 }
 0xb05   :  { %v7907_v51 = vunpack.i.h.bf16 %v7905_v5  ;;  %v7906_v38 = vunpack.i.l.bf16 %v7905_v5 }
 0xb07   :  { %v7458_v9 = vpack.c.bf16 %v7907_v51, %v7906_v38  ;;  %v8188_v43 = vpop.eup %8187 }
 0xb08   :  { %v3492_v36 = vpop.xlane.xlu1 %3491  ;;  %v7915_v47 = vpop.permute.xlu0 %7914  ;;  %v3507_v58 = vmul.f32 %v8188_v43, %v9701_v30 }
 0xb09   :  { %v7917_v53 = vunpack.i.h.bf16 %v7915_v47  ;;  %v7916_v62 = vunpack.i.l.bf16 %v7915_v47  ;;  %7459 = vmatprep.subr.bf16.mxu1 %v7458_v9  ;;  %8193 = vrcp.f32 %v3492_v36 }
 0xb0a   :  { %7461 = vmatpush3.bf16.msra.mxu1 %v7458_v9  ;;  %8195 = vrcp.f32 %v3495_v24 }
 0xb0b   :  { %v7506_v12 = vpack.c.bf16 %v7917_v53, %v7916_v62  ;;  %v8190_v34 = vpop.eup %8189 }
 0xb0c   :  { %v7910_v48 = vpop.permute.xlu1 %7909  ;;  %v7925_v59 = vpop.permute.xlu0 %7924  ;;  %v3508_v42 = vmul.f32 %v8190_v34, %v9707_v57 }
 0xb0d   :  { %v7912_v56 = vunpack.i.h.bf16 %v7910_v48  ;;  %v7911_v21 = vunpack.i.l.bf16 %v7910_v48  ;;  %7508 = vmatprep.subr.msk.bf16.mxu0 %vm8684_vm2, %v7506_v12  ;;  %v7927_v17 = vunpack.i.h.bf16 %v7925_v59  ;;  %v7926_v29 = vunpack.i.l.bf16 %v7925_v59  ;;  %v8192_v40 = vpop.eup %8191 }
 0xb0e   :  { %7511 = vmatpush3.bf16.xpose.msk.msra.mxu0 %vm8684_vm2, %v7506_v12  ;;  %v3509_v5 = vmul.f32 %v8192_v40, %v9705_v27 }
 0xb0f   :  { %v7462_v60 = vpack.c.bf16 %v7912_v56, %v7911_v21  ;;  %v7518_v26 = vpack.c.bf16 %v7927_v17, %v7926_v29 }
 0xb10   :  { %v7920_v22 = vpop.permute.xlu1 %7919  ;;  %v4350_v11 = vpop.permute.xlu0 %4349 }
 0xb11   :  { %v7922_v50 = vunpack.i.h.bf16 %v7920_v22  ;;  %v7921_v32 = vunpack.i.l.bf16 %v7920_v22  ;;  %7463 = vmatprep.subr.bf16.mxu1 %v7462_v60  ;;  %7092 = vmatprep.mubr.msk.f32.mxu0 %vm554_vm1, %v4350_v11 }
 0xb12   :  { %7465 = vmatpush3.bf16.msra.mxu1 %v7462_v60 }
 0xb13   :  { %v7512_v28 = vpack.c.bf16 %v7922_v50, %v7921_v32  ;;  %6992 = vmatprep.subr.mxu1 %v8358_v37  ;;  %v8194_v31 = vpop.eup %8193 }
 0xb14   :  { %v7930_v18 = vpop.permute.xlu1 %7929  ;;  %v8196_v51 = vpop.eup %8195  ;;  %v3510_v38 = vmul.f32 %v8194_v31, %v9717_v39 }
 0xb15   :  { %6981 = vmatmul.mubr.msk.f32.vlgmr.msra.gmra.mrb[56].mxu1 %vm692_vm3, %v3505_v52  ;;  %7514 = vmatprep.subr.msk.bf16.mxu0 %vm8684_vm2, %v7512_v28  ;;  %v7932_v49 = vunpack.i.h.bf16 %v7930_v18  ;;  %v7931_v24 = vunpack.i.l.bf16 %v7930_v18  ;;  %v3511_v30 = vmul.f32 %v8196_v51, %v9713_v33  ;;  %v4354_v27 = vpop.permute.xlu0 %4353 }
 0xb16   :  { %6983 = vmatprep.mubr.msk.f32.mxu1 %vm692_vm3, %v3506_v4  ;;  %7517 = vmatpush3.bf16.xpose.msk.msra.mxu0 %vm8684_vm2, %v7512_v28 }
 0xb17   :  { %7520 = vmatprep.subr.msk.bf16.mxu0 %vm8684_vm2, %v7518_v26  ;;  %6993 = vmatpush3.msra.mxu1 %v8358_v37  ;;  %v7524_v9 = vpack.c.bf16 %v7932_v49, %v7931_v24 }
 0xb18   :  { %v4352_v57 = vpop.permute.xlu1 %4351 }
 0xb19   :  { %6984 = vmatmul.mubr.msk.f32.gmra.mrb[58].mxu1 %vm692_vm3, %v3507_v58  ;;  %v4358_v36 = vpop.permute.xlu0 %4357 }
 0xb1a   :  { %6986 = vmatprep.mubr.msk.f32.mxu1 %vm692_vm3, %v3508_v42 }
 0xb1c   :  { %v4356_v39 = vpop.permute.xlu1 %4355 }
 0xb1d   :  { %6987 = vmatmul.mubr.msk.f32.gmra.mrb[60].mxu1 %vm692_vm3, %v3509_v5  ;;  %v4362_v53 = vpop.permute.xlu0 %4361 }
 0xb1e   :  { %6989 = vmatprep.mubr.msk.f32.mxu1 %vm692_vm3, %v3510_v38  ;;  %7523 = vmatpush3.bf16.xpose.msk.msra.mxu0 %vm8684_vm2, %v7518_v26 }
 0xb1f   :  { %7526 = vmatprep.subr.msk.bf16.mxu0 %vm8684_vm2, %v7524_v9 }
 0xb20   :  { %v4360_v47 = vpop.permute.xlu1 %4359 }
 0xb21   :  { %6990 = vmatmul.mubr.msk.f32.gmra.mrb[62].mxu1 %vm692_vm3, %v3511_v30 }
 0xb24   :  { %v4364_v33 = vpop.permute.xlu1 %4363 }
 0xb26   :  { %7529 = vmatpush3.bf16.xpose.msk.msra.mxu0 %vm8684_vm2, %v7524_v9 }
 0xb2d   :  { %7093 = vmatmul.mubr.msk.f32.vlgmr.msra.gmra.mrb[72].mxu0 %vm554_vm1, %v4352_v57 }
 0xb2e   :  { %7095 = vmatprep.mubr.msk.f32.mxu0 %vm554_vm1, %v4354_v27 }
 0xb31   :  { %7096 = vmatmul.mubr.msk.f32.gmra.mrb[74].mxu0 %vm554_vm1, %v4356_v39 }
 0xb32   :  { %7098 = vmatprep.mubr.msk.f32.mxu0 %vm554_vm1, %v4358_v36 }
 0xb35   :  { %7099 = vmatmul.mubr.msk.f32.gmra.mrb[76].mxu0 %vm554_vm1, %v4360_v47 }
 0xb36   :  { %7101 = vmatprep.mubr.msk.f32.mxu0 %vm554_vm1, %v4362_v53 }
 0xb39   :  { %7102 = vmatmul.mubr.msk.f32.gmra.mrb[78].mxu0 %vm554_vm1, %v4364_v33 }
 0xb51   :  { %v3973_v2 = vpop.xlane.xlu0 %3972 }
 0xb52   :  { %v3995_v62 = vsub.f32 %v9775_v1, %v3973_v2 }
 0xb54   :  { %v4003_v12 = vmul.f32 1.442695, %v3995_v62 }
 0xb55   :  { %v3976_v48 = vpop.xlane.xlu1 %3975  ;;  %v3979_v59 = vpop.xlane.xlu0 %3978 }
 0xb56   :  { %8197 = vpow2.f32 %v4003_v12  ;;  %v3996_v56 = vsub.f32 %v9773_v35, %v3976_v48  ;;  %v3997_v21 = vsub.f32 %v9781_v54, %v3979_v59 }
 0xb58   :  { %v4005_v60 = vmul.f32 1.442695, %v3996_v56  ;;  %v4007_v63 = vmul.f32 1.442695, %v3997_v21 }
 0xb59   :  { %v3988_v22 = vpop.xlane.xlu1 %3987  ;;  %v3982_v11 = vpop.xlane.xlu0 %3981 }
 0xb5a   :  { %8199 = vpow2.f32 %v4005_v60  ;;  %v4000_v23 = vsub.f32 %v9787_v14, %v3988_v22  ;;  %v3998_v17 = vsub.f32 %v9779_v46, %v3982_v11 }
 0xb5b   :  { %8201 = vpow2.f32 %v4007_v63 }
 0xb5c   :  { %v4009_v29 = vmul.f32 1.442695, %v3998_v17  ;;  %v4013_v1 = vmul.f32 1.442695, %v4000_v23 }
 0xb5d   :  { %v3994_v50 = vpop.xlane.xlu1 %3993  ;;  %v3985_v32 = vpop.xlane.xlu0 %3984 }
 0xb5e   :  { %v4002_v52 = vsub.f32 %v9795_v25, %v3994_v50  ;;  %v3999_v35 = vsub.f32 %v9789_v45, %v3985_v32  ;;  %8203 = vpow2.f32 %v4009_v29 }
 0xb5f   :  { %8205 = vpow2.f32 %v4013_v1 }
 0xb60   :  { %v9859_v54 = vpop.eup %8197  ;;  %v4011_v28 = vmul.f32 1.442695, %v3999_v35  ;;  %v4017_v37 = vmul.f32 1.442695, %v4002_v52 }
 0xb61   :  { %v3991_v43 = vpop.xlane.xlu0 %3990  ;;  %v4019_v14 = vsel %vm692_vm3, %v9859_v54, 0.0  ;;  %v7940_v27 = vpop.permute.xlu1 %7939 }
 0xb62   :  { %v4001_v46 = vsub.f32 %v9797_v41, %v3991_v43  ;;  %4020 = vadd.xlane.f32.xlu0 %v4019_v14  ;;  %8207 = vpow2.f32 %v4011_v28  ;;  %v7942_v39 = vunpack.i.h.bf16 %v7940_v27  ;;  %v7941_v36 = vunpack.i.l.bf16 %v7940_v27 }
 0xb63   :  { %8209 = vpow2.f32 %v4017_v37 }
 0xb64   :  { %v9864_v4 = vpop.eup %8199  ;;  %v4015_v45 = vmul.f32 1.442695, %v4001_v46  ;;  %v7494_v33 = vpack.c.bf16 %v7942_v39, %v7941_v36 }
 0xb65   :  { %v9866_v34 = vpop.eup %8201  ;;  %v7935_v25 = vpop.permute.xlu0 %7934  ;;  %v4022_v26 = vsel %vm692_vm3, %v9864_v4, 0.0 }
 0xb66   :  { %v7937_v18 = vunpack.i.h.bf16 %v7935_v25  ;;  %v7936_v58 = vunpack.i.l.bf16 %v7935_v25  ;;  %4023 = vadd.xlane.f32.xlu1 %v4022_v26  ;;  %v4025_v40 = vsel %vm692_vm3, %v9866_v34, 0.0  ;;  %8211 = vpow2.f32 %v4015_v45 }
 0xb67   :  { %4026 = vadd.xlane.f32.xlu0 %v4025_v40 }
 0xb68   :  { %v7490_v41 = vpack.c.bf16 %v7937_v18, %v7936_v58  ;;  %v9872_v42 = vpop.eup %8203 }
 0xb69   :  { %v4028_v31 = vsel %vm692_vm3, %v9872_v42, 0.0  ;;  %v9876_v49 = vpop.eup %8205 }
 0xb6a   :  { %7491 = vmatprep.subr.bf16.mxu1 %v7490_v41  ;;  %4029 = vadd.xlane.f32.xlu1 %v4028_v31  ;;  %v4034_v5 = vsel %vm692_vm3, %v9876_v49, 0.0 }
 0xb6c   :  { %v9878_v24 = vpop.eup %8207 }
 0xb6d   :  { %v4031_v51 = vsel %vm692_vm3, %v9878_v24, 0.0  ;;  %v9884_v38 = vpop.eup %8209 }
 0xb6e   :  { %4035 = vadd.xlane.f32.xlu1 %v4034_v5  ;;  %4032 = vadd.xlane.f32.xlu0 %v4031_v51  ;;  %v4040_v9 = vsel %vm692_vm3, %v9884_v38, 0.0 }
 0xb70   :  { %v9888_v30 = vpop.eup %8211 }
 0xb71   :  { %v4037_v57 = vsel %vm692_vm3, %v9888_v30, 0.0 }
 0xb72   :  { %4041 = vadd.xlane.f32.xlu1 %v4040_v9 }
 0xb76   :  { %4038 = vadd.xlane.f32.xlu1 %v4037_v57 }
 0xb84   :  { %7944 = vrot.lane.b32.xlu0 %v9266_v61, %s8389_s9 }
 0xb87   :  { %7949 = vrot.lane.b32.xlu1 %v9274_v20, %s8389_s9 }
 0xbe8   :  { %v6982_v47 = vpop.f32.mrb[56].mxu1 }
 0xbe9   :  { %v3626_v53 = vpop.f32.mrb[57].mxu1 }
 0xbea   :  { %6994 = vmatprep.mubr.msk.f32.mxu1 %vm554_vm1, %v3626_v53 }
 0xbeb   :  { %6995 = vmatmul.mubr.msk.f32.vlgmr.msra.gmra.mrb[48].mxu1 %vm554_vm1, %v6982_v47 }
 0xbec   :  { %7493 = vmatpush3.bf16.msra.mxu1 %v7490_v41  ;;  %v6985_v2 = vpop.f32.mrb[58].mxu1 }
 0xbed   :  { %7495 = vmatprep.subr.bf16.mxu1 %v7494_v33  ;;  %v3636_v62 = vpop.f32.mrb[59].mxu1 }
 0xbee   :  { %6997 = vmatprep.mubr.msk.f32.mxu1 %vm554_vm1, %v3636_v62 }
 0xbef   :  { %v4021_v12 = vpop.xlane.xlu0 %4020  ;;  %6998 = vmatmul.mubr.msk.f32.gmra.mrb[50].mxu1 %vm554_vm1, %v6985_v2 }
 0xbf0   :  { %8213 = vrcp.f32 %v4021_v12  ;;  %7497 = vmatpush3.bf16.msra.mxu1 %v7494_v33  ;;  %v6988_v48 = vpop.f32.mrb[60].mxu1  ;;  %v8359_v33 = vld [vmem:[%s10660_s3 + $0x10] sm:$0xff] }
 0xbf1   :  { %v3646_v59 = vpop.f32.mrb[61].mxu1 }
 0xbf2   :  { %7000 = vmatprep.mubr.msk.f32.mxu1 %vm554_vm1, %v3646_v59 }
 0xbf3   :  { %v4024_v56 = vpop.xlane.xlu1 %4023  ;;  %7001 = vmatmul.mubr.msk.f32.gmra.mrb[52].mxu1 %vm554_vm1, %v6988_v48 }
 0xbf4   :  { %v6991_v21 = vpop.f32.mrb[62].mxu1  ;;  %v4027_v63 = vpop.xlane.xlu0 %4026  ;;  %8215 = vrcp.f32 %v4024_v56 }
 0xbf5   :  { %v3656_v60 = vpop.f32.mrb[63].mxu1  ;;  %8217 = vrcp.f32 %v4027_v63 }
 0xbf6   :  { %7003 = vmatprep.mubr.msk.f32.mxu1 %vm554_vm1, %v3656_v60 }
 0xbf7   :  { %7004 = vmatmul.mubr.msk.f32.gmra.mrb[54].mxu1 %vm554_vm1, %v6991_v21  ;;  %v4030_v22 = vpop.xlane.xlu1 %4029 }
 0xbf8   :  { %8219 = vrcp.f32 %v4030_v22 }
 0xbfa   :  { %v8214_v11 = vpop.eup %8213 }
 0xbfb   :  { %v4051_v23 = vmul.f32 %v8214_v11, %v9859_v54  ;;  %v4036_v17 = vpop.xlane.xlu1 %4035  ;;  %v4033_v29 = vpop.xlane.xlu0 %4032 }
 0xbfc   :  { %8221 = vrcp.f32 %v4033_v29 }
 0xbfd   :  { %7050 = vmatprep.mubr.msk.f32.mxu1 %vm692_vm3, %v4051_v23  ;;  %8223 = vrcp.f32 %v4036_v17 }
 0xbfe   :  { %v8216_v9 = vpop.eup %8215 }
 0xbff   :  { %v4042_v1 = vpop.xlane.xlu1 %4041  ;;  %v7945_v50 = vpop.permute.xlu0 %7944  ;;  %v4052_v47 = vmul.f32 %v8216_v9, %v9864_v4 }
 0xc00   :  { %v7947_v32 = vunpack.i.h.bf16 %v7945_v50  ;;  %v7946_v52 = vunpack.i.l.bf16 %v7945_v50  ;;  %v9906_v35 = vpop.f32.mrb[72].mxu0  ;;  %v8218_v27 = vpop.eup %8217 }
 0xc01   :  { %v9908_v28 = vpop.f32.mrb[73].mxu0  ;;  %v4521_v37 = vsel %vm692_vm3, %v9906_v35, -inf  ;;  %v4053_v62 = vmul.f32 %v8218_v27, %v9866_v34 }
 0xc02   :  { %v7498_v43 = vpack.c.bf16 %v7947_v32, %v7946_v52  ;;  %4522 = vmax.xlane.f32.xlu1 %v4521_v37  ;;  %v4518_v54 = vsel %vm692_vm3, %v9908_v28, -inf  ;;  %v8220_v2 = vpop.eup %8219 }
 0xc03   :  { %v4039_v14 = vpop.xlane.xlu1 %4038  ;;  %4519 = vmax.xlane.f32.xlu0 %v4518_v54  ;;  %v4054_v48 = vmul.f32 %v8220_v2, %v9872_v42 }
 0xc04   :  { %v9914_v46 = vpop.f32.mrb[74].mxu0  ;;  %7499 = vmatprep.subr.bf16.mxu1 %v7498_v43  ;;  %8225 = vrcp.f32 %v4039_v14 }
 0xc05   :  { %v9916_v45 = vpop.f32.mrb[75].mxu0  ;;  %7501 = vmatpush3.bf16.msra.mxu1 %v7498_v43  ;;  %v4527_v51 = vsel %vm692_vm3, %v9914_v46, -inf  ;;  %8227 = vrcp.f32 %v4042_v1 }
 0xc06   :  { %v4524_v25 = vsel %vm692_vm3, %v9916_v45, -inf  ;;  %v8222_v12 = vpop.eup %8221 }
 0xc07   :  { %v7950_v26 = vpop.permute.xlu1 %7949  ;;  %4525 = vmax.xlane.f32.xlu0 %v4524_v25  ;;  %v8224_v59 = vpop.eup %8223  ;;  %v4055_v56 = vmul.f32 %v8222_v12, %v9878_v24 }
 0xc08   :  { %v9920_v18 = vpop.f32.mrb[76].mxu0  ;;  %v7952_v58 = vunpack.i.h.bf16 %v7950_v26  ;;  %v7951_v40 = vunpack.i.l.bf16 %v7950_v26  ;;  %v4056_v34 = vmul.f32 %v8224_v59, %v9876_v49  ;;  %v10003_v59 = vld [vmem:[%s10658_s1] sm:$0x3f] }
 0xc09   :  { %v9922_v41 = vpop.f32.mrb[77].mxu0  ;;  %v4533_v31 = vsel %vm692_vm3, %v9920_v18, -inf }
 0xc0a   :  { %4534 = vmax.xlane.f32.xlu1 %v4533_v31  ;;  %v7502_v5 = vpack.c.bf16 %v7952_v58, %v7951_v40  ;;  %v4530_v53 = vsel %vm692_vm3, %v9922_v41, -inf }
 0xc0b   :  { %4528 = vmax.xlane.f32.xlu0 %v4527_v51 }
 0xc0c   :  { %v7103_v57 = vpop.f32.mrb[78].mxu0  ;;  %7503 = vmatprep.subr.bf16.mxu1 %v7502_v5 }
 0xc0d   :  { %v9928_v39 = vpop.f32.mrb[79].mxu0  ;;  %v4539_v36 = vsel %vm692_vm3, %v7103_v57, -inf  ;;  %7505 = vmatpush3.bf16.msra.mxu1 %v7502_v5 }
 0xc0e   :  { %4540 = vmax.xlane.f32.xlu1 %v4539_v36  ;;  %7062 = vmatprep.subr.mxu1 %v8359_v33  ;;  %v4536_v4 = vsel %vm692_vm3, %v9928_v39, -inf  ;;  %v8226_v21 = vpop.eup %8225 }
 0xc0f   :  { %4531 = vmax.xlane.f32.xlu0 %v4530_v53  ;;  %v8228_v60 = vpop.eup %8227  ;;  %v4057_v63 = vmul.f32 %v8226_v21, %v9888_v30 }
 0xc10   :  { %7051 = vmatmul.mubr.msk.f32.vlgmr.msra.gmra.mrb[64].mxu1 %vm692_vm3, %v4052_v47  ;;  %v4058_v42 = vmul.f32 %v8228_v60, %v9884_v38  ;;  %v8362_v60 = vld [vmem:[%s10656_s0] sm:$0xff] }
 0xc11   :  { %7053 = vmatprep.mubr.msk.f32.mxu1 %vm692_vm3, %v4053_v62  ;;  %7063 = vmatpush3.msra.mxu1 %v8359_v33 }
 0xc13   :  { %4537 = vmax.xlane.f32.xlu0 %v4536_v4 }
 0xc14   :  { %7054 = vmatmul.mubr.msk.f32.gmra.mrb[66].mxu1 %vm692_vm3, %v4054_v48  ;;  %v528_v48 = vsub.s32 4, %v8525_v55 }
 0xc15   :  { %7056 = vmatprep.mubr.msk.f32.mxu1 %vm692_vm3, %v4055_v56 }
 0xc16   :  { %v10006_v56 = vrot.slane %v10003_v59, %v528_v48 }
 0xc18   :  { %7057 = vmatmul.mubr.msk.f32.gmra.mrb[68].mxu1 %vm692_vm3, %v4056_v34  ;;  %v7578_v21 = vadd.f32 %v9721_v15, %v10006_v56  ;;  %v7579_v34 = vadd.f32 %v9723_v3, %v10006_v56 }
 0xc19   :  { %7059 = vmatprep.mubr.msk.f32.mxu1 %vm692_vm3, %v4057_v63 }
 0xc1a   :  { %v10020_v63 = vadd.f32 %v8362_v60, %v7579_v34 }
 0xc1c   :  { %7060 = vmatmul.mubr.msk.f32.gmra.mrb[70].mxu1 %vm692_vm3, %v4058_v42 }
 0xc1f   :  { %7959 = vrot.lane.b32.xlu1 %v9262_v10, %s8390_s28 }
 0xc29   :  { %7954 = vrot.lane.b32.xlu0 %v9246_v13, %s8390_s28 }
 0xc8f   :  { %v4523_v24 = vpop.xlane.xlu1 %4522 }
 0xc90   :  { %v4543_v49 = vsub.f32 %v9906_v35, %v4523_v24  ;;  %v4520_v22 = vpop.xlane.xlu0 %4519  ;;  %v4912_v24 = vsel %vm44_vm0, %v10020_v63, 0.0 }
 0xc91   :  { %v4542_v30 = vsub.f32 %v9908_v28, %v4520_v22 }
 0xc92   :  { %v4552_v11 = vmul.f32 1.442695, %v4543_v49 }
 0xc93   :  { %v4550_v23 = vmul.f32 1.442695, %v4542_v30  ;;  %v7580_v30 = vadd.f32 %v9725_v19, %v10006_v56  ;;  %v8363_v19 = vld [vmem:[%s10656_s0 + $0x18] sm:$0xff] }
 0xc94   :  { %8229 = vpow2.f32 %v4552_v11  ;;  %v4526_v17 = vpop.xlane.xlu0 %4525 }
 0xc95   :  { %8231 = vpow2.f32 %v4550_v23  ;;  %v4544_v38 = vsub.f32 %v9916_v45, %v4526_v17  ;;  %v7581_v23 = vadd.f32 %v9729_v16, %v10006_v56 }
 0xc97   :  { %v4535_v29 = vpop.xlane.xlu1 %4534  ;;  %v4554_v1 = vmul.f32 1.442695, %v4544_v38  ;;  %v4960_v38 = vmul.f32 %v10020_v63, %v10020_v63 }
 0xc98   :  { %v4547_v10 = vsub.f32 %v9920_v18, %v4535_v29  ;;  %v4529_v50 = vpop.xlane.xlu0 %4528 }
 0xc99   :  { %8233 = vpow2.f32 %v4554_v1  ;;  %v4545_v13 = vsub.f32 %v9914_v46, %v4529_v50  ;;  %v8364_v50 = vld [vmem:[%s10656_s0 + $0x10] sm:$0xff] }
 0xc9a   :  { %v4560_v52 = vmul.f32 1.442695, %v4547_v10  ;;  %v10038_v10 = vadd.f32 %v8363_v19, %v7580_v30 }
 0xc9b   :  { %v4541_v32 = vpop.xlane.xlu1 %4540  ;;  %v4556_v35 = vmul.f32 1.442695, %v4545_v13  ;;  %v10043_v13 = vadd.f32 %v8364_v50, %v7581_v23  ;;  %v5195_v23 = vld [vmem:[%s10661_s4 + $0x18] sm:$0xff] }
 0xc9c   :  { %v4549_v37 = vsub.f32 %v7103_v57, %v4541_v32  ;;  %v4532_v28 = vpop.xlane.xlu0 %4531 }
 0xc9d   :  { %8235 = vpow2.f32 %v4556_v35  ;;  %v4546_v43 = vsub.f32 %v9922_v41, %v4532_v28 }
 0xc9e   :  { %v9962_v54 = vpop.eup %8229  ;;  %8237 = vpow2.f32 %v4560_v52  ;;  %v4564_v45 = vmul.f32 1.442695, %v4549_v37  ;;  %v4976_v52 = vsel %vm44_vm0, %v4960_v38, 0.0  ;;  %v7582_v37 = vadd.f32 %v9733_v0, %v10006_v56 }
 0xc9f   :  { %v9964_v14 = vpop.eup %8231  ;;  %v4558_v25 = vmul.f32 1.442695, %v4546_v43  ;;  %v4569_v26 = vsel %vm692_vm3, %v9962_v54, 0.0  ;;  %v7960_v42 = vpop.permute.xlu1 %7959  ;;  %v4921_v43 = vsel %vm44_vm0, %v10038_v10, 0.0 }
 0xca0   :  { %v4538_v18 = vpop.xlane.xlu0 %4537  ;;  %v4566_v46 = vsel %vm692_vm3, %v9964_v14, 0.0  ;;  %4570 = vadd.xlane.f32.xlu1 %v4569_v26  ;;  %v7962_v3 = vunpack.i.h.bf16 %v7960_v42  ;;  %v7961_v49 = vunpack.i.l.bf16 %v7960_v42  ;;  %v4963_v26 = vmul.f32 %v10038_v10, %v10038_v10 }
 0xca1   :  { %8239 = vpow2.f32 %v4558_v25  ;;  %v4548_v58 = vsub.f32 %v9928_v39, %v4538_v18  ;;  %4567 = vadd.xlane.f32.xlu0 %v4566_v46  ;;  %v4918_v25 = vsel %vm44_vm0, %v10043_v13, 0.0  ;;  %v4962_v18 = vmul.f32 %v10043_v13, %v10043_v13 }
 0xca2   :  { %8241 = vpow2.f32 %v4564_v45  ;;  %v7534_v29 = vpack.c.bf16 %v7962_v3, %v7961_v49  ;;  %v7583_v45 = vadd.f32 %v9737_v7, %v10006_v56  ;;  %v8365_v7 = vld [vmem:[%s10656_s0 + $0x28] sm:$0xff]  ;;  %v5192_v49 = vld [vmem:[%s10661_s4] sm:$0xff] }
 0xca3   :  { %v9971_v40 = vpop.eup %8233  ;;  %v4562_v41 = vmul.f32 1.442695, %v4548_v58  ;;  %v10067_v46 = vadd.f32 %v8365_v7, %v7582_v37 }
 0xca4   :  { %v7955_v31 = vpop.permute.xlu0 %7954  ;;  %v4572_v5 = vsel %vm692_vm3, %v9971_v40, 0.0 }
 0xca5   :  { %v7957_v51 = vunpack.i.h.bf16 %v7955_v31  ;;  %v7956_v9 = vunpack.i.l.bf16 %v7955_v31  ;;  %4573 = vadd.xlane.f32.xlu0 %v4572_v5  ;;  %8243 = vpow2.f32 %v4562_v41  ;;  %v8366_v41 = vld [vmem:[%s10656_s0 + $0x20] sm:$0xff]  ;;  %v4985_v5 = vsel %vm44_vm0, %v4963_v26, 0.0 }
 0xca6   :  { %v10072_v31 = vadd.f32 %v8366_v41, %v7583_v45 }
 0xca7   :  { %v9975_v57 = vpop.eup %8235  ;;  %v7530_v27 = vpack.c.bf16 %v7957_v51, %v7956_v9  ;;  %v4982_v51 = vsel %vm44_vm0, %v4962_v18, 0.0  ;;  %v7584_v9 = vadd.f32 %v9741_v8, %v10006_v56  ;;  %v8367_v8 = vld [vmem:[%s10656_s0 + $0x38] sm:$0xff] }
 0xca8   :  { %v4575_v36 = vsel %vm692_vm3, %v9975_v57, 0.0  ;;  %v9979_v39 = vpop.eup %8237 }
 0xca9   :  { %4576 = vadd.xlane.f32.xlu1 %v4575_v36  ;;  %7531 = vmatprep.subr.bf16.mxu1 %v7530_v27  ;;  %v4581_v53 = vsel %vm692_vm3, %v9979_v39, 0.0  ;;  %v7585_v36 = vadd.f32 %v9745_v44, %v10006_v56  ;;  %v8368_v44 = vld [vmem:[%s10656_s0 + $0x30] sm:$0xff] }
 0xcab   :  { %v9981_v47 = vpop.eup %8239  ;;  %v10098_v48 = vadd.f32 %v8368_v44, %v7585_v36 }
 0xcac   :  { %v4578_v33 = vsel %vm692_vm3, %v9981_v47, 0.0  ;;  %v9987_v2 = vpop.eup %8241 }
 0xcad   :  { %4582 = vadd.xlane.f32.xlu1 %v4581_v53  ;;  %4579 = vadd.xlane.f32.xlu0 %v4578_v33  ;;  %v4587_v62 = vsel %vm692_vm3, %v9987_v2, 0.0  ;;  %v4924_v53 = vsel %vm44_vm0, %v10072_v31, 0.0  ;;  %v4965_v33 = vmul.f32 %v10067_v46, %v10067_v46  ;;  %v4930_v60 = vsel %vm44_vm0, %v10098_v48, 0.0 }
 0xcaf   :  { %v9991_v12 = vpop.eup %8243 }
 0xcb0   :  { %v4584_v4 = vsel %vm692_vm3, %v9991_v12, 0.0 }
 0xcb1   :  { %4588 = vadd.xlane.f32.xlu1 %v4587_v62  ;;  %v4964_v62 = vmul.f32 %v10072_v31, %v10072_v31 }
 0xcb3   :  { %v4988_v34 = vsel %vm44_vm0, %v4964_v62, 0.0 }
 0xcb5   :  { %4585 = vadd.xlane.f32.xlu1 %v4584_v4  ;;  %v10093_v4 = vadd.f32 %v8367_v8, %v7584_v9 }
 0xcb7   :  { %v4967_v42 = vmul.f32 %v10093_v4, %v10093_v4 }
 0xcc3   :  { %7964 = vrot.lane.b32.xlu0 %v9266_v61, %s8390_s28  ;;  %v8361_v61 = vld [vmem:[%s10656_s0 + $0x8] sm:$0xff] }
 0xcc6   :  { %7969 = vrot.lane.b32.xlu1 %v9274_v20, %s8390_s28  ;;  %v10015_v20 = vadd.f32 %v8361_v61, %v7578_v21  ;;  %v4991_v21 = vsel %vm44_vm0, %v4965_v33, 0.0  ;;  %v4933_v61 = vsel %vm44_vm0, %v10093_v4, 0.0 }
 0xcc8   :  { %v4961_v15 = vmul.f32 %v10015_v20, %v10015_v20  ;;  %v4915_v32 = vsel %vm44_vm0, %v10015_v20, 0.0 }
 0xcca   :  { %v4979_v17 = vsel %vm44_vm0, %v4961_v15, 0.0  ;;  %v4997_v15 = vsel %vm44_vm0, %v4967_v42, 0.0 }
 0xce2   :  { %4913 = vadd.xlane.f32.xlu0 %v4912_v24  ;;  %v4966_v24 = vmul.f32 %v10098_v48, %v10098_v48 }
 0xce3   :  { %v7052_v22 = vpop.f32.mrb[64].mxu1 }
 0xce4   :  { %v4173_v11 = vpop.f32.mrb[65].mxu1  ;;  %v4994_v3 = vsel %vm44_vm0, %v4966_v24, 0.0 }
 0xce5   :  { %7064 = vmatprep.mubr.msk.f32.mxu1 %vm554_vm1, %v4173_v11  ;;  %v5194_v11 = vld [vmem:[%s10661_s4 + $0x10] sm:$0xff] }
 0xce6   :  { %4980 = vadd.xlane.f32.xlu0 %v4979_v17  ;;  %7065 = vmatmul.mubr.msk.f32.vlgmr.msra.gmra.mrb[48].mxu1 %vm554_vm1, %v7052_v22  ;;  %v5193_v22 = vld [vmem:[%s10661_s4 + $0x8] sm:$0xff]  ;;  %v7550_v17 = vpack.c.bf16 %v5195_v23, %v5194_v11 }
 0xce7   :  { %7533 = vmatpush3.bf16.msra.mxu1 %v7530_v27  ;;  %v7055_v1 = vpop.f32.mrb[66].mxu1  ;;  %v4927_v27 = vsel %vm44_vm0, %v10067_v46, 0.0  ;;  %v7546_v30 = vpack.c.bf16 %v5193_v22, %v5192_v49 }
 0xce8   :  { %7535 = vmatprep.subr.bf16.mxu1 %v7534_v29  ;;  %v4183_v16 = vpop.f32.mrb[67].mxu1 }
 0xce9   :  { %7067 = vmatprep.mubr.msk.f32.mxu1 %vm554_vm1, %v4183_v16  ;;  %7547 = vmatprep.subr.bf16.mxu0 %v7546_v30 }
 0xcea   :  { %4916 = vadd.xlane.f32.xlu1 %v4915_v32  ;;  %4977 = vadd.xlane.f32.xlu0 %v4976_v52 }
 0xceb   :  { %7068 = vmatmul.mubr.msk.f32.gmra.mrb[50].mxu1 %vm554_vm1, %v7055_v1  ;;  %v7058_v35 = vpop.f32.mrb[68].mxu1  ;;  %7549 = vmatpush3.bf16.msra.mxu0 %v7546_v30 }
 0xcec   :  { %7537 = vmatpush3.bf16.msra.mxu1 %v7534_v29  ;;  %v4193_v28 = vpop.f32.mrb[69].mxu1  ;;  %7551 = vmatprep.subr.bf16.mxu0 %v7550_v17 }
 0xced   :  { %7070 = vmatprep.mubr.msk.f32.mxu1 %vm554_vm1, %v4193_v28 }
 0xcee   :  { %4922 = vadd.xlane.f32.xlu1 %v4921_v43  ;;  %4919 = vadd.xlane.f32.xlu0 %v4918_v25 }
 0xcef   :  { %7071 = vmatmul.mubr.msk.f32.gmra.mrb[52].mxu1 %vm554_vm1, %v7058_v35  ;;  %v7061_v0 = vpop.f32.mrb[70].mxu1  ;;  %7553 = vmatpush3.bf16.msra.mxu0 %v7550_v17 }
 0xcf0   :  { %v4203_v58 = vpop.f32.mrb[71].mxu1 }
 0xcf1   :  { %7073 = vmatprep.mubr.msk.f32.mxu1 %vm554_vm1, %v4203_v58 }
 0xcf2   :  { %4986 = vadd.xlane.f32.xlu1 %v4985_v5  ;;  %4983 = vadd.xlane.f32.xlu0 %v4982_v51  ;;  %v8369_v5 = vld [vmem:[%s10660_s3 + $0x18] sm:$0xff] }
 0xcf3   :  { %7074 = vmatmul.mubr.msk.f32.gmra.mrb[54].mxu1 %vm554_vm1, %v7061_v0 }
 0xcf6   :  { %4928 = vadd.xlane.f32.xlu1 %v4927_v27  ;;  %4925 = vadd.xlane.f32.xlu0 %v4924_v53 }
 0xcfa   :  { %4992 = vadd.xlane.f32.xlu1 %v4991_v21  ;;  %4989 = vadd.xlane.f32.xlu0 %v4988_v34 }
 0xcfe   :  { %4934 = vadd.xlane.f32.xlu1 %v4933_v61  ;;  %4931 = vadd.xlane.f32.xlu0 %v4930_v60 }
 0xd02   :  { %4998 = vadd.xlane.f32.xlu1 %v4997_v15  ;;  %4995 = vadd.xlane.f32.xlu0 %v4994_v3 }
 0xd2d   :  { %v4571_v29 = vpop.xlane.xlu1 %4570 }
 0xd2e   :  { %v4568_v38 = vpop.xlane.xlu0 %4567 }
 0xd2f   :  { %8245 = vrcp.f32 %v4568_v38 }
 0xd30   :  { %8247 = vrcp.f32 %v4571_v29 }
 0xd32   :  { %v4574_v1 = vpop.xlane.xlu0 %4573 }
 0xd33   :  { %8249 = vrcp.f32 %v4574_v1 }
 0xd36   :  { %v4577_v19 = vpop.xlane.xlu1 %4576 }
 0xd37   :  { %8251 = vrcp.f32 %v4577_v19 }
 0xd39   :  { %v8246_v16 = vpop.eup %8245 }
 0xd3a   :  { %v4583_v50 = vpop.xlane.xlu1 %4582  ;;  %v4580_v32 = vpop.xlane.xlu0 %4579  ;;  %v4598_v52 = vmul.f32 %v8246_v16, %v9964_v14 }
 0xd3b   :  { %8253 = vrcp.f32 %v4580_v32  ;;  %v8248_v7 = vpop.eup %8247 }
 0xd3c   :  { %7120 = vmatprep.mubr.msk.f32.mxu1 %vm692_vm3, %v4598_v52  ;;  %8255 = vrcp.f32 %v4583_v50  ;;  %v4599_v41 = vmul.f32 %v8248_v7, %v9962_v54  ;;  %v5154_v52 = vsub.s32 2, %v8525_v55 }
 0xd3d   :  { %v8250_v58 = vpop.eup %8249 }
 0xd3e   :  { %v4589_v35 = vpop.xlane.xlu1 %4588  ;;  %v7965_v37 = vpop.permute.xlu0 %7964  ;;  %v4600_v9 = vmul.f32 %v8250_v58, %v9971_v40 }
 0xd3f   :  { %v7967_v28 = vunpack.i.h.bf16 %v7965_v37  ;;  %v7966_v43 = vunpack.i.l.bf16 %v7965_v37 }
 0xd41   :  { %v7538_v45 = vpack.c.bf16 %v7967_v28, %v7966_v43  ;;  %v8252_v51 = vpop.eup %8251 }
 0xd42   :  { %v4586_v25 = vpop.xlane.xlu1 %4585  ;;  %v4601_v36 = vmul.f32 %v8252_v51, %v9975_v57 }
 0xd43   :  { %7539 = vmatprep.subr.bf16.mxu1 %v7538_v45  ;;  %8257 = vrcp.f32 %v4586_v25 }
 0xd44   :  { %7541 = vmatpush3.bf16.msra.mxu1 %v7538_v45  ;;  %8259 = vrcp.f32 %v4589_v35 }
 0xd45   :  { %v8254_v27 = vpop.eup %8253 }
 0xd46   :  { %v7970_v26 = vpop.permute.xlu1 %7969  ;;  %v8256_v53 = vpop.eup %8255  ;;  %v4602_v33 = vmul.f32 %v8254_v27, %v9981_v47 }
 0xd47   :  { %v7972_v18 = vunpack.i.h.bf16 %v7970_v26  ;;  %v7971_v0 = vunpack.i.l.bf16 %v7970_v26  ;;  %v4603_v62 = vmul.f32 %v8256_v53, %v9979_v39  ;;  %v5174_v26 = vsub.s32 3, %v8525_v55 }
 0xd49   :  { %v7542_v14 = vpack.c.bf16 %v7972_v18, %v7971_v0  ;;  %v10159_v0 = vrot.slane %v10003_v59, %v5154_v52  ;;  %v10166_v27 = vrot.slane %v10003_v59, %v5174_v26 }
 0xd4b   :  { %7543 = vmatprep.subr.bf16.mxu1 %v7542_v14 }
 0xd4c   :  { %7545 = vmatpush3.bf16.msra.mxu1 %v7542_v14 }
 0xd4d   :  { %7132 = vmatprep.subr.mxu1 %v8369_v5  ;;  %v8258_v54 = vpop.eup %8257 }
 0xd4e   :  { %v8260_v8 = vpop.eup %8259  ;;  %v4604_v40 = vmul.f32 %v8258_v54, %v9991_v12 }
 0xd4f   :  { %7121 = vmatmul.mubr.msk.f32.vlgmr.msra.gmra.mrb[72].mxu1 %vm692_vm3, %v4599_v41  ;;  %v4605_v44 = vmul.f32 %v8260_v8, %v9987_v2 }
 0xd50   :  { %7123 = vmatprep.mubr.msk.f32.mxu1 %vm692_vm3, %v4600_v9  ;;  %7133 = vmatpush3.msra.mxu1 %v8369_v5 }
 0xd53   :  { %7124 = vmatmul.mubr.msk.f32.gmra.mrb[74].mxu1 %vm692_vm3, %v4601_v36 }
 0xd54   :  { %7126 = vmatprep.mubr.msk.f32.mxu1 %vm692_vm3, %v4602_v33 }
 0xd57   :  { %7127 = vmatmul.mubr.msk.f32.gmra.mrb[76].mxu1 %vm692_vm3, %v4603_v62 }
 0xd58   :  { %7129 = vmatprep.mubr.msk.f32.mxu1 %vm692_vm3, %v4604_v40 }
 0xd5b   :  { %7130 = vmatmul.mubr.msk.f32.gmra.mrb[78].mxu1 %vm692_vm3, %v4605_v44 }
 0xd6f   :  { %v4914_v57 = vpop.xlane.xlu0 %4913 }
 0xd70   :  { %v5024_v21 = vmul.f32 0.03125, %v4914_v57 }
 0xd72   :  { %v5056_v60 = vmul.f32 %v5024_v21, %v5024_v21  ;;  %v5088_v18 = vsub.f32 %v10020_v63, %v5024_v21 }
 0xd73   :  { %v4981_v47 = vpop.xlane.xlu0 %4980 }
 0xd74   :  { %v5041_v39 = vmul.f32 0.03125, %v4981_v47 }
 0xd77   :  { %v4917_v34 = vpop.xlane.xlu1 %4916  ;;  %v4978_v61 = vpop.xlane.xlu0 %4977 }
 0xd78   :  { %v5025_v42 = vmul.f32 0.03125, %v4917_v34  ;;  %v5040_v24 = vmul.f32 0.03125, %v4978_v61 }
 0xd7a   :  { %v5057_v15 = vmul.f32 %v5025_v42, %v5025_v42  ;;  %v5072_v3 = vsub.f32 %v5040_v24, %v5056_v60  ;;  %v5089_v36 = vsub.f32 %v10015_v20, %v5025_v42 }
 0xd7b   :  { %v4923_v12 = vpop.xlane.xlu1 %4922  ;;  %v4920_v49 = vpop.xlane.xlu0 %4919 }
 0xd7c   :  { %v5073_v22 = vsub.f32 %v5041_v39, %v5057_v15  ;;  %v5104_v30 = vadd.f32 1e-05, %v5072_v3  ;;  %v10143_v11 = vmul.f32 0.03125, %v4923_v12  ;;  %v10145_v2 = vmul.f32 0.03125, %v4920_v49 }
 0xd7e   :  { %v5105_v23 = vadd.f32 1e-05, %v5073_v22  ;;  %8261 = vrsqrt.f32 %v5104_v30  ;;  %v5059_v17 = vmul.f32 %v10143_v11, %v10143_v11  ;;  %v5058_v1 = vmul.f32 %v10145_v2, %v10145_v2 }
 0xd7f   :  { %v4987_v38 = vpop.xlane.xlu1 %4986  ;;  %v4984_v29 = vpop.xlane.xlu0 %4983  ;;  %v5091_v24 = vsub.f32 %v10038_v10, %v10143_v11  ;;  %v5090_v39 = vsub.f32 %v10043_v13, %v10145_v2 }
 0xd80   :  { %8263 = vrsqrt.f32 %v5105_v23  ;;  %v5043_v19 = vmul.f32 0.03125, %v4987_v38  ;;  %v5042_v16 = vmul.f32 0.03125, %v4984_v29 }
 0xd82   :  { %v5075_v50 = vsub.f32 %v5043_v19, %v5059_v17  ;;  %v5074_v32 = vsub.f32 %v5042_v16, %v5058_v1 }
 0xd83   :  { %v4929_v35 = vpop.xlane.xlu1 %4928  ;;  %v4926_v37 = vpop.xlane.xlu0 %4925 }
 0xd84   :  { %v5107_v28 = vadd.f32 1e-05, %v5075_v50  ;;  %v5106_v43 = vadd.f32 1e-05, %v5074_v32  ;;  %v10152_v45 = vmul.f32 0.03125, %v4929_v35  ;;  %v10154_v25 = vmul.f32 0.03125, %v4926_v37 }
 0xd86   :  { %8265 = vrsqrt.f32 %v5107_v28  ;;  %v5061_v41 = vmul.f32 %v10152_v45, %v10152_v45  ;;  %v5060_v5 = vmul.f32 %v10154_v25, %v10154_v25  ;;  %v5093_v35 = vsub.f32 %v10067_v46, %v10152_v45 }
 0xd87   :  { %8267 = vrsqrt.f32 %v5106_v43  ;;  %v4993_v14 = vpop.xlane.xlu1 %4992  ;;  %v4990_v7 = vpop.xlane.xlu0 %4989  ;;  %v5092_v28 = vsub.f32 %v10072_v31, %v10154_v25 }
 0xd88   :  { %v8262_v58 = vpop.eup %8261  ;;  %v5045_v51 = vmul.f32 0.03125, %v4993_v14  ;;  %v5044_v9 = vmul.f32 0.03125, %v4990_v7 }
 0xd89   :  { %v5136_v53 = vmul.f32 %v8262_v58, %v5088_v18 }
 0xd8a   :  { %v8264_v33 = vpop.eup %8263  ;;  %v5077_v54 = vsub.f32 %v5045_v51, %v5061_v41  ;;  %v5076_v62 = vsub.f32 %v5044_v9, %v5060_v5 }
 0xd8b   :  { %v5137_v8 = vmul.f32 %v8264_v33, %v5089_v36  ;;  %v4935_v40 = vpop.xlane.xlu1 %4934  ;;  %v4932_v44 = vpop.xlane.xlu0 %4931  ;;  %v5156_v57 = vmul.f32 %v10159_v0, %v5136_v53 }
 0xd8c   :  { %v5109_v47 = vadd.f32 1e-05, %v5077_v54  ;;  %v5108_v21 = vadd.f32 1e-05, %v5076_v62  ;;  %v5031_v34 = vmul.f32 0.03125, %v4935_v40  ;;  %v5030_v61 = vmul.f32 0.03125, %v4932_v44 }
 0xd8d   :  { %v5157_v60 = vmul.f32 %v10159_v0, %v5137_v8  ;;  %v5176_v59 = vadd.f32 %v10166_v27, %v5156_v57 }
 0xd8e   :  { %8269 = vrsqrt.f32 %v5109_v47  ;;  %v5063_v49 = vmul.f32 %v5031_v34, %v5031_v34  ;;  %v5062_v22 = vmul.f32 %v5030_v61, %v5030_v61  ;;  %v5095_v41 = vsub.f32 %v10093_v4, %v5031_v34 }
 0xd8f   :  { %v5177_v42 = vadd.f32 %v10166_v27, %v5157_v60  ;;  %8271 = vrsqrt.f32 %v5108_v21  ;;  %7154 = vmatprep.mubr.msk.f32.mxu0 %vm44_vm0, %v5176_v59  ;;  %v4999_v15 = vpop.xlane.xlu1 %4998  ;;  %v4996_v3 = vpop.xlane.xlu0 %4995  ;;  %v5094_v25 = vsub.f32 %v10098_v48, %v5030_v61 }
 0xd90   :  { %v8266_v12 = vpop.eup %8265  ;;  %v5047_v30 = vmul.f32 0.03125, %v4999_v15  ;;  %v5046_v23 = vmul.f32 0.03125, %v4996_v3 }
 0xd91   :  { %v8268_v17 = vpop.eup %8267  ;;  %7155 = vmatmul.mubr.msk.f32.vlgmr.msra.gmra.mrb[80].mxu0 %vm44_vm0, %v5177_v42  ;;  %v5139_v38 = vmul.f32 %v8266_v12, %v5091_v24 }
 0xd92   :  { %v5079_v29 = vsub.f32 %v5047_v30, %v5063_v49  ;;  %v5078_v1 = vsub.f32 %v5046_v23, %v5062_v22  ;;  %v5138_v11 = vmul.f32 %v8268_v17, %v5090_v39  ;;  %v8370_v17 = vld [vmem:[%s10656_s0 + $0x48] sm:$0xff] }
 0xd93   :  { %v5159_v19 = vmul.f32 %v10159_v0, %v5139_v38 }
 0xd94   :  { %v5111_v2 = vadd.f32 1e-05, %v5079_v29  ;;  %v5110_v16 = vadd.f32 1e-05, %v5078_v1  ;;  %v5158_v50 = vmul.f32 %v10159_v0, %v5138_v11  ;;  %v8371_v29 = vld [vmem:[%s10656_s0 + $0x40] sm:$0xff] }
 0xd95   :  { %v5179_v32 = vadd.f32 %v10166_v27, %v5159_v19 }
 0xd96   :  { %8273 = vrsqrt.f32 %v5111_v2  ;;  %v5178_v52 = vadd.f32 %v10166_v27, %v5158_v50 }
 0xd97   :  { %8275 = vrsqrt.f32 %v5110_v16 }
 0xd98   :  { %v8270_v37 = vpop.eup %8269  ;;  %7157 = vmatprep.mubr.msk.f32.mxu0 %vm44_vm0, %v5178_v52 }
 0xd99   :  { %v8272_v43 = vpop.eup %8271  ;;  %7158 = vmatmul.mubr.msk.f32.gmra.mrb[82].mxu0 %vm44_vm0, %v5179_v32  ;;  %v5141_v26 = vmul.f32 %v8270_v37, %v5093_v35 }
 0xd9a   :  { %v5140_v18 = vmul.f32 %v8272_v43, %v5092_v28  ;;  %v8372_v28 = vld [vmem:[%s10656_s0 + $0x58] sm:$0xff] }
 0xd9b   :  { %v5161_v14 = vmul.f32 %v10159_v0, %v5141_v26 }
 0xd9c   :  { %v5160_v7 = vmul.f32 %v10159_v0, %v5140_v18 }
 0xd9d   :  { %v5181_v58 = vadd.f32 %v10166_v27, %v5161_v14  ;;  %v8373_v14 = vld [vmem:[%s10656_s0 + $0x50] sm:$0xff] }
 0xd9e   :  { %v5180_v45 = vadd.f32 %v10166_v27, %v5160_v7 }
 0xda0   :  { %v8274_v5 = vpop.eup %8273  ;;  %7160 = vmatprep.mubr.msk.f32.mxu0 %vm44_vm0, %v5180_v45 }
 0xda1   :  { %v8276_v51 = vpop.eup %8275  ;;  %7161 = vmatmul.mubr.msk.f32.gmra.mrb[84].mxu0 %vm44_vm0, %v5181_v58  ;;  %v5143_v9 = vmul.f32 %v8274_v5, %v5095_v41 }
 0xda2   :  { %v5142_v36 = vmul.f32 %v8276_v51, %v5094_v25 }
 0xda3   :  { %v5163_v53 = vmul.f32 %v10159_v0, %v5143_v9 }
 0xda4   :  { %v5162_v33 = vmul.f32 %v10159_v0, %v5142_v36 }
 0xda5   :  { %v5183_v54 = vadd.f32 %v10166_v27, %v5163_v53 }
 0xda6   :  { %v5182_v62 = vadd.f32 %v10166_v27, %v5162_v33  ;;  %v8374_v33 = vld [vmem:[%s10656_s0 + $0x68] sm:$0xff] }
 0xda8   :  { %7163 = vmatprep.mubr.msk.f32.mxu0 %vm44_vm0, %v5182_v62 }
 0xda9   :  { %7164 = vmatmul.mubr.msk.f32.gmra.mrb[86].mxu0 %vm44_vm0, %v5183_v54 }
 0xe22   :  { %v7122_v8 = vpop.f32.mrb[72].mxu1 }
 0xe23   :  { %v4720_v40 = vpop.f32.mrb[73].mxu1 }
 0xe24   :  { %7134 = vmatprep.mubr.msk.f32.mxu1 %vm554_vm1, %v4720_v40 }
 0xe25   :  { %7135 = vmatmul.mubr.msk.f32.vlgmr.msra.gmra.mrb[48].mxu1 %vm554_vm1, %v7122_v8  ;;  %v8375_v8 = vld [vmem:[%s10656_s0 + $0x60] sm:$0xff] }
 0xe26   :  { %v7125_v44 = vpop.f32.mrb[74].mxu1 }
 0xe27   :  { %v4730_v57 = vpop.f32.mrb[75].mxu1 }
 0xe28   :  { %7137 = vmatprep.mubr.msk.f32.mxu1 %vm554_vm1, %v4730_v57 }
 0xe29   :  { %7138 = vmatmul.mubr.msk.f32.gmra.mrb[50].mxu1 %vm554_vm1, %v7125_v44 }
 0xe2a   :  { %v7128_v47 = vpop.f32.mrb[76].mxu1 }
 0xe2b   :  { %v4740_v21 = vpop.f32.mrb[77].mxu1 }
 0xe2c   :  { %7140 = vmatprep.mubr.msk.f32.mxu1 %vm554_vm1, %v4740_v21 }
 0xe2d   :  { %7141 = vmatmul.mubr.msk.f32.gmra.mrb[52].mxu1 %vm554_vm1, %v7128_v47 }
 0xe2e   :  { %v7131_v34 = vpop.f32.mrb[78].mxu1 }
 0xe2f   :  { %v4750_v61 = vpop.f32.mrb[79].mxu1 }
 0xe30   :  { %7143 = vmatprep.mubr.msk.f32.mxu1 %vm554_vm1, %v4750_v61 }
 0xe31   :  { %7144 = vmatmul.mubr.msk.f32.gmra.mrb[54].mxu1 %vm554_vm1, %v7131_v34 }
 0xe64   :  { %v10211_v60 = vpop.f32.mrb[80].mxu0 }
 0xe65   :  { %v10213_v59 = vpop.f32.mrb[81].mxu0 }
 0xe6c   :  { %v10215_v42 = vpop.f32.mrb[82].mxu0 }
 0xe6d   :  { %v10217_v24 = vpop.f32.mrb[83].mxu0 }
 0xe74   :  { %v10219_v39 = vpop.f32.mrb[84].mxu0 }
 0xe75   :  { %v10221_v15 = vpop.f32.mrb[85].mxu0 }
 0xe7c   :  { %v10223_v3 = vpop.f32.mrb[86].mxu0 }
 0xe7d   :  { %v10225_v12 = vpop.f32.mrb[87].mxu0 }
 0xef8   :  { %v7136_v49 = vpop.f32.mrb[48].mxu1 }
 0xef9   :  { %v7586_v22 = vadd.f32 %v7136_v49, %v10006_v56  ;;  %v4849_v30 = vpop.f32.mrb[49].mxu1 }
 0xefa   :  { %v7587_v23 = vadd.f32 %v4849_v30, %v10006_v56 }
 0xefb   :  { %v10232_v38 = vadd.f32 %v8370_v17, %v7586_v22  ;;  %v8376_v22 = vld [vmem:[%s10656_s0 + $0x78] sm:$0xff] }
 0xefc   :  { %v10237_v1 = vadd.f32 %v8371_v29, %v7587_v23  ;;  %v7139_v11 = vpop.f32.mrb[50].mxu1 }
 0xefd   :  { %v7588_v19 = vadd.f32 %v7139_v11, %v10006_v56  ;;  %v4859_v2 = vpop.f32.mrb[51].mxu1  ;;  %v4939_v16 = vsel %vm44_vm0, %v10232_v38, 0.0  ;;  %v4969_v50 = vmul.f32 %v10232_v38, %v10232_v38 }
 0xefe   :  { %v7589_v32 = vadd.f32 %v4859_v2, %v10006_v56  ;;  %4940 = vadd.xlane.f32.xlu1 %v4939_v16  ;;  %v4936_v52 = vsel %vm44_vm0, %v10237_v1, 0.0  ;;  %v4968_v35 = vmul.f32 %v10237_v1, %v10237_v1 }
 0xeff   :  { %4937 = vadd.xlane.f32.xlu0 %v4936_v52  ;;  %v10252_v43 = vadd.f32 %v8372_v28, %v7588_v19  ;;  %v5003_v18 = vsel %vm44_vm0, %v4969_v50, 0.0  ;;  %v5585_v52 = vld [vmem:[%s10662_s5] sm:$0xff]  ;;  %v5587_v28 = vld [vmem:[%s10662_s5 + $0x10] sm:$0xff] }
 0xf00   :  { %v7142_v37 = vpop.f32.mrb[52].mxu1  ;;  %v10258_v7 = vadd.f32 %v8373_v14, %v7589_v32  ;;  %v5000_v58 = vsel %vm44_vm0, %v4968_v35, 0.0  ;;  %v5586_v35 = vld [vmem:[%s10662_s5 + $0x8] sm:$0xff]  ;;  %v8378_v14 = vld [vmem:[%s10659_s6] sm:$0x3] }
 0xf01   :  { %v4869_v26 = vpop.f32.mrb[53].mxu1  ;;  %v7590_v41 = vadd.f32 %v7142_v37, %v10006_v56  ;;  %v4945_v25 = vsel %vm44_vm0, %v10252_v43, 0.0  ;;  %v4971_v51 = vmul.f32 %v10252_v43, %v10252_v43  ;;  %v7554_v37 = vpack.c.bf16 %v5586_v35, %v5585_v52 }
 0xf02   :  { %5004 = vadd.xlane.f32.xlu1 %v5003_v18  ;;  %v7591_v9 = vadd.f32 %v4869_v26, %v10006_v56  ;;  %v4942_v36 = vsel %vm44_vm0, %v10258_v7, 0.0  ;;  %v4970_v53 = vmul.f32 %v10258_v7, %v10258_v7  ;;  %v5588_v26 = vld [vmem:[%s10662_s5 + $0x18] sm:$0xff] }
 0xf03   :  { %5001 = vadd.xlane.f32.xlu0 %v5000_v58  ;;  %v10274_v54 = vadd.f32 %v8374_v33, %v7590_v41  ;;  %v5009_v62 = vsel %vm44_vm0, %v4971_v51, 0.0  ;;  %7570 = vmatprep.subr.bf16.mxu1 %v7554_v37  ;;  %v7558_v18 = vpack.c.bf16 %v5588_v26, %v5587_v28  ;;  %v10332_v58 = vrot.slane %v8378_v14, %v307_v6  ;;  %v5590_v41 = vld [vmem:[%s10662_s5 + $0x28] sm:$0xff]  ;;  %v5591_v6 = vld [vmem:[%s10662_s5 + $0x30] sm:$0xff]  ;;  %v5592_v51 = vld [vmem:[%s10662_s5 + $0x38] sm:$0xff] }
 0xf04   :  { %v7145_v45 = vpop.f32.mrb[54].mxu1  ;;  %v10280_v40 = vadd.f32 %v8375_v8, %v7591_v9  ;;  %v5006_v44 = vsel %vm44_vm0, %v4970_v53, 0.0  ;;  %7555 = vmatprep.subr.bf16.mxu0 %v7554_v37  ;;  %7574 = vmatpush3.bf16.msra.mxu1 %v7554_v37  ;;  %v7566_v9 = vpack.c.bf16 %v5592_v51, %v5591_v6 }
 0xf05   :  { %v4879_v5 = vpop.f32.mrb[55].mxu1  ;;  %v7592_v57 = vadd.f32 %v7145_v45, %v10006_v56  ;;  %v4951_v47 = vsel %vm44_vm0, %v10274_v54, 0.0  ;;  %v4973_v21 = vmul.f32 %v10274_v54, %v10274_v54  ;;  %7557 = vmatpush3.bf16.msra.mxu0 %v7554_v37  ;;  %7571 = vmatprep.subr.bf16.mxu1 %v7558_v18  ;;  %v5589_v45 = vld [vmem:[%s10662_s5 + $0x20] sm:$0xff]  ;;  %v10364_v53 = vadd.f32 %v10219_v39, %v10332_v58 }
 0xf06   :  { %4946 = vadd.xlane.f32.xlu1 %v4945_v25  ;;  %v7593_v34 = vadd.f32 %v4879_v5, %v10006_v56  ;;  %v4948_v61 = vsel %vm44_vm0, %v10280_v40, 0.0  ;;  %v4972_v49 = vmul.f32 %v10280_v40, %v10280_v40  ;;  %v8377_v56 = vld [vmem:[%s10656_s0 + $0x70] sm:$0xff]  ;;  %7559 = vmatprep.subr.bf16.mxu0 %v7558_v18  ;;  %v7562_v5 = vpack.c.bf16 %v5590_v41, %v5589_v45 }
 0xf07   :  { %4943 = vadd.xlane.f32.xlu0 %v4942_v36  ;;  %v10296_v30 = vadd.f32 %v8376_v22, %v7592_v57  ;;  %v5015_v23 = vsel %vm44_vm0, %v4973_v21, 0.0  ;;  %v10342_v25 = vadd.f32 %v10215_v42, %v10332_v58  ;;  %v10354_v42 = vadd.f32 %v10221_v15, %v10332_v58 }
 0xf08   :  { %v10302_v17 = vadd.f32 %v8377_v56, %v7593_v34  ;;  %v5012_v29 = vsel %vm44_vm0, %v4972_v49, 0.0  ;;  %7575 = vmatpush3.bf16.msra.mxu1 %v7558_v18  ;;  %v10358_v36 = vadd.f32 %v10217_v24, %v10332_v58  ;;  %v10370_v15 = vadd.f32 %v10225_v12, %v10332_v58 }
 0xf09   :  { %v4957_v11 = vsel %vm44_vm0, %v10296_v30, 0.0  ;;  %v4975_v19 = vmul.f32 %v10296_v30, %v10296_v30  ;;  %7561 = vmatpush3.bf16.msra.mxu0 %v7558_v18  ;;  %7572 = vmatprep.subr.bf16.mxu1 %v7562_v5  ;;  %v10376_v24 = vadd.f32 %v10223_v3, %v10332_v58  ;;  %v6133_v39 = vmul.f32 -1.442695, %v10342_v25 }
 0xf0a   :  { %5010 = vadd.xlane.f32.xlu1 %v5009_v62  ;;  %v4954_v2 = vsel %vm44_vm0, %v10302_v17, 0.0  ;;  %v4974_v16 = vmul.f32 %v10302_v17, %v10302_v17  ;;  %7563 = vmatprep.subr.bf16.mxu0 %v7562_v5  ;;  %v6132_v33 = vmul.f32 -1.442695, %v10358_v36  ;;  %v6134_v12 = vmul.f32 -1.442695, %v10354_v42 }
 0xf0b   :  { %5007 = vadd.xlane.f32.xlu0 %v5006_v44  ;;  %v5021_v50 = vsel %vm44_vm0, %v4975_v19, 0.0  ;;  %8277 = vpow2.f32 %v6133_v39  ;;  %v6135_v57 = vmul.f32 -1.442695, %v10364_v53  ;;  %v6136_v21 = vmul.f32 -1.442695, %v10370_v15 }
 0xf0c   :  { %v5018_v32 = vsel %vm44_vm0, %v4974_v16, 0.0  ;;  %7576 = vmatpush3.bf16.msra.mxu1 %v7562_v5  ;;  %8279 = vpow2.f32 %v6132_v33  ;;  %v6137_v19 = vmul.f32 -1.442695, %v10376_v24 }
 0xf0d   :  { %7565 = vmatpush3.bf16.msra.mxu0 %v7562_v5  ;;  %7573 = vmatprep.subr.bf16.mxu1 %v7566_v9  ;;  %8281 = vpow2.f32 %v6134_v12 }
 0xf0e   :  { %4952 = vadd.xlane.f32.xlu1 %v4951_v47  ;;  %7567 = vmatprep.subr.bf16.mxu0 %v7566_v9  ;;  %8283 = vpow2.f32 %v6135_v57 }
 0xf0f   :  { %4949 = vadd.xlane.f32.xlu0 %v4948_v61  ;;  %8285 = vpow2.f32 %v6136_v21 }
 0xf10   :  { %7577 = vmatpush3.bf16.msra.mxu1 %v7566_v9 }
 0xf11   :  { %7569 = vmatpush3.bf16.msra.mxu0 %v7566_v9 }
 0xf12   :  { %5016 = vadd.xlane.f32.xlu1 %v5015_v23 }
 0xf13   :  { %5013 = vadd.xlane.f32.xlu0 %v5012_v29 }
 0xf16   :  { %4958 = vadd.xlane.f32.xlu1 %v4957_v11 }
 0xf17   :  { %4955 = vadd.xlane.f32.xlu0 %v4954_v2 }
 0xf1a   :  { %5022 = vadd.xlane.f32.xlu1 %v5021_v50 }
 0xf1b   :  { %5019 = vadd.xlane.f32.xlu0 %v5018_v32  ;;  %v8278_v32 = vpop.eup %8277 }
 0xf1c   :  { %v8280_v37 = vpop.eup %8279  ;;  %v5444_v26 = vadd.f32 1.0, %v8278_v32 }
 0xf1d   :  { %v8282_v41 = vpop.eup %8281  ;;  %v5443_v5 = vadd.f32 1.0, %v8280_v37 }
 0xf1e   :  { %v8284_v12 = vpop.eup %8283 }
 0xf2b   :  { %5527 = vrot.lane.b32.xlu1 %v10342_v25, %s8381_s22 }
 0xf2f   :  { %5529 = vrot.lane.b32.xlu1 %v10354_v42, %s8381_s22 }
 0xf31   :  { %5525 = vrot.lane.b32.xlu0 %v10358_v36, %s8381_s22 }
 0xf33   :  { %5531 = vrot.lane.b32.xlu1 %v10364_v53, %s8381_s22 }
 0xf35   :  { %5533 = vrot.lane.b32.xlu0 %v10370_v15, %s8381_s22 }
 0xf37   :  { %5535 = vrot.lane.b32.xlu1 %v10376_v24, %s8381_s22 }
 0xf8b   :  { %v4941_v62 = vpop.xlane.xlu1 %4940 }
 0xf8c   :  { %v10385_v8 = vmul.f32 0.03125, %v4941_v62  ;;  %v4938_v44 = vpop.xlane.xlu0 %4937  ;;  %v5445_v62 = vadd.f32 1.0, %v8282_v41 }
 0xf8d   :  { %v10387_v3 = vmul.f32 0.03125, %v4938_v44 }
 0xf8e   :  { %v5065_v34 = vmul.f32 %v10385_v8, %v10385_v8 }
 0xf8f   :  { %v5005_v47 = vpop.xlane.xlu1 %5004  ;;  %v5064_v22 = vmul.f32 %v10387_v3, %v10387_v3 }
 0xf90   :  { %v5049_v61 = vmul.f32 0.03125, %v5005_v47  ;;  %v5002_v49 = vpop.xlane.xlu0 %5001 }
 0xf91   :  { %v5048_v23 = vmul.f32 0.03125, %v5002_v49  ;;  %v5446_v49 = vadd.f32 1.0, %v8284_v12 }
 0xf92   :  { %v5081_v56 = vsub.f32 %v5049_v61, %v5065_v34  ;;  %v8286_v61 = vpop.eup %8285 }
 0xf93   :  { %v5080_v29 = vsub.f32 %v5048_v23, %v5064_v22  ;;  %v4947_v11 = vpop.xlane.xlu1 %4946  ;;  %v5097_v22 = vsub.f32 %v10232_v38, %v10385_v8  ;;  %v5447_v32 = vadd.f32 1.0, %v8286_v61 }
 0xf94   :  { %v5113_v2 = vadd.f32 1e-05, %v5081_v56  ;;  %v10396_v16 = vmul.f32 0.03125, %v4947_v11  ;;  %v4944_v50 = vpop.xlane.xlu0 %4943 }
 0xf95   :  { %v5112_v52 = vadd.f32 1e-05, %v5080_v29  ;;  %v10398_v35 = vmul.f32 0.03125, %v4944_v50  ;;  %v5096_v29 = vsub.f32 %v10237_v1, %v10387_v3 }
 0xf96   :  { %8287 = vrsqrt.f32 %v5113_v2  ;;  %v5067_v18 = vmul.f32 %v10396_v16, %v10396_v16 }
 0xf97   :  { %8289 = vrsqrt.f32 %v5112_v52  ;;  %v5011_v28 = vpop.xlane.xlu1 %5010  ;;  %v5066_v6 = vmul.f32 %v10398_v35, %v10398_v35 }
 0xf98   :  { %8291 = vpow2.f32 %v6137_v19  ;;  %v5051_v14 = vmul.f32 0.03125, %v5011_v28  ;;  %v5008_v45 = vpop.xlane.xlu0 %5007 }
 0xf99   :  { %v5050_v51 = vmul.f32 0.03125, %v5008_v45  ;;  %8293 = vrcp.f32 %v5444_v26 }
 0xf9a   :  { %v5083_v9 = vsub.f32 %v5051_v14, %v5067_v18  ;;  %8295 = vrcp.f32 %v5443_v5 }
 0xf9b   :  { %v5082_v39 = vsub.f32 %v5050_v51, %v5066_v6  ;;  %v4953_v33 = vpop.xlane.xlu1 %4952 }
 0xf9c   :  { %v5115_v44 = vadd.f32 1e-05, %v5083_v9  ;;  %v10404_v57 = vmul.f32 0.03125, %v4953_v33  ;;  %v4950_v47 = vpop.xlane.xlu0 %4949 }
 0xf9d   :  { %v5114_v21 = vadd.f32 1e-05, %v5082_v39  ;;  %v10406_v34 = vmul.f32 0.03125, %v4950_v47  ;;  %v5099_v47 = vsub.f32 %v10252_v43, %v10396_v16 }
 0xf9e   :  { %8297 = vrsqrt.f32 %v5115_v44  ;;  %v5069_v11 = vmul.f32 %v10404_v57, %v10404_v57 }
 0xf9f   :  { %8299 = vrsqrt.f32 %v5114_v21  ;;  %v5017_v23 = vpop.xlane.xlu1 %5016  ;;  %v5068_v52 = vmul.f32 %v10406_v34, %v10406_v34 }
 0xfa0   :  { %v8288_v56 = vpop.eup %8287  ;;  %8301 = vrcp.f32 %v5445_v62  ;;  %v5053_v19 = vmul.f32 0.03125, %v5017_v23  ;;  %v5014_v2 = vpop.xlane.xlu0 %5013 }
 0xfa1   :  { %v8290_v50 = vpop.eup %8289  ;;  %v5052_v37 = vmul.f32 0.03125, %v5014_v2  ;;  %v5145_v28 = vmul.f32 %v8288_v56, %v5097_v22  ;;  %8303 = vrcp.f32 %v5446_v49  ;;  %v5098_v22 = vsub.f32 %v10258_v7, %v10398_v35 }
 0xfa2   :  { %v8292_v8 = vpop.eup %8291  ;;  %v5085_v26 = vsub.f32 %v5053_v19, %v5069_v11  ;;  %v5144_v18 = vmul.f32 %v8290_v50, %v5096_v29  ;;  %8305 = vrcp.f32 %v5447_v32 }
 0xfa3   :  { %v5084_v14 = vsub.f32 %v5052_v37, %v5068_v52  ;;  %v4959_v45 = vpop.xlane.xlu1 %4958  ;;  %v5165_v41 = vmul.f32 %v10159_v0, %v5145_v28  ;;  %v5448_v9 = vadd.f32 1.0, %v8292_v8  ;;  %v8294_v12 = vpop.eup %8293 }
 0xfa4   :  { %v5117_v3 = vadd.f32 1e-05, %v5085_v26  ;;  %v10417_v5 = vmul.f32 0.03125, %v4959_v45  ;;  %v4956_v6 = vpop.xlane.xlu0 %4955  ;;  %v5164_v51 = vmul.f32 %v10159_v0, %v5144_v18  ;;  %v8296_v44 = vpop.eup %8295  ;;  %v5492_v18 = vmul.f32 %v8294_v12, %v10342_v25 }
 0xfa5   :  { %v5116_v39 = vadd.f32 1e-05, %v5084_v14  ;;  %v10420_v33 = vmul.f32 0.03125, %v4956_v6  ;;  %v5185_v61 = vadd.f32 %v10166_v27, %v5165_v41  ;;  %v5491_v28 = vmul.f32 %v8296_v44, %v10358_v36 }
 0xfa6   :  { %8307 = vrsqrt.f32 %v5117_v3  ;;  %v5184_v62 = vadd.f32 %v10166_v27, %v5164_v51  ;;  %v5071_v23 = vmul.f32 %v10417_v5, %v10417_v5  ;;  %v5101_v36 = vsub.f32 %v10274_v54, %v10404_v57 }
 0xfa7   :  { %8309 = vrsqrt.f32 %v5116_v39  ;;  %v5023_v21 = vpop.xlane.xlu1 %5022  ;;  %v5070_v16 = vmul.f32 %v10420_v33, %v10420_v33 }
 0xfa8   :  { %v8298_v49 = vpop.eup %8297  ;;  %v5055_v56 = vmul.f32 0.03125, %v5023_v21  ;;  %7166 = vmatprep.mubr.msk.f32.mxu0 %vm44_vm0, %v5184_v62  ;;  %v5020_v29 = vpop.xlane.xlu0 %5019  ;;  %8311 = vrcp.f32 %v5448_v9 }
 0xfa9   :  { %v8300_v11 = vpop.eup %8299  ;;  %v5054_v19 = vmul.f32 0.03125, %v5020_v29  ;;  %7167 = vmatmul.mubr.msk.f32.gmra.mrb[88].mxu0 %vm44_vm0, %v5185_v61  ;;  %v5147_v2 = vmul.f32 %v8298_v49, %v5099_v47  ;;  %v5100_v47 = vsub.f32 %v10280_v40, %v10406_v34 }
 0xfaa   :  { %v8302_v50 = vpop.eup %8301  ;;  %v5087_v32 = vsub.f32 %v5055_v56, %v5071_v23  ;;  %v5146_v52 = vmul.f32 %v8300_v11, %v5098_v22 }
 0xfab   :  { %v5086_v35 = vsub.f32 %v5054_v19, %v5070_v16  ;;  %v5528_v37 = vpop.permute.xlu1 %5527  ;;  %v5167_v8 = vmul.f32 %v10159_v0, %v5147_v2  ;;  %v8304_v6 = vpop.eup %8303  ;;  %v5493_v9 = vmul.f32 %v8302_v50, %v10354_v42 }
 0xfac   :  { %v5119_v26 = vadd.f32 1e-05, %v5087_v32  ;;  %v5526_v14 = vpop.permute.xlu0 %5525  ;;  %v5166_v45 = vmul.f32 %v10159_v0, %v5146_v52  ;;  %v5572_v51 = vmul.f32 %v5528_v37, %v5492_v18  ;;  %v8306_v62 = vpop.eup %8305  ;;  %v5494_v49 = vmul.f32 %v8304_v6, %v10364_v53 }
 0xfad   :  { %v5118_v41 = vadd.f32 1e-05, %v5086_v35  ;;  %v5571_v3 = vmul.f32 %v5526_v14, %v5491_v28  ;;  %v5187_v25 = vadd.f32 %v10166_v27, %v5167_v8  ;;  %v5495_v56 = vmul.f32 %v8306_v62, %v10370_v15 }
 0xfae   :  { %8313 = vrsqrt.f32 %v5119_v26  ;;  %v5186_v39 = vadd.f32 %v10166_v27, %v5166_v45  ;;  %v5103_v53 = vsub.f32 %v10296_v30, %v10417_v5  ;;  %v5102_v35 = vsub.f32 %v10302_v17, %v10420_v33 }
 0xfaf   :  { %8315 = vrsqrt.f32 %v5118_v41  ;;  %v5530_v44 = vpop.permute.xlu1 %5529  ;;  %7197 = vmatprep.mubr.msk.f32.mxu1 %vm692_vm3, %v5571_v3  ;;  %v5804_v6 = vsub.s32 5, %v8525_v55 }
 0xfb0   :  { %v8308_v12 = vpop.eup %8307  ;;  %v5573_v21 = vmul.f32 %v5530_v44, %v5493_v9  ;;  %7169 = vmatprep.mubr.msk.f32.mxu0 %vm44_vm0, %v5186_v39  ;;  %7198 = vmatmul.mubr.msk.f32.vlgmr.msra.gmra.mrb[80].mxu1 %vm692_vm3, %v5572_v51  ;;  %v5534_v57 = vpop.permute.xlu0 %5533 }
 0xfb1   :  { %v8310_v42 = vpop.eup %8309  ;;  %7170 = vmatmul.mubr.msk.f32.gmra.mrb[90].mxu0 %vm44_vm0, %v5187_v25  ;;  %v5149_v61 = vmul.f32 %v8308_v12, %v5101_v36  ;;  %v5575_v19 = vmul.f32 %v5534_v57, %v5495_v56 }
 0xfb2   :  { %7200 = vmatprep.mubr.msk.f32.mxu1 %vm692_vm3, %v5573_v21  ;;  %v5148_v22 = vmul.f32 %v8310_v42, %v5100_v47  ;;  %v8312_v23 = vpop.eup %8311 }
 0xfb3   :  { %v5532_v29 = vpop.permute.xlu1 %5531  ;;  %v5169_v34 = vmul.f32 %v10159_v0, %v5149_v61  ;;  %v5496_v2 = vmul.f32 %v8312_v23, %v10376_v24 }
 0xfb4   :  { %v5574_v11 = vmul.f32 %v5532_v29, %v5494_v49  ;;  %v5168_v16 = vmul.f32 %v10159_v0, %v5148_v22 }
 0xfb5   :  { %v5189_v15 = vadd.f32 %v10166_v27, %v5169_v34 }
 0xfb6   :  { %7201 = vmatmul.mubr.msk.f32.gmra.mrb[82].mxu1 %vm692_vm3, %v5574_v11  ;;  %v5188_v50 = vadd.f32 %v10166_v27, %v5168_v16 }
 0xfb7   :  { %v5536_v32 = vpop.permute.xlu1 %5535  ;;  %7203 = vmatprep.mubr.msk.f32.mxu1 %vm692_vm3, %v5575_v19 }
 0xfb8   :  { %v8314_v52 = vpop.eup %8313  ;;  %v5576_v37 = vmul.f32 %v5536_v32, %v5496_v2  ;;  %7172 = vmatprep.mubr.msk.f32.mxu0 %vm44_vm0, %v5188_v50  ;;  %v10552_v2 = vadd.f32 %v10211_v60, %v10332_v58 }
 0xfb9   :  { %v8316_v28 = vpop.eup %8315  ;;  %7173 = vmatmul.mubr.msk.f32.gmra.mrb[92].mxu0 %vm44_vm0, %v5189_v15  ;;  %v5151_v24 = vmul.f32 %v8314_v52, %v5103_v53 }
 0xfba   :  { %7204 = vmatmul.mubr.msk.f32.gmra.mrb[84].mxu1 %vm692_vm3, %v5576_v37  ;;  %v5150_v8 = vmul.f32 %v8316_v28, %v5102_v35 }
 0xfbb   :  { %v5171_v5 = vmul.f32 %v10159_v0, %v5151_v24 }
 0xfbc   :  { %v5170_v26 = vmul.f32 %v10159_v0, %v5150_v8  ;;  %v8379_v0 = vld [vmem:[%s10658_s1] sm:$0x3f] }
 0xfbd   :  { %v5191_v14 = vadd.f32 %v10166_v27, %v5171_v5 }
 0xfbe   :  { %v5190_v18 = vadd.f32 %v10166_v27, %v5170_v26  ;;  %v10486_v27 = vrot.slane %v8379_v0, %v5804_v6 }
 0xfc0   :  { %7175 = vmatprep.mubr.msk.f32.mxu0 %vm44_vm0, %v5190_v18  ;;  %v6131_v18 = vmul.f32 -1.442695, %v10552_v2 }
 0xfc1   :  { %7176 = vmatmul.mubr.msk.f32.gmra.mrb[94].mxu0 %vm44_vm0, %v5191_v14 }
0x107c   :  { %v7168_v33 = vpop.f32.mrb[88].mxu0 }
0x107d   :  { %v10473_v45 = vadd.f32 %v7168_v33, %v10332_v58  ;;  %v5354_v41 = vpop.f32.mrb[89].mxu0 }
0x107e   :  { %v10476_v3 = vadd.f32 %v5354_v41, %v10332_v58 }
0x107f   :  { %5539 = vrot.lane.b32.xlu1 %v10473_v45, %s8381_s22  ;;  %v6139_v60 = vmul.f32 -1.442695, %v10473_v45 }
0x1080   :  { %5537 = vrot.lane.b32.xlu0 %v10476_v3, %s8381_s22  ;;  %v6138_v53 = vmul.f32 -1.442695, %v10476_v3 }
0x1082   :  { %8317 = vpow2.f32 %v6138_v53 }
0x1083   :  { %v7199_v51 = vpop.f32.mrb[80].mxu1  ;;  %8319 = vpow2.f32 %v6139_v60 }
0x1084   :  { %v5789_v9 = vadd.f32 %v7199_v51, %v10038_v10  ;;  %v7171_v39 = vpop.f32.mrb[90].mxu0  ;;  %v5717_v62 = vpop.f32.mrb[81].mxu1 }
0x1085   :  { %v10490_v36 = vadd.f32 %v7171_v39, %v10332_v58  ;;  %v5788_v55 = vadd.f32 %v5717_v62, %v10043_v13  ;;  %v5364_v44 = vpop.f32.mrb[91].mxu0 }
0x1086   :  { %v5809_v25 = vadd.f32 %v10486_v27, %v5789_v9  ;;  %v10495_v12 = vadd.f32 %v5364_v44, %v10332_v58 }
0x1087   :  { %v5808_v47 = vadd.f32 %v10486_v27, %v5788_v55  ;;  %5543 = vrot.lane.b32.xlu1 %v10490_v36, %s8381_s22  ;;  %v6141_v15 = vmul.f32 -1.442695, %v10490_v36 }
0x1088   :  { %5825 = vst.msk [vmem:[%s10663_s7 + $0x18] sm:$0xff] %vm44_vm0, %v5809_v25  ;;  %5541 = vrot.lane.b32.xlu0 %v10495_v12, %s8381_s22  ;;  %v6140_v32 = vmul.f32 -1.442695, %v10495_v12 }
0x1089   :  { %5824 = vst.msk [vmem:[%s10663_s7 + $0x10] sm:$0xff] %vm44_vm0, %v5808_v47  ;;  %v7202_v10 = vpop.f32.mrb[82].mxu1 }
0x108a   :  { %v5791_v13 = vadd.f32 %v7202_v10, %v10067_v46  ;;  %v5727_v21 = vpop.f32.mrb[83].mxu1  ;;  %8321 = vpow2.f32 %v6140_v32 }
0x108b   :  { %v5790_v42 = vadd.f32 %v5727_v21, %v10072_v31  ;;  %8323 = vpow2.f32 %v6141_v15 }
0x108c   :  { %v5811_v61 = vadd.f32 %v10486_v27, %v5791_v13  ;;  %v7174_v57 = vpop.f32.mrb[92].mxu0  ;;  %v8318_v52 = vpop.eup %8317 }
0x108d   :  { %v5810_v49 = vadd.f32 %v10486_v27, %v5790_v42  ;;  %v10515_v22 = vadd.f32 %v7174_v57, %v10332_v58  ;;  %v5374_v23 = vpop.f32.mrb[93].mxu0  ;;  %v7205_v56 = vpop.f32.mrb[84].mxu1  ;;  %v5449_v37 = vadd.f32 1.0, %v8318_v52 }
0x108e   :  { %5827 = vst.msk [vmem:[%s10663_s7 + $0x28] sm:$0xff] %vm44_vm0, %v5811_v61  ;;  %v10522_v46 = vadd.f32 %v5374_v23, %v10332_v58  ;;  %v5793_v31 = vadd.f32 %v7205_v56, %v10093_v4  ;;  %v5737_v29 = vpop.f32.mrb[85].mxu1  ;;  %v10538_v4 = vadd.f32 %v10213_v59, %v10332_v58  ;;  %v8320_v35 = vpop.eup %8319 }
0x108f   :  { %5826 = vst.msk [vmem:[%s10663_s7 + $0x20] sm:$0xff] %vm44_vm0, %v5810_v49  ;;  %v5792_v34 = vadd.f32 %v5737_v29, %v10098_v48  ;;  %5547 = vrot.lane.b32.xlu1 %v10515_v22, %s8381_s22  ;;  %v6143_v28 = vmul.f32 -1.442695, %v10515_v22  ;;  %v5450_v24 = vadd.f32 1.0, %v8320_v35  ;;  %8325 = vrcp.f32 %v5449_v37 }
0x1090   :  { %v5813_v11 = vadd.f32 %v10486_v27, %v5793_v31  ;;  %5545 = vrot.lane.b32.xlu0 %v10522_v46, %s8381_s22  ;;  %v6130_v8 = vmul.f32 -1.442695, %v10538_v4 }
0x1091   :  { %v5812_v16 = vadd.f32 %v10486_v27, %v5792_v34 }
0x1092   :  { %5829 = vst.msk [vmem:[%s10663_s7 + $0x38] sm:$0xff] %vm44_vm0, %v5813_v11 }
0x1093   :  { %5828 = vst.msk [vmem:[%s10663_s7 + $0x30] sm:$0xff] %vm44_vm0, %v5812_v16 }
0x1094   :  { %5521 = vrot.lane.b32.xlu0 %v10538_v4, %s8381_s22  ;;  %v7177_v48 = vpop.f32.mrb[94].mxu0  ;;  %v8322_v5 = vpop.eup %8321 }
0x1095   :  { %v5384_v19 = vpop.f32.mrb[95].mxu0  ;;  %v10562_v50 = vadd.f32 %v7177_v48, %v10332_v58  ;;  %v8324_v26 = vpop.eup %8323  ;;  %v5451_v33 = vadd.f32 1.0, %v8322_v5 }
0x1096   :  { %v10555_v59 = vadd.f32 %v5384_v19, %v10332_v58  ;;  %v6142_v58 = vmul.f32 -1.442695, %v10522_v46  ;;  %v5452_v41 = vadd.f32 1.0, %v8324_v26 }
0x1097   :  { %v6145_v6 = vmul.f32 -1.442695, %v10562_v50 }
0x1098   :  { %5523 = vrot.lane.b32.xlu0 %v10552_v2, %s8381_s22  ;;  %5549 = vrot.lane.b32.xlu1 %v10555_v59, %s8381_s22  ;;  %8327 = vpow2.f32 %v6142_v58  ;;  %v6144_v14 = vmul.f32 -1.442695, %v10555_v59 }
0x1099   :  { %8329 = vpow2.f32 %v6143_v28  ;;  %v8326_v0 = vpop.eup %8325 }
0x109a   :  { %8331 = vrcp.f32 %v5450_v24  ;;  %v5497_v47 = vmul.f32 %v8326_v0, %v10476_v3 }
0x109b   :  { %8333 = vpow2.f32 %v6130_v8 }
0x109c   :  { %5551 = vrot.lane.b32.xlu1 %v10562_v50, %s8381_s22  ;;  %8335 = vpow2.f32 %v6131_v18 }
0x109d   :  { %8337 = vpow2.f32 %v6144_v14 }
0x109e   :  { %8339 = vrcp.f32 %v5451_v33 }
0x109f   :  { %8341 = vrcp.f32 %v5452_v41 }
0x10a0   :  { %8343 = vpow2.f32 %v6145_v6 }
0x10a2   :  { %v8328_v51 = vpop.eup %8327 }
0x10a3   :  { %v8330_v9 = vpop.eup %8329  ;;  %v5453_v62 = vadd.f32 1.0, %v8328_v51 }
0x10a4   :  { %v8332_v39 = vpop.eup %8331  ;;  %v5454_v44 = vadd.f32 1.0, %v8330_v9 }
0x10a5   :  { %v8334_v55 = vpop.eup %8333  ;;  %v5498_v10 = vmul.f32 %v8332_v39, %v10473_v45  ;;  %8345 = vrcp.f32 %v5453_v62 }
0x10a6   :  { %v8336_v42 = vpop.eup %8335  ;;  %v5441_v61 = vadd.f32 1.0, %v8334_v55  ;;  %8347 = vrcp.f32 %v5454_v44 }
0x10a7   :  { %v8338_v49 = vpop.eup %8337  ;;  %v5442_v31 = vadd.f32 1.0, %v8336_v42 }
0x10a8   :  { %v8340_v23 = vpop.eup %8339  ;;  %8349 = vrcp.f32 %v5441_v61  ;;  %v5455_v29 = vadd.f32 1.0, %v8338_v49 }
0x10a9   :  { %v8342_v56 = vpop.eup %8341  ;;  %v5499_v45 = vmul.f32 %v8340_v23, %v10495_v12  ;;  %8351 = vrcp.f32 %v5442_v31 }
0x10aa   :  { %v8344_v3 = vpop.eup %8343  ;;  %v5500_v11 = vmul.f32 %v8342_v56, %v10490_v36  ;;  %8353 = vrcp.f32 %v5455_v29 }
0x10ab   :  { %v5456_v19 = vadd.f32 1.0, %v8344_v3 }
0x10ad   :  { %8355 = vrcp.f32 %v5456_v19 }
0x10af   :  { %v8346_v60 = vpop.eup %8345 }
0x10b0   :  { %v8348_v32 = vpop.eup %8347  ;;  %v5501_v52 = vmul.f32 %v8346_v60, %v10522_v46 }
0x10b1   :  { %v5502_v12 = vmul.f32 %v8348_v32, %v10515_v22 }
0x10b2   :  { %v8350_v35 = vpop.eup %8349 }
0x10b3   :  { %v8352_v28 = vpop.eup %8351  ;;  %v5489_v24 = vmul.f32 %v8350_v35, %v10538_v4 }
0x10b4   :  { %v8354_v8 = vpop.eup %8353  ;;  %v5490_v18 = vmul.f32 %v8352_v28, %v10552_v2 }
0x10b5   :  { %v5503_v46 = vmul.f32 %v8354_v8, %v10555_v59 }
0x10b7   :  { %v8356_v22 = vpop.eup %8355 }
0x10b8   :  { %v5504_v4 = vmul.f32 %v8356_v22, %v10562_v50 }
0x10f1   :  { %v5540_v25 = vpop.permute.xlu1 %5539 }
0x10f2   :  { %v5538_v13 = vpop.permute.xlu0 %5537  ;;  %v5578_v57 = vmul.f32 %v5540_v25, %v5498_v10 }
0x10f3   :  { %v5577_v21 = vmul.f32 %v5538_v13, %v5497_v47 }
0x10f5   :  { %7206 = vmatprep.mubr.msk.f32.mxu1 %vm692_vm3, %v5577_v21 }
0x10f6   :  { %7207 = vmatmul.mubr.msk.f32.gmra.mrb[86].mxu1 %vm692_vm3, %v5578_v57 }
0x10f9   :  { %v5544_v34 = vpop.permute.xlu1 %5543 }
0x10fa   :  { %v5542_v16 = vpop.permute.xlu0 %5541  ;;  %v5580_v53 = vmul.f32 %v5544_v34, %v5500_v11 }
0x10fb   :  { %v5579_v48 = vmul.f32 %v5542_v16, %v5499_v45 }
0x10fd   :  { %7209 = vmatprep.mubr.msk.f32.mxu1 %vm692_vm3, %v5579_v48 }
0x10fe   :  { %7210 = vmatmul.mubr.msk.f32.gmra.mrb[88].mxu1 %vm692_vm3, %v5580_v53 }
0x1101   :  { %v5548_v15 = vpop.permute.xlu1 %5547 }
0x1102   :  { %v5546_v36 = vpop.permute.xlu0 %5545  ;;  %v5582_v58 = vmul.f32 %v5548_v15, %v5502_v12 }
0x1103   :  { %v5581_v37 = vmul.f32 %v5546_v36, %v5501_v52 }
0x1105   :  { %7212 = vmatprep.mubr.msk.f32.mxu1 %vm692_vm3, %v5581_v37 }
0x1106   :  { %7213 = vmatmul.mubr.msk.f32.gmra.mrb[90].mxu1 %vm692_vm3, %v5582_v58  ;;  %v5522_v5 = vpop.permute.xlu0 %5521 }
0x1107   :  { %v5569_v26 = vmul.f32 %v5522_v5, %v5489_v24 }
0x1109   :  { %7194 = vmatprep.mubr.msk.f32.mxu0 %vm692_vm3, %v5569_v26 }
0x110a   :  { %v5550_v14 = vpop.permute.xlu1 %5549  ;;  %v5524_v33 = vpop.permute.xlu0 %5523 }
0x110b   :  { %v5583_v41 = vmul.f32 %v5550_v14, %v5503_v46  ;;  %v5570_v6 = vmul.f32 %v5524_v33, %v5490_v18 }
0x110d   :  { %7195 = vmatmul.mubr.msk.f32.vlgmr.msra.gmra.mrb[96].mxu0 %vm692_vm3, %v5570_v6  ;;  %7215 = vmatprep.mubr.msk.f32.mxu1 %vm692_vm3, %v5583_v41 }
0x110e   :  { %v5552_v0 = vpop.permute.xlu1 %5551 }
0x110f   :  { %v5584_v51 = vmul.f32 %v5552_v0, %v5504_v4 }
0x1111   :  { %7216 = vmatmul.mubr.msk.f32.gmra.mrb[92].mxu1 %vm692_vm3, %v5584_v51 }
0x11c9   :  { %v7208_v9 = vpop.f32.mrb[86].mxu1 }
0x11ca   :  { %v5795_v59 = vadd.f32 %v7208_v9, %v10232_v38  ;;  %v5747_v39 = vpop.f32.mrb[87].mxu1 }
0x11cb   :  { %v5794_v2 = vadd.f32 %v5747_v39, %v10237_v1 }
0x11cc   :  { %v5815_v62 = vadd.f32 %v10486_v27, %v5795_v59 }
0x11cd   :  { %v5814_v55 = vadd.f32 %v10486_v27, %v5794_v2 }
0x11ce   :  { %5831 = vst.msk [vmem:[%s10663_s7 + $0x48] sm:$0xff] %vm44_vm0, %v5815_v62 }
0x11cf   :  { %5830 = vst.msk [vmem:[%s10663_s7 + $0x40] sm:$0xff] %vm44_vm0, %v5814_v55 }
0x11d1   :  { %v7211_v50 = vpop.f32.mrb[88].mxu1 }
0x11d2   :  { %v5797_v38 = vadd.f32 %v7211_v50, %v10252_v43  ;;  %v5757_v44 = vpop.f32.mrb[89].mxu1 }
0x11d3   :  { %v5796_v1 = vadd.f32 %v5757_v44, %v10258_v7 }
0x11d4   :  { %v5817_v25 = vadd.f32 %v10486_v27, %v5797_v38 }
0x11d5   :  { %v5816_v47 = vadd.f32 %v10486_v27, %v5796_v1 }
0x11d6   :  { %5833 = vst.msk [vmem:[%s10663_s7 + $0x58] sm:$0xff] %vm44_vm0, %v5817_v25 }
0x11d7   :  { %5832 = vst.msk [vmem:[%s10663_s7 + $0x50] sm:$0xff] %vm44_vm0, %v5816_v47 }
0x11d9   :  { %v7214_v10 = vpop.f32.mrb[90].mxu1 }
0x11da   :  { %v5799_v43 = vadd.f32 %v7214_v10, %v10274_v54  ;;  %v5767_v13 = vpop.f32.mrb[91].mxu1 }
0x11db   :  { %v5798_v7 = vadd.f32 %v5767_v13, %v10280_v40 }
0x11dc   :  { %v5819_v21 = vadd.f32 %v10486_v27, %v5799_v43 }
0x11dd   :  { %v5818_v42 = vadd.f32 %v10486_v27, %v5798_v7 }
0x11de   :  { %5835 = vst.msk [vmem:[%s10663_s7 + $0x68] sm:$0xff] %vm44_vm0, %v5819_v21 }
0x11df   :  { %5834 = vst.msk [vmem:[%s10663_s7 + $0x60] sm:$0xff] %vm44_vm0, %v5818_v42 }
0x11e0   :  { %v7196_v61 = vpop.f32.mrb[96].mxu0 }
0x11e1   :  { %v5787_v54 = vadd.f32 %v7196_v61, %v10015_v20  ;;  %v5707_v57 = vpop.f32.mrb[97].mxu0 }
0x11e2   :  { %v5786_v40 = vadd.f32 %v5707_v57, %v10020_v63 }
0x11e3   :  { %v5807_v49 = vadd.f32 %v10486_v27, %v5787_v54 }
0x11e4   :  { %v5806_v23 = vadd.f32 %v10486_v27, %v5786_v40  ;;  %v7217_v56 = vpop.f32.mrb[92].mxu1 }
0x11e5   :  { %5823 = vst.msk [vmem:[%s10663_s7 + $0x8] sm:$0xff] %vm44_vm0, %v5807_v49  ;;  %v5801_v31 = vadd.f32 %v7217_v56, %v10296_v30  ;;  %v5777_v29 = vpop.f32.mrb[93].mxu1 }
0x11e6   :  { %5822 = vst.msk [vmem:[%s10663_s7] sm:$0xff] %vm44_vm0, %v5806_v23  ;;  %v5800_v20 = vadd.f32 %v5777_v29, %v10302_v17 }
0x11e7   :  { %v5821_v63 = vadd.f32 %v10486_v27, %v5801_v31 }
0x11e8   :  { %v5820_v3 = vadd.f32 %v10486_v27, %v5800_v20 }
0x11e9   :  { %5837 = vst.msk [vmem:[%s10663_s7 + $0x78] sm:$0xff] %vm44_vm0, %v5821_v63 }
0x11ea   :  { %5836 = vst.msk [vmem:[%s10663_s7 + $0x70] sm:$0xff] %vm44_vm0, %v5820_v3 }

</bundles_post_ra>
